<compile_context>
chip_gen: v7x
topology: tpu7x:2x2x1
jax: 0.10.0
libtpu: 0.0.40
codegen_flags: <defaults>
</compile_context>

<pallas_src>
import math
import functools

import jax
import jax.numpy as jnp
from jax import lax
from jax.experimental import pallas as pl
from jax.experimental.pallas import tpu as pltpu


# ----------------------------------------------------------------------------- #
# Helper functions used by the PyTorch module's __init__.
# ----------------------------------------------------------------------------- #
def prime_factors(n):
    f, p = [], 2
    while p * p <= n:
        while n % p == 0:
            f.append(p)
            n //= p
        p += 1
    if n > 1:
        f.append(n)
    return f


def is_power2(n):
    return n != 0 and (n & (n - 1)) == 0


def calculate_padding(kernel_size, stride=1, in_size=0):
    if in_size == 0:
        return kernel_size - stride
    out_size = -(-in_size // stride)
    return ((out_size - 1) * stride + kernel_size - in_size) // 2


def calculate_output_length(length, kernel_size, stride=1, padding=0, dilation=1):
    return (length + 2 * padding - dilation * (kernel_size - 1) - 1) // stride + 1


def _round_up(x, m):
    return ((x + m - 1) // m) * m


# ----------------------------------------------------------------------------- #
# Pallas kernel 1: fused  (X @ W + b) -> BatchNorm(train, batch stats) -> act
# X, W are bf16 (f32 accumulation); output channels are padded to a multiple of
# 128 so the store is lane-dense.  bias/gamma/beta arrive packed in one ref.
# ----------------------------------------------------------------------------- #
def _fused_matmul_bn_act_kernel(x_ref, w_ref, p_ref, o_ref, *, act, use_bn, eps):
    y = jnp.dot(x_ref[...], w_ref[...], preferred_element_type=jnp.float32)
    y = y + p_ref[0:1, :]                                 # bias  [1, Cp]
    if use_bn:
        # training-mode BatchNorm: stats over rows == over (N, *spatial) per channel
        mean = jnp.mean(y, axis=0, keepdims=True)
        var = jnp.mean(jnp.square(y - mean), axis=0, keepdims=True)
        y = (y - mean) * lax.rsqrt(var + eps)
        y = y * p_ref[1:2, :] + p_ref[2:3, :]             # gamma, beta
    if act == "relu":
        y = jnp.maximum(y, 0.0)
    elif act == "tanh":
        y = jnp.tanh(y)
    o_ref[...] = y


def fused_matmul_bn_act(x, w, packed, act, use_bn=True, eps=1e-5):
    """x: [M, Kp] bf16, w: [Kp, Cp] bf16, packed: [R, Cp] f32 (R=3 if BN else 1)."""
    M, K = x.shape
    _, C = w.shape
    R = packed.shape[0]
    kernel = functools.partial(_fused_matmul_bn_act_kernel,
                               act=act, use_bn=use_bn, eps=eps)
    return pl.pallas_call(
        kernel,
        out_shape=jax.ShapeDtypeStruct((M, C), jnp.float32),
        grid=(1,),
        in_specs=[
            pl.BlockSpec((M, K), lambda i: (0, 0)),
            pl.BlockSpec((K, C), lambda i: (0, 0)),
            pl.BlockSpec((R, C), lambda i: (0, 0)),
        ],
        out_specs=pl.BlockSpec((M, C), lambda i: (0, 0)),
        compiler_params=pltpu.CompilerParams(
            dimension_semantics=("arbitrary",),
            vmem_limit_bytes=32 * 1024 * 1024),
    )(x, w, packed)


def _gemm_layer(mat, w2, b, gamma, beta, act, use_bn):
    """Pad K and Cout to multiples of 128, cast operands to bf16, run the fused
    kernel, slice the channel padding back off."""
    M, K = mat.shape
    Cout = w2.shape[1]
    Kp = _round_up(K, 128)
    Cp = _round_up(Cout, 128)
    x_p = jnp.pad(mat, ((0, 0), (0, Kp - K))).astype(jnp.bfloat16)
    w_p = jnp.pad(w2, ((0, Kp - K), (0, Cp - Cout))).astype(jnp.bfloat16)
    padc = lambda a: jnp.pad(a, ((0, 0), (0, Cp - Cout)))
    if use_bn:
        packed = jnp.concatenate([padc(b), padc(gamma), padc(beta)], axis=0)
    else:
        packed = padc(b)                                  # no gamma/beta DMA
    y = fused_matmul_bn_act(x_p, w_p, packed, act, use_bn)
    return y[:, :Cout]


# ----------------------------------------------------------------------------- #
# Pallas kernel 2: GRU recurrence, grid over time, hidden state in VMEM scratch.
# The input projection (x @ Wih + b_ih for all T) is precomputed (hoisted) and fed
# in as `gi`.  Gate weights are concatenated with each gate in its own 128-lane
# slot, so one h @ Whh matmul per step produces all three gates lane-aligned.
# PyTorch GRU math: r,z = sigmoid(...); n = tanh(Wx + r*(Wh h + bh)); h = (1-z)n + z h
# ----------------------------------------------------------------------------- #
GATE_PAD = 128   # lane width reserved per gate (>= hidden size, lane-aligned slices)


def _gru_kernel(gi_ref, whh_ref, bhh_ref, y_ref, h_ref):
    GP = GATE_PAD
    t = pl.program_id(0)

    @pl.when(t == 0)
    def _():
        h_ref[...] = jnp.zeros_like(h_ref)

    h = h_ref[...]                                        # [B, GP] f32
    gi = gi_ref[0]                                        # [B, 3*GP] f32 (precomputed)
    gh = jnp.dot(h.astype(jnp.bfloat16), whh_ref[...],
                 preferred_element_type=jnp.float32) + bhh_ref[...]   # [B, 3*GP]

    r = jax.nn.sigmoid(gi[:, 0:GP] + gh[:, 0:GP])
    z = jax.nn.sigmoid(gi[:, GP:2 * GP] + gh[:, GP:2 * GP])
    n = jnp.tanh(gi[:, 2 * GP:3 * GP] + r * gh[:, 2 * GP:3 * GP])
    h_new = (1.0 - z) * n + z * h

    h_ref[...] = h_new
    y_ref[0] = h_new                                      # lane-dense [B, 128] store


def gru_forward(x_tbi, gru_p):
    """x_tbi: [T, B, I] (seq-major). Returns y: [T, B, H]. h0 = zeros."""
    T, B, I = x_tbi.shape
    GP = GATE_PAD
    H = gru_p["H"]
    Ip = gru_p["wih"].shape[0]

    # Hoisted input projection for all T steps: one [T*B, Ip] @ [Ip, 3*GP] GEMM.
    x2 = x_tbi.reshape(T * B, I)
    x2 = jnp.pad(x2, ((0, 0), (0, Ip - I))).astype(jnp.bfloat16)
    gi = fused_matmul_bn_act(x2, gru_p["wih"], gru_p["bih"], act=None, use_bn=False)
    gi = gi.reshape(T, B, 3 * GP)

    y = pl.pallas_call(
        _gru_kernel,
        out_shape=jax.ShapeDtypeStruct((T, B, GP), jnp.float32),
        grid=(T,),
        in_specs=[
            pl.BlockSpec((1, B, 3 * GP), lambda t: (t, 0, 0)),
            pl.BlockSpec((GP, 3 * GP), lambda t: (0, 0)),
            pl.BlockSpec((1, 3 * GP), lambda t: (0, 0)),
        ],
        out_specs=pl.BlockSpec((1, B, GP), lambda t: (t, 0, 0)),
        scratch_shapes=[pltpu.VMEM((B, GP), jnp.float32)],
        # Hidden-state carry requires sequential execution: keep "arbitrary".
        compiler_params=pltpu.CompilerParams(dimension_semantics=("arbitrary",)),
    )(gi, gru_p["whh"], gru_p["bhh"])
    return y[:, :, :H]


# ----------------------------------------------------------------------------- #
# im2col glue (plain JAX): patch extraction only; matmul stays in the kernel.
# ----------------------------------------------------------------------------- #
def im2col2d(x, kh, kw, stride, pad):
    N, C, H, W = x.shape
    xp = jnp.pad(x, ((0, 0), (0, 0), (pad, pad), (pad, pad)))
    Ho = (H + 2 * pad - kh) // stride + 1
    Wo = (W + 2 * pad - kw) // stride + 1
    cols = []
    for i in range(kh):
        for j in range(kw):
            cols.append(xp[:, :, i:i + stride * Ho:stride, j:j + stride * Wo:stride])
    pat = jnp.stack(cols, axis=2)                                 # [N, C, kh*kw, Ho, Wo]
    mat = pat.reshape(N, C * kh * kw, Ho, Wo).transpose(0, 2, 3, 1)
    return mat.reshape(N * Ho * Wo, C * kh * kw), Ho, Wo


def im2col1d(x, k, stride, pad):
    N, C, L = x.shape
    xp = jnp.pad(x, ((0, 0), (0, 0), (pad, pad)))
    Lo = (L + 2 * pad - k) // stride + 1
    cols = [xp[:, :, j:j + stride * Lo:stride] for j in range(k)]  # each [N, C, Lo]
    pat = jnp.stack(cols, axis=2)                                  # [N, C, k, Lo]
    mat = pat.reshape(N, C * k, Lo).transpose(0, 2, 1)
    return mat.reshape(N * Lo, C * k), Lo


def conv2d_layer(x, layer):
    p = layer["params"]
    w = p["w"]                                  # [Cout, Cin, kh, kw]
    Cout, Cin, kh, kw = w.shape
    mat, Ho, Wo = im2col2d(x, kh, kw, layer["stride"], layer["pad"])
    w2 = w.reshape(Cout, Cin * kh * kw).T
    y = _gemm_layer(mat, w2, p["b"], p["gamma"], p["beta"],
                    layer["act"], layer["use_bn"])
    N = x.shape[0]
    return y.reshape(N, Ho, Wo, Cout).transpose(0, 3, 1, 2)


def conv1d_layer(x, layer):
    p = layer["params"]
    w = p["w"]                                  # [Cout, Cin, k]
    Cout, Cin, k = w.shape
    mat, Lo = im2col1d(x, k, layer["stride"], layer["pad"])
    w2 = w.reshape(Cout, Cin * k).T
    y = _gemm_layer(mat, w2, p["b"], p["gamma"], p["beta"],
                    layer["act"], layer["use_bn"])
    N = x.shape[0]
    return y.reshape(N, Lo, Cout).transpose(0, 2, 1)


# ----------------------------------------------------------------------------- #
# Deterministic parameter initialization (mirrors the module's __init__ shapes)
# ----------------------------------------------------------------------------- #
def init_conv2d(key, cin, cout, kh, kw):
    kw_, kb_ = jax.random.split(key)
    fan_in = cin * kh * kw
    return dict(
        w=jax.random.normal(kw_, (cout, cin, kh, kw), jnp.float32) / math.sqrt(fan_in),
        b=0.01 * jax.random.normal(kb_, (1, cout), jnp.float32),
        gamma=jnp.ones((1, cout), jnp.float32),
        beta=jnp.zeros((1, cout), jnp.float32),
    )


def init_conv1d(key, cin, cout, k):
    kw_, kb_ = jax.random.split(key)
    fan_in = cin * k
    return dict(
        w=jax.random.normal(kw_, (cout, cin, k), jnp.float32) / math.sqrt(fan_in),
        b=0.01 * jax.random.normal(kb_, (1, cout), jnp.float32),
        gamma=jnp.ones((1, cout), jnp.float32),
        beta=jnp.zeros((1, cout), jnp.float32),
    )


def init_gru(key, input_size, hidden_size):
    k1, k2, k3, k4 = jax.random.split(key, 4)
    s = 1.0 / math.sqrt(hidden_size)
    u = lambda k, shp: jax.random.uniform(k, shp, jnp.float32, -s, s)
    return dict(
        wih=u(k1, (3, input_size, hidden_size)),   # gates ordered (r, z, n)
        whh=u(k2, (3, hidden_size, hidden_size)),
        bih=u(k3, (3, 1, hidden_size)),
        bhh=u(k4, (3, 1, hidden_size)),
    )


def prep_gru(gru, input_size, hidden_size):
    """Concatenate gate weights with each gate in its own 128-lane slot; pad the
    contraction dims to multiples of 128; cast weight matrices to bf16."""
    GP = GATE_PAD
    I, H = input_size, hidden_size
    Ip = _round_up(I, 128)
    wih = jnp.zeros((Ip, 3 * GP), jnp.float32)
    whh = jnp.zeros((GP, 3 * GP), jnp.float32)
    bih = jnp.zeros((1, 3 * GP), jnp.float32)
    bhh = jnp.zeros((1, 3 * GP), jnp.float32)
    for g in range(3):
        wih = wih.at[:I, g * GP:g * GP + H].set(gru["wih"][g])
        whh = whh.at[:H, g * GP:g * GP + H].set(gru["whh"][g])
        bih = bih.at[:, g * GP:g * GP + H].set(gru["bih"][g])
        bhh = bhh.at[:, g * GP:g * GP + H].set(gru["bhh"][g])
    return dict(wih=wih.astype(jnp.bfloat16), whh=whh.astype(jnp.bfloat16),
                bih=bih, bhh=bhh, H=H)


def build_image_encoder(key, cfg, img_size):
    stable = max(img_size) if is_power2(max(img_size)) else min(img_size)
    fh = int(4 * img_size[0] // stable) + 4
    fw = int(4 * img_size[1] // stable) + 3
    padding = calculate_padding(cfg["kernel_size"], cfg["stride"])
    num_layers = int(math.log2(max(img_size))) - 2
    hid_d = cfg["hid_d"]
    layers = []
    for i in range(num_layers - 1):
        cin = 3 if i == 0 else hid_d
        key, sk = jax.random.split(key)
        layers.append(dict(params=init_conv2d(sk, cin, hid_d * 2,
                                              cfg["kernel_size"], cfg["kernel_size"]),
                           stride=cfg["stride"], pad=padding // 2,
                           act="relu", use_bn=True))
        hid_d *= 2
    key, sk = jax.random.split(key)
    layers.append(dict(params=init_conv2d(sk, hid_d, cfg["out_d"], fh, fw),
                       stride=1, pad=0, act="tanh", use_bn=False))
    return layers


def build_audio_encoder(key, cfg):
    hid_d, out_d = cfg["hid_d"], cfg["out_d"]
    features = cfg["audio_length"] * cfg["sample_rate"]
    strides = prime_factors(features)
    kernels = [2 * s for s in strides]
    paddings = [calculate_padding(kernels[i], strides[i], features)
                for i in range(len(strides))]
    layers = []
    for i in range(len(strides)):
        features = calculate_output_length(features, kernels[i],
                                           stride=strides[i], padding=paddings[i])
        if i == 0:
            cin, cout = 1, hid_d
        else:
            cin, cout = hid_d, hid_d * 2
        key, sk = jax.random.split(key)
        layers.append(dict(params=init_conv1d(sk, cin, cout, kernels[i]),
                           stride=strides[i], pad=paddings[i],
                           act="relu", use_bn=True))
        if i != 0:
            hid_d *= 2
    key, sk = jax.random.split(key)
    layers.append(dict(params=init_conv1d(sk, hid_d, out_d, features),
                       stride=1, pad=0, act="tanh", use_bn=True))
    key, sk = jax.random.split(key)
    gru = init_gru(sk, cfg["gru"]["input_size"], cfg["gru"]["hidden_size"])
    gru_p = prep_gru(gru, cfg["gru"]["input_size"], cfg["gru"]["hidden_size"])
    return dict(layers=layers, gru=gru_p)


def build_encoder_params(key, config, img_size):
    k_img, k_aud, k_noise = jax.random.split(key, 3)
    noise_gru = init_gru(k_noise, config["noise_generator"]["input_size"],
                         config["noise_generator"]["hidden_size"])
    # TODO(synk): emotion_encoder (Embedding+Linear+ReLU) is not built/used —
    # forward is exercised with emotion=None (the emotion branch in the original
    # code is also malformed torch.cat usage).
    return dict(
        image_encoder=build_image_encoder(k_img, config["image_encoder"], img_size),
        audio_encoder=build_audio_encoder(k_aud, config["audio_encoder"]),
        noise_encoder=prep_gru(noise_gru,
                               config["noise_generator"]["input_size"],
                               config["noise_generator"]["hidden_size"]),
    )


# ----------------------------------------------------------------------------- #
# Forward passes
# ----------------------------------------------------------------------------- #
def image_encoder_forward(layers, x):
    img_latent = []
    for layer in layers:
        x = conv2d_layer(x, layer)
        img_latent.append(x)
    last = img_latent[-1]                                  # [N, out_d, 1, 1]
    img_latent[-1] = jnp.squeeze(jnp.squeeze(last, axis=-1), axis=-1)
    return img_latent


def audio_encoder_forward(ae, audio):
    z = audio                                              # [N, 1, L]
    for layer in ae["layers"]:
        z = conv1d_layer(z, layer)                         # -> [N, out_d, 1]
    # GRU is batch_first=True: input [N, L=1, out_d] -> seq-major [1, N, out_d]
    x_tbi = jnp.transpose(z, (2, 0, 1))
    y = gru_forward(x_tbi, ae["gru"])                      # [1, N, H]
    y_bf = jnp.transpose(y, (1, 0, 2))                     # [N, 1, H]
    return jnp.squeeze(jnp.transpose(y_bf, (0, 2, 1)), axis=-1)   # [N, H]


def encoder_forward(params, img, audio, noise_key):
    N = audio.shape[0]
    # torch.FloatTensor(N,1,256).normal_(0, 0.33)
    noise = 0.33 * jax.random.normal(noise_key, (N, 1, 256), jnp.float32)
    # img.expand(N, ...) — identity frame broadcast across the N audio frames
    img_b = jnp.broadcast_to(img[None], (N,) + img.shape)  # [N, 3, H, W]

    # noise GRU: batch_first=False, input [seq=N, batch=1, 256]; the reference
    # applies an explicit F.tanh on top of the GRU hidden-state output.
    noise_z = jnp.tanh(gru_forward(noise, params["noise_encoder"]))   # [N, 1, Hn]

    audio_z = audio_encoder_forward(params["audio_encoder"], audio)   # [N, Ha]
    img_zs = image_encoder_forward(params["image_encoder"], img_b)

    out = jnp.concatenate(
        (img_zs[-1], audio_z, jnp.squeeze(noise_z, axis=1)), axis=-1)
    return out, img_zs


# ----------------------------------------------------------------------------- #
CONFIG = {
    "image_encoder": {"hid_d": 4, "out_d": 8, "kernel_size": 4, "stride": 2},
    "audio_encoder": {"hid_d": 4, "out_d": 8, "audio_length": 1, "sample_rate": 16,
                      "gru": {"input_size": 8, "hidden_size": 8, "num_layers": 1}},
    "noise_generator": {"input_size": 256, "hidden_size": 16, "num_layers": 1},
    "emotion_enc": {"n_emos": 6, "hid_d": 8},
}
IMG_SIZE = (32, 24)          # H, W  (max is a power of 2, as the module expects)


if __name__ == "__main__":
    key = jax.random.PRNGKey(0)
    k_img, k_aud, k_noise, k_params = jax.random.split(key, 4)

    N = 2                                             # number of audio frames
    H, W = IMG_SIZE
    L = CONFIG["audio_encoder"]["audio_length"] * CONFIG["audio_encoder"]["sample_rate"]

    img = jax.random.normal(k_img, (3, H, W), jnp.float32)       # identity frame
    audio = jax.random.normal(k_aud, (N, 1, L), jnp.float32)     # [N, 1, L]

    params = build_encoder_params(k_params, CONFIG, IMG_SIZE)

    # Compile the whole forward as one program (params closed over as constants) to
    # cut per-pallas_call dispatch overhead — the model is launch-latency bound.
    fwd = jax.jit(lambda i, a, nk: encoder_forward(params, i, a, nk))

    out, img_zs = fwd(img, audio, k_noise)
    out = jax.block_until_ready(out)
    img_zs = [jax.block_until_ready(z) for z in img_zs]

    expected_cols = (CONFIG["image_encoder"]["out_d"]
                     + CONFIG["audio_encoder"]["gru"]["hidden_size"]
                     + CONFIG["noise_generator"]["hidden_size"])
    assert out.shape == (N, expected_cols), out.shape
    assert img_zs[0].shape == (N, 8, 16, 12), img_zs[0].shape
    assert img_zs[1].shape == (N, 16, 8, 6), img_zs[1].shape
    assert img_zs[-1].shape == (N, 8), img_zs[-1].shape
    assert bool(jnp.all(jnp.isfinite(out)))

    print("KERNEL_OK")
</pallas_src>

<mosaic_0001>
module attributes {stable_mosaic.version = 11 : i64} {
  func.func @_fused_matmul_bn_act_kernel(%arg0: i32, %arg1: memref<384x128xbf16, #tpu.memory_space<vmem>>, %arg2: memref<128x128xbf16, #tpu.memory_space<vmem>>, %arg3: memref<3x128xf32, #tpu.memory_space<vmem>>, %arg4: memref<384x128xf32, #tpu.memory_space<vmem>>) attributes {dimension_semantics = [#tpu.dimension_semantics<arbitrary>], iteration_bounds = array<i64: 1>, scalar_prefetch = 0 : i64, scratch_operands = 0 : i64, tpu.core_type = #tpu.core_type<tc>, window_params = [{pipeline_mode = #tpu.pipeline_mode<synchronous>, transform_indices = @transform_0, window_bounds = array<i64: 384, 128>}, {pipeline_mode = #tpu.pipeline_mode<synchronous>, transform_indices = @transform_1, window_bounds = array<i64: 128, 128>}, {pipeline_mode = #tpu.pipeline_mode<synchronous>, transform_indices = @transform_2, window_bounds = array<i64: 3, 128>}, {pipeline_mode = #tpu.pipeline_mode<synchronous>, transform_indices = @transform_3, window_bounds = array<i64: 384, 128>}]} {
    %c0 = arith.constant 0 : index
    %c0_0 = arith.constant 0 : index
    %0 = vector.load %arg1[%c0, %c0_0] : memref<384x128xbf16, #tpu.memory_space<vmem>>, vector<384x128xbf16>
    %c0_1 = arith.constant 0 : index
    %c0_2 = arith.constant 0 : index
    %1 = vector.load %arg2[%c0_1, %c0_2] : memref<128x128xbf16, #tpu.memory_space<vmem>>, vector<128x128xbf16>
    %cst = arith.constant dense<0.000000e+00> : vector<384x128xf32>
    %2 = tpu.matmul %0, %1, %cst {dimension_numbers = #tpu.dot_dimension_numbers<[1], [0], [0], [1], [0, 0, 1, 1], [], []>} : vector<384x128xbf16>, vector<128x128xbf16>, vector<384x128xf32> -> vector<384x128xf32>
    %c0_3 = arith.constant 0 : index
    %c0_4 = arith.constant 0 : index
    %3 = vector.load %arg3[%c0_3, %c0_4] : memref<3x128xf32, #tpu.memory_space<vmem>>, vector<1x128xf32>
    %4 = vector.broadcast %3 : vector<1x128xf32> to vector<384x128xf32>
    %5 = arith.addf %2, %4 : vector<384x128xf32>
    %cst_5 = arith.constant dense<0.000000e+00> : vector<128xf32>
    %6 = vector.multi_reduction <add>, %5, %cst_5 [0] : vector<384x128xf32> to vector<128xf32>
    %7 = vector.shape_cast %6 : vector<128xf32> to vector<1x128xf32>
    %cst_6 = arith.constant 3.840000e+02 : f32
    %8 = vector.broadcast %cst_6 : f32 to vector<1x128xf32>
    %9 = arith.divf %7, %8 : vector<1x128xf32>
    %10 = vector.broadcast %9 : vector<1x128xf32> to vector<384x128xf32>
    %11 = arith.subf %5, %10 : vector<384x128xf32>
    %12 = arith.mulf %11, %11 : vector<384x128xf32>
    %cst_7 = arith.constant dense<0.000000e+00> : vector<128xf32>
    %13 = vector.multi_reduction <add>, %12, %cst_7 [0] : vector<384x128xf32> to vector<128xf32>
    %14 = vector.shape_cast %13 : vector<128xf32> to vector<1x128xf32>
    %cst_8 = arith.constant 3.840000e+02 : f32
    %15 = vector.broadcast %cst_8 : f32 to vector<1x128xf32>
    %16 = arith.divf %14, %15 : vector<1x128xf32>
    %17 = vector.broadcast %9 : vector<1x128xf32> to vector<384x128xf32>
    %18 = arith.subf %5, %17 : vector<384x128xf32>
    %cst_9 = arith.constant 9.99999974E-6 : f32
    %19 = vector.broadcast %cst_9 : f32 to vector<1x128xf32>
    %20 = arith.addf %16, %19 : vector<1x128xf32>
    %21 = math.rsqrt %20 : vector<1x128xf32>
    %22 = vector.broadcast %21 : vector<1x128xf32> to vector<384x128xf32>
    %23 = arith.mulf %18, %22 : vector<384x128xf32>
    %c1 = arith.constant 1 : index
    %c0_10 = arith.constant 0 : index
    %24 = vector.load %arg3[%c1, %c0_10] : memref<3x128xf32, #tpu.memory_space<vmem>>, vector<1x128xf32>
    %25 = vector.broadcast %24 : vector<1x128xf32> to vector<384x128xf32>
    %26 = arith.mulf %23, %25 : vector<384x128xf32>
    %c2 = arith.constant 2 : index
    %c0_11 = arith.constant 0 : index
    %27 = vector.load %arg3[%c2, %c0_11] : memref<3x128xf32, #tpu.memory_space<vmem>>, vector<1x128xf32>
    %28 = vector.broadcast %27 : vector<1x128xf32> to vector<384x128xf32>
    %29 = arith.addf %26, %28 : vector<384x128xf32>
    %cst_12 = arith.constant 0.000000e+00 : f32
    %30 = vector.broadcast %cst_12 : f32 to vector<384x128xf32>
    %31 = arith.maximumf %29, %30 : vector<384x128xf32>
    %c0_13 = arith.constant 0 : index
    %c0_14 = arith.constant 0 : index
    %32 = vector.load %arg4[%c0_13, %c0_14] : memref<384x128xf32, #tpu.memory_space<vmem>>, vector<384x128xf32>
    tpu.vector_store %arg4[%c0_13, %c0_14], %31 {strides = array<i32>} : memref<384x128xf32, #tpu.memory_space<vmem>>, vector<384x128xf32>,
    return
  }
  func.func @transform_0(%arg0: i32) -> (i32, i32) {
    %c0_i32 = arith.constant 0 : i32
    %c0_i32_0 = arith.constant 0 : i32
    %c0_i32_1 = arith.constant 0 : i32
    return %c0_i32, %c0_i32_0 : i32, i32
  }
  func.func @transform_1(%arg0: i32) -> (i32, i32) {
    %c0_i32 = arith.constant 0 : i32
    %c0_i32_0 = arith.constant 0 : i32
    %c0_i32_1 = arith.constant 0 : i32
    return %c0_i32, %c0_i32_0 : i32, i32
  }
  func.func @transform_2(%arg0: i32) -> (i32, i32) {
    %c0_i32 = arith.constant 0 : i32
    %c0_i32_0 = arith.constant 0 : i32
    %c0_i32_1 = arith.constant 0 : i32
    return %c0_i32, %c0_i32_0 : i32, i32
  }
  func.func @transform_3(%arg0: i32) -> (i32, i32) {
    %c0_i32 = arith.constant 0 : i32
    %c0_i32_0 = arith.constant 0 : i32
    %c0_i32_1 = arith.constant 0 : i32
    return %c0_i32, %c0_i32_0 : i32, i32
  }
}

module attributes {stable_mosaic.version = 11 : i64} {
  func.func @_fused_matmul_bn_act_kernel(%arg0: i32, %arg1: memref<96x128xbf16, #tpu.memory_space<vmem>>, %arg2: memref<128x128xbf16, #tpu.memory_space<vmem>>, %arg3: memref<3x128xf32, #tpu.memory_space<vmem>>, %arg4: memref<96x128xf32, #tpu.memory_space<vmem>>) attributes {dimension_semantics = [#tpu.dimension_semantics<arbitrary>], iteration_bounds = array<i64: 1>, scalar_prefetch = 0 : i64, scratch_operands = 0 : i64, tpu.core_type = #tpu.core_type<tc>, window_params = [{pipeline_mode = #tpu.pipeline_mode<synchronous>, transform_indices = @transform_0, window_bounds = array<i64: 96, 128>}, {pipeline_mode = #tpu.pipeline_mode<synchronous>, transform_indices = @transform_1, window_bounds = array<i64: 128, 128>}, {pipeline_mode = #tpu.pipeline_mode<synchronous>, transform_indices = @transform_2, window_bounds = array<i64: 3, 128>}, {pipeline_mode = #tpu.pipeline_mode<synchronous>, transform_indices = @transform_3, window_bounds = array<i64: 96, 128>}]} {
    %c0 = arith.constant 0 : index
    %c0_0 = arith.constant 0 : index
    %0 = vector.load %arg1[%c0, %c0_0] : memref<96x128xbf16, #tpu.memory_space<vmem>>, vector<96x128xbf16>
    %c0_1 = arith.constant 0 : index
    %c0_2 = arith.constant 0 : index
    %1 = vector.load %arg2[%c0_1, %c0_2] : memref<128x128xbf16, #tpu.memory_space<vmem>>, vector<128x128xbf16>
    %cst = arith.constant dense<0.000000e+00> : vector<96x128xf32>
    %2 = tpu.matmul %0, %1, %cst {dimension_numbers = #tpu.dot_dimension_numbers<[1], [0], [0], [1], [0, 0, 1, 1], [], []>} : vector<96x128xbf16>, vector<128x128xbf16>, vector<96x128xf32> -> vector<96x128xf32>
    %c0_3 = arith.constant 0 : index
    %c0_4 = arith.constant 0 : index
    %3 = vector.load %arg3[%c0_3, %c0_4] : memref<3x128xf32, #tpu.memory_space<vmem>>, vector<1x128xf32>
    %4 = vector.broadcast %3 : vector<1x128xf32> to vector<96x128xf32>
    %5 = arith.addf %2, %4 : vector<96x128xf32>
    %cst_5 = arith.constant dense<0.000000e+00> : vector<128xf32>
    %6 = vector.multi_reduction <add>, %5, %cst_5 [0] : vector<96x128xf32> to vector<128xf32>
    %7 = vector.shape_cast %6 : vector<128xf32> to vector<1x128xf32>
    %cst_6 = arith.constant 9.600000e+01 : f32
    %8 = vector.broadcast %cst_6 : f32 to vector<1x128xf32>
    %9 = arith.divf %7, %8 : vector<1x128xf32>
    %10 = vector.broadcast %9 : vector<1x128xf32> to vector<96x128xf32>
    %11 = arith.subf %5, %10 : vector<96x128xf32>
    %12 = arith.mulf %11, %11 : vector<96x128xf32>
    %cst_7 = arith.constant dense<0.000000e+00> : vector<128xf32>
    %13 = vector.multi_reduction <add>, %12, %cst_7 [0] : vector<96x128xf32> to vector<128xf32>
    %14 = vector.shape_cast %13 : vector<128xf32> to vector<1x128xf32>
    %cst_8 = arith.constant 9.600000e+01 : f32
    %15 = vector.broadcast %cst_8 : f32 to vector<1x128xf32>
    %16 = arith.divf %14, %15 : vector<1x128xf32>
    %17 = vector.broadcast %9 : vector<1x128xf32> to vector<96x128xf32>
    %18 = arith.subf %5, %17 : vector<96x128xf32>
    %cst_9 = arith.constant 9.99999974E-6 : f32
    %19 = vector.broadcast %cst_9 : f32 to vector<1x128xf32>
    %20 = arith.addf %16, %19 : vector<1x128xf32>
    %21 = math.rsqrt %20 : vector<1x128xf32>
    %22 = vector.broadcast %21 : vector<1x128xf32> to vector<96x128xf32>
    %23 = arith.mulf %18, %22 : vector<96x128xf32>
    %c1 = arith.constant 1 : index
    %c0_10 = arith.constant 0 : index
    %24 = vector.load %arg3[%c1, %c0_10] : memref<3x128xf32, #tpu.memory_space<vmem>>, vector<1x128xf32>
    %25 = vector.broadcast %24 : vector<1x128xf32> to vector<96x128xf32>
    %26 = arith.mulf %23, %25 : vector<96x128xf32>
    %c2 = arith.constant 2 : index
    %c0_11 = arith.constant 0 : index
    %27 = vector.load %arg3[%c2, %c0_11] : memref<3x128xf32, #tpu.memory_space<vmem>>, vector<1x128xf32>
    %28 = vector.broadcast %27 : vector<1x128xf32> to vector<96x128xf32>
    %29 = arith.addf %26, %28 : vector<96x128xf32>
    %cst_12 = arith.constant 0.000000e+00 : f32
    %30 = vector.broadcast %cst_12 : f32 to vector<96x128xf32>
    %31 = arith.maximumf %29, %30 : vector<96x128xf32>
    %c0_13 = arith.constant 0 : index
    %c0_14 = arith.constant 0 : index
    %32 = vector.load %arg4[%c0_13, %c0_14] : memref<96x128xf32, #tpu.memory_space<vmem>>, vector<96x128xf32>
    tpu.vector_store %arg4[%c0_13, %c0_14], %31 {strides = array<i32>} : memref<96x128xf32, #tpu.memory_space<vmem>>, vector<96x128xf32>,
    return
  }
  func.func @transform_0(%arg0: i32) -> (i32, i32) {
    %c0_i32 = arith.constant 0 : i32
    %c0_i32_0 = arith.constant 0 : i32
    %c0_i32_1 = arith.constant 0 : i32
    return %c0_i32, %c0_i32_0 : i32, i32
  }
  func.func @transform_1(%arg0: i32) -> (i32, i32) {
    %c0_i32 = arith.constant 0 : i32
    %c0_i32_0 = arith.constant 0 : i32
    %c0_i32_1 = arith.constant 0 : i32
    return %c0_i32, %c0_i32_0 : i32, i32
  }
  func.func @transform_2(%arg0: i32) -> (i32, i32) {
    %c0_i32 = arith.constant 0 : i32
    %c0_i32_0 = arith.constant 0 : i32
    %c0_i32_1 = arith.constant 0 : i32
    return %c0_i32, %c0_i32_0 : i32, i32
  }
  func.func @transform_3(%arg0: i32) -> (i32, i32) {
    %c0_i32 = arith.constant 0 : i32
    %c0_i32_0 = arith.constant 0 : i32
    %c0_i32_1 = arith.constant 0 : i32
    return %c0_i32, %c0_i32_0 : i32, i32
  }
}

module attributes {stable_mosaic.version = 11 : i64} {
  func.func @_fused_matmul_bn_act_kernel(%arg0: i32, %arg1: memref<2x768xbf16, #tpu.memory_space<vmem>>, %arg2: memref<768x128xbf16, #tpu.memory_space<vmem>>, %arg3: memref<1x128xf32, #tpu.memory_space<vmem>>, %arg4: memref<2x128xf32, #tpu.memory_space<vmem>>) attributes {dimension_semantics = [#tpu.dimension_semantics<arbitrary>], iteration_bounds = array<i64: 1>, scalar_prefetch = 0 : i64, scratch_operands = 0 : i64, tpu.core_type = #tpu.core_type<tc>, window_params = [{pipeline_mode = #tpu.pipeline_mode<synchronous>, transform_indices = @transform_0, window_bounds = array<i64: 2, 768>}, {pipeline_mode = #tpu.pipeline_mode<synchronous>, transform_indices = @transform_1, window_bounds = array<i64: 768, 128>}, {pipeline_mode = #tpu.pipeline_mode<synchronous>, transform_indices = @transform_2, window_bounds = array<i64: 1, 128>}, {pipeline_mode = #tpu.pipeline_mode<synchronous>, transform_indices = @transform_3, window_bounds = array<i64: 2, 128>}]} {
    %c0 = arith.constant 0 : index
    %c0_0 = arith.constant 0 : index
    %0 = vector.load %arg1[%c0, %c0_0] : memref<2x768xbf16, #tpu.memory_space<vmem>>, vector<2x768xbf16>
    %c0_1 = arith.constant 0 : index
    %c0_2 = arith.constant 0 : index
    %1 = vector.load %arg2[%c0_1, %c0_2] : memref<768x128xbf16, #tpu.memory_space<vmem>>, vector<768x128xbf16>
    %cst = arith.constant dense<0.000000e+00> : vector<2x128xf32>
    %2 = tpu.matmul %0, %1, %cst {dimension_numbers = #tpu.dot_dimension_numbers<[1], [0], [0], [1], [0, 0, 1, 1], [], []>} : vector<2x768xbf16>, vector<768x128xbf16>, vector<2x128xf32> -> vector<2x128xf32>
    %c0_3 = arith.constant 0 : index
    %c0_4 = arith.constant 0 : index
    %3 = vector.load %arg3[%c0_3, %c0_4] : memref<1x128xf32, #tpu.memory_space<vmem>>, vector<1x128xf32>
    %4 = vector.broadcast %3 : vector<1x128xf32> to vector<2x128xf32>
    %5 = arith.addf %2, %4 : vector<2x128xf32>
    %6 = math.tanh %5 : vector<2x128xf32>
    %c0_5 = arith.constant 0 : index
    %c0_6 = arith.constant 0 : index
    %7 = vector.load %arg4[%c0_5, %c0_6] : memref<2x128xf32, #tpu.memory_space<vmem>>, vector<2x128xf32>
    tpu.vector_store %arg4[%c0_5, %c0_6], %6 {strides = array<i32>} : memref<2x128xf32, #tpu.memory_space<vmem>>, vector<2x128xf32>,
    return
  }
  func.func @transform_0(%arg0: i32) -> (i32, i32) {
    %c0_i32 = arith.constant 0 : i32
    %c0_i32_0 = arith.constant 0 : i32
    %c0_i32_1 = arith.constant 0 : i32
    return %c0_i32, %c0_i32_0 : i32, i32
  }
  func.func @transform_1(%arg0: i32) -> (i32, i32) {
    %c0_i32 = arith.constant 0 : i32
    %c0_i32_0 = arith.constant 0 : i32
    %c0_i32_1 = arith.constant 0 : i32
    return %c0_i32, %c0_i32_0 : i32, i32
  }
  func.func @transform_2(%arg0: i32) -> (i32, i32) {
    %c0_i32 = arith.constant 0 : i32
    %c0_i32_0 = arith.constant 0 : i32
    %c0_i32_1 = arith.constant 0 : i32
    return %c0_i32, %c0_i32_0 : i32, i32
  }
  func.func @transform_3(%arg0: i32) -> (i32, i32) {
    %c0_i32 = arith.constant 0 : i32
    %c0_i32_0 = arith.constant 0 : i32
    %c0_i32_1 = arith.constant 0 : i32
    return %c0_i32, %c0_i32_0 : i32, i32
  }
}

module attributes {stable_mosaic.version = 11 : i64} {
  func.func @_fused_matmul_bn_act_kernel(%arg0: i32, %arg1: memref<16x128xbf16, #tpu.memory_space<vmem>>, %arg2: memref<128x128xbf16, #tpu.memory_space<vmem>>, %arg3: memref<3x128xf32, #tpu.memory_space<vmem>>, %arg4: memref<16x128xf32, #tpu.memory_space<vmem>>) attributes {dimension_semantics = [#tpu.dimension_semantics<arbitrary>], iteration_bounds = array<i64: 1>, scalar_prefetch = 0 : i64, scratch_operands = 0 : i64, tpu.core_type = #tpu.core_type<tc>, window_params = [{pipeline_mode = #tpu.pipeline_mode<synchronous>, transform_indices = @transform_0, window_bounds = array<i64: 16, 128>}, {pipeline_mode = #tpu.pipeline_mode<synchronous>, transform_indices = @transform_1, window_bounds = array<i64: 128, 128>}, {pipeline_mode = #tpu.pipeline_mode<synchronous>, transform_indices = @transform_2, window_bounds = array<i64: 3, 128>}, {pipeline_mode = #tpu.pipeline_mode<synchronous>, transform_indices = @transform_3, window_bounds = array<i64: 16, 128>}]} {
    %c0 = arith.constant 0 : index
    %c0_0 = arith.constant 0 : index
    %0 = vector.load %arg1[%c0, %c0_0] : memref<16x128xbf16, #tpu.memory_space<vmem>>, vector<16x128xbf16>
    %c0_1 = arith.constant 0 : index
    %c0_2 = arith.constant 0 : index
    %1 = vector.load %arg2[%c0_1, %c0_2] : memref<128x128xbf16, #tpu.memory_space<vmem>>, vector<128x128xbf16>
    %cst = arith.constant dense<0.000000e+00> : vector<16x128xf32>
    %2 = tpu.matmul %0, %1, %cst {dimension_numbers = #tpu.dot_dimension_numbers<[1], [0], [0], [1], [0, 0, 1, 1], [], []>} : vector<16x128xbf16>, vector<128x128xbf16>, vector<16x128xf32> -> vector<16x128xf32>
    %c0_3 = arith.constant 0 : index
    %c0_4 = arith.constant 0 : index
    %3 = vector.load %arg3[%c0_3, %c0_4] : memref<3x128xf32, #tpu.memory_space<vmem>>, vector<1x128xf32>
    %4 = vector.broadcast %3 : vector<1x128xf32> to vector<16x128xf32>
    %5 = arith.addf %2, %4 : vector<16x128xf32>
    %cst_5 = arith.constant dense<0.000000e+00> : vector<128xf32>
    %6 = vector.multi_reduction <add>, %5, %cst_5 [0] : vector<16x128xf32> to vector<128xf32>
    %7 = vector.shape_cast %6 : vector<128xf32> to vector<1x128xf32>
    %cst_6 = arith.constant 1.600000e+01 : f32
    %8 = vector.broadcast %cst_6 : f32 to vector<1x128xf32>
    %9 = arith.divf %7, %8 : vector<1x128xf32>
    %10 = vector.broadcast %9 : vector<1x128xf32> to vector<16x128xf32>
    %11 = arith.subf %5, %10 : vector<16x128xf32>
    %12 = arith.mulf %11, %11 : vector<16x128xf32>
    %cst_7 = arith.constant dense<0.000000e+00> : vector<128xf32>
    %13 = vector.multi_reduction <add>, %12, %cst_7 [0] : vector<16x128xf32> to vector<128xf32>
    %14 = vector.shape_cast %13 : vector<128xf32> to vector<1x128xf32>
    %cst_8 = arith.constant 1.600000e+01 : f32
    %15 = vector.broadcast %cst_8 : f32 to vector<1x128xf32>
    %16 = arith.divf %14, %15 : vector<1x128xf32>
    %17 = vector.broadcast %9 : vector<1x128xf32> to vector<16x128xf32>
    %18 = arith.subf %5, %17 : vector<16x128xf32>
    %cst_9 = arith.constant 9.99999974E-6 : f32
    %19 = vector.broadcast %cst_9 : f32 to vector<1x128xf32>
    %20 = arith.addf %16, %19 : vector<1x128xf32>
    %21 = math.rsqrt %20 : vector<1x128xf32>
    %22 = vector.broadcast %21 : vector<1x128xf32> to vector<16x128xf32>
    %23 = arith.mulf %18, %22 : vector<16x128xf32>
    %c1 = arith.constant 1 : index
    %c0_10 = arith.constant 0 : index
    %24 = vector.load %arg3[%c1, %c0_10] : memref<3x128xf32, #tpu.memory_space<vmem>>, vector<1x128xf32>
    %25 = vector.broadcast %24 : vector<1x128xf32> to vector<16x128xf32>
    %26 = arith.mulf %23, %25 : vector<16x128xf32>
    %c2 = arith.constant 2 : index
    %c0_11 = arith.constant 0 : index
    %27 = vector.load %arg3[%c2, %c0_11] : memref<3x128xf32, #tpu.memory_space<vmem>>, vector<1x128xf32>
    %28 = vector.broadcast %27 : vector<1x128xf32> to vector<16x128xf32>
    %29 = arith.addf %26, %28 : vector<16x128xf32>
    %cst_12 = arith.constant 0.000000e+00 : f32
    %30 = vector.broadcast %cst_12 : f32 to vector<16x128xf32>
    %31 = arith.maximumf %29, %30 : vector<16x128xf32>
    %c0_13 = arith.constant 0 : index
    %c0_14 = arith.constant 0 : index
    %32 = vector.load %arg4[%c0_13, %c0_14] : memref<16x128xf32, #tpu.memory_space<vmem>>, vector<16x128xf32>
    tpu.vector_store %arg4[%c0_13, %c0_14], %31 {strides = array<i32>} : memref<16x128xf32, #tpu.memory_space<vmem>>, vector<16x128xf32>,
    return
  }
  func.func @transform_0(%arg0: i32) -> (i32, i32) {
    %c0_i32 = arith.constant 0 : i32
    %c0_i32_0 = arith.constant 0 : i32
    %c0_i32_1 = arith.constant 0 : i32
    return %c0_i32, %c0_i32_0 : i32, i32
  }
  func.func @transform_1(%arg0: i32) -> (i32, i32) {
    %c0_i32 = arith.constant 0 : i32
    %c0_i32_0 = arith.constant 0 : i32
    %c0_i32_1 = arith.constant 0 : i32
    return %c0_i32, %c0_i32_0 : i32, i32
  }
  func.func @transform_2(%arg0: i32) -> (i32, i32) {
    %c0_i32 = arith.constant 0 : i32
    %c0_i32_0 = arith.constant 0 : i32
    %c0_i32_1 = arith.constant 0 : i32
    return %c0_i32, %c0_i32_0 : i32, i32
  }
  func.func @transform_3(%arg0: i32) -> (i32, i32) {
    %c0_i32 = arith.constant 0 : i32
    %c0_i32_0 = arith.constant 0 : i32
    %c0_i32_1 = arith.constant 0 : i32
    return %c0_i32, %c0_i32_0 : i32, i32
  }
}

module attributes {stable_mosaic.version = 11 : i64} {
  func.func @_fused_matmul_bn_act_kernel(%arg0: i32, %arg1: memref<8x128xbf16, #tpu.memory_space<vmem>>, %arg2: memref<128x128xbf16, #tpu.memory_space<vmem>>, %arg3: memref<3x128xf32, #tpu.memory_space<vmem>>, %arg4: memref<8x128xf32, #tpu.memory_space<vmem>>) attributes {dimension_semantics = [#tpu.dimension_semantics<arbitrary>], iteration_bounds = array<i64: 1>, scalar_prefetch = 0 : i64, scratch_operands = 0 : i64, tpu.core_type = #tpu.core_type<tc>, window_params = [{pipeline_mode = #tpu.pipeline_mode<synchronous>, transform_indices = @transform_0, window_bounds = array<i64: 8, 128>}, {pipeline_mode = #tpu.pipeline_mode<synchronous>, transform_indices = @transform_1, window_bounds = array<i64: 128, 128>}, {pipeline_mode = #tpu.pipeline_mode<synchronous>, transform_indices = @transform_2, window_bounds = array<i64: 3, 128>}, {pipeline_mode = #tpu.pipeline_mode<synchronous>, transform_indices = @transform_3, window_bounds = array<i64: 8, 128>}]} {
    %c0 = arith.constant 0 : index
    %c0_0 = arith.constant 0 : index
    %0 = vector.load %arg1[%c0, %c0_0] : memref<8x128xbf16, #tpu.memory_space<vmem>>, vector<8x128xbf16>
    %c0_1 = arith.constant 0 : index
    %c0_2 = arith.constant 0 : index
    %1 = vector.load %arg2[%c0_1, %c0_2] : memref<128x128xbf16, #tpu.memory_space<vmem>>, vector<128x128xbf16>
    %cst = arith.constant dense<0.000000e+00> : vector<8x128xf32>
    %2 = tpu.matmul %0, %1, %cst {dimension_numbers = #tpu.dot_dimension_numbers<[1], [0], [0], [1], [0, 0, 1, 1], [], []>} : vector<8x128xbf16>, vector<128x128xbf16>, vector<8x128xf32> -> vector<8x128xf32>
    %c0_3 = arith.constant 0 : index
    %c0_4 = arith.constant 0 : index
    %3 = vector.load %arg3[%c0_3, %c0_4] : memref<3x128xf32, #tpu.memory_space<vmem>>, vector<1x128xf32>
    %4 = vector.broadcast %3 : vector<1x128xf32> to vector<8x128xf32>
    %5 = arith.addf %2, %4 : vector<8x128xf32>
    %cst_5 = arith.constant dense<0.000000e+00> : vector<128xf32>
    %6 = vector.multi_reduction <add>, %5, %cst_5 [0] : vector<8x128xf32> to vector<128xf32>
    %7 = vector.shape_cast %6 : vector<128xf32> to vector<1x128xf32>
    %cst_6 = arith.constant 8.000000e+00 : f32
    %8 = vector.broadcast %cst_6 : f32 to vector<1x128xf32>
    %9 = arith.divf %7, %8 : vector<1x128xf32>
    %10 = vector.broadcast %9 : vector<1x128xf32> to vector<8x128xf32>
    %11 = arith.subf %5, %10 : vector<8x128xf32>
    %12 = arith.mulf %11, %11 : vector<8x128xf32>
    %cst_7 = arith.constant dense<0.000000e+00> : vector<128xf32>
    %13 = vector.multi_reduction <add>, %12, %cst_7 [0] : vector<8x128xf32> to vector<128xf32>
    %14 = vector.shape_cast %13 : vector<128xf32> to vector<1x128xf32>
    %cst_8 = arith.constant 8.000000e+00 : f32
    %15 = vector.broadcast %cst_8 : f32 to vector<1x128xf32>
    %16 = arith.divf %14, %15 : vector<1x128xf32>
    %17 = vector.broadcast %9 : vector<1x128xf32> to vector<8x128xf32>
    %18 = arith.subf %5, %17 : vector<8x128xf32>
    %cst_9 = arith.constant 9.99999974E-6 : f32
    %19 = vector.broadcast %cst_9 : f32 to vector<1x128xf32>
    %20 = arith.addf %16, %19 : vector<1x128xf32>
    %21 = math.rsqrt %20 : vector<1x128xf32>
    %22 = vector.broadcast %21 : vector<1x128xf32> to vector<8x128xf32>
    %23 = arith.mulf %18, %22 : vector<8x128xf32>
    %c1 = arith.constant 1 : index
    %c0_10 = arith.constant 0 : index
    %24 = vector.load %arg3[%c1, %c0_10] : memref<3x128xf32, #tpu.memory_space<vmem>>, vector<1x128xf32>
    %25 = vector.broadcast %24 : vector<1x128xf32> to vector<8x128xf32>
    %26 = arith.mulf %23, %25 : vector<8x128xf32>
    %c2 = arith.constant 2 : index
    %c0_11 = arith.constant 0 : index
    %27 = vector.load %arg3[%c2, %c0_11] : memref<3x128xf32, #tpu.memory_space<vmem>>, vector<1x128xf32>
    %28 = vector.broadcast %27 : vector<1x128xf32> to vector<8x128xf32>
    %29 = arith.addf %26, %28 : vector<8x128xf32>
    %cst_12 = arith.constant 0.000000e+00 : f32
    %30 = vector.broadcast %cst_12 : f32 to vector<8x128xf32>
    %31 = arith.maximumf %29, %30 : vector<8x128xf32>
    %c0_13 = arith.constant 0 : index
    %c0_14 = arith.constant 0 : index
    %32 = vector.load %arg4[%c0_13, %c0_14] : memref<8x128xf32, #tpu.memory_space<vmem>>, vector<8x128xf32>
    tpu.vector_store %arg4[%c0_13, %c0_14], %31 {strides = array<i32>} : memref<8x128xf32, #tpu.memory_space<vmem>>, vector<8x128xf32>,
    return
  }
  func.func @transform_0(%arg0: i32) -> (i32, i32) {
    %c0_i32 = arith.constant 0 : i32
    %c0_i32_0 = arith.constant 0 : i32
    %c0_i32_1 = arith.constant 0 : i32
    return %c0_i32, %c0_i32_0 : i32, i32
  }
  func.func @transform_1(%arg0: i32) -> (i32, i32) {
    %c0_i32 = arith.constant 0 : i32
    %c0_i32_0 = arith.constant 0 : i32
    %c0_i32_1 = arith.constant 0 : i32
    return %c0_i32, %c0_i32_0 : i32, i32
  }
  func.func @transform_2(%arg0: i32) -> (i32, i32) {
    %c0_i32 = arith.constant 0 : i32
    %c0_i32_0 = arith.constant 0 : i32
    %c0_i32_1 = arith.constant 0 : i32
    return %c0_i32, %c0_i32_0 : i32, i32
  }
  func.func @transform_3(%arg0: i32) -> (i32, i32) {
    %c0_i32 = arith.constant 0 : i32
    %c0_i32_0 = arith.constant 0 : i32
    %c0_i32_1 = arith.constant 0 : i32
    return %c0_i32, %c0_i32_0 : i32, i32
  }
}

module attributes {stable_mosaic.version = 11 : i64} {
  func.func @_fused_matmul_bn_act_kernel(%arg0: i32, %arg1: memref<4x128xbf16, #tpu.memory_space<vmem>>, %arg2: memref<128x128xbf16, #tpu.memory_space<vmem>>, %arg3: memref<3x128xf32, #tpu.memory_space<vmem>>, %arg4: memref<4x128xf32, #tpu.memory_space<vmem>>) attributes {dimension_semantics = [#tpu.dimension_semantics<arbitrary>], iteration_bounds = array<i64: 1>, scalar_prefetch = 0 : i64, scratch_operands = 0 : i64, tpu.core_type = #tpu.core_type<tc>, window_params = [{pipeline_mode = #tpu.pipeline_mode<synchronous>, transform_indices = @transform_0, window_bounds = array<i64: 4, 128>}, {pipeline_mode = #tpu.pipeline_mode<synchronous>, transform_indices = @transform_1, window_bounds = array<i64: 128, 128>}, {pipeline_mode = #tpu.pipeline_mode<synchronous>, transform_indices = @transform_2, window_bounds = array<i64: 3, 128>}, {pipeline_mode = #tpu.pipeline_mode<synchronous>, transform_indices = @transform_3, window_bounds = array<i64: 4, 128>}]} {
    %c0 = arith.constant 0 : index
    %c0_0 = arith.constant 0 : index
    %0 = vector.load %arg1[%c0, %c0_0] : memref<4x128xbf16, #tpu.memory_space<vmem>>, vector<4x128xbf16>
    %c0_1 = arith.constant 0 : index
    %c0_2 = arith.constant 0 : index
    %1 = vector.load %arg2[%c0_1, %c0_2] : memref<128x128xbf16, #tpu.memory_space<vmem>>, vector<128x128xbf16>
    %cst = arith.constant dense<0.000000e+00> : vector<4x128xf32>
    %2 = tpu.matmul %0, %1, %cst {dimension_numbers = #tpu.dot_dimension_numbers<[1], [0], [0], [1], [0, 0, 1, 1], [], []>} : vector<4x128xbf16>, vector<128x128xbf16>, vector<4x128xf32> -> vector<4x128xf32>
    %c0_3 = arith.constant 0 : index
    %c0_4 = arith.constant 0 : index
    %3 = vector.load %arg3[%c0_3, %c0_4] : memref<3x128xf32, #tpu.memory_space<vmem>>, vector<1x128xf32>
    %4 = vector.broadcast %3 : vector<1x128xf32> to vector<4x128xf32>
    %5 = arith.addf %2, %4 : vector<4x128xf32>
    %cst_5 = arith.constant dense<0.000000e+00> : vector<128xf32>
    %6 = vector.multi_reduction <add>, %5, %cst_5 [0] : vector<4x128xf32> to vector<128xf32>
    %7 = vector.shape_cast %6 : vector<128xf32> to vector<1x128xf32>
    %cst_6 = arith.constant 4.000000e+00 : f32
    %8 = vector.broadcast %cst_6 : f32 to vector<1x128xf32>
    %9 = arith.divf %7, %8 : vector<1x128xf32>
    %10 = vector.broadcast %9 : vector<1x128xf32> to vector<4x128xf32>
    %11 = arith.subf %5, %10 : vector<4x128xf32>
    %12 = arith.mulf %11, %11 : vector<4x128xf32>
    %cst_7 = arith.constant dense<0.000000e+00> : vector<128xf32>
    %13 = vector.multi_reduction <add>, %12, %cst_7 [0] : vector<4x128xf32> to vector<128xf32>
    %14 = vector.shape_cast %13 : vector<128xf32> to vector<1x128xf32>
    %cst_8 = arith.constant 4.000000e+00 : f32
    %15 = vector.broadcast %cst_8 : f32 to vector<1x128xf32>
    %16 = arith.divf %14, %15 : vector<1x128xf32>
    %17 = vector.broadcast %9 : vector<1x128xf32> to vector<4x128xf32>
    %18 = arith.subf %5, %17 : vector<4x128xf32>
    %cst_9 = arith.constant 9.99999974E-6 : f32
    %19 = vector.broadcast %cst_9 : f32 to vector<1x128xf32>
    %20 = arith.addf %16, %19 : vector<1x128xf32>
    %21 = math.rsqrt %20 : vector<1x128xf32>
    %22 = vector.broadcast %21 : vector<1x128xf32> to vector<4x128xf32>
    %23 = arith.mulf %18, %22 : vector<4x128xf32>
    %c1 = arith.constant 1 : index
    %c0_10 = arith.constant 0 : index
    %24 = vector.load %arg3[%c1, %c0_10] : memref<3x128xf32, #tpu.memory_space<vmem>>, vector<1x128xf32>
    %25 = vector.broadcast %24 : vector<1x128xf32> to vector<4x128xf32>
    %26 = arith.mulf %23, %25 : vector<4x128xf32>
    %c2 = arith.constant 2 : index
    %c0_11 = arith.constant 0 : index
    %27 = vector.load %arg3[%c2, %c0_11] : memref<3x128xf32, #tpu.memory_space<vmem>>, vector<1x128xf32>
    %28 = vector.broadcast %27 : vector<1x128xf32> to vector<4x128xf32>
    %29 = arith.addf %26, %28 : vector<4x128xf32>
    %cst_12 = arith.constant 0.000000e+00 : f32
    %30 = vector.broadcast %cst_12 : f32 to vector<4x128xf32>
    %31 = arith.maximumf %29, %30 : vector<4x128xf32>
    %c0_13 = arith.constant 0 : index
    %c0_14 = arith.constant 0 : index
    %32 = vector.load %arg4[%c0_13, %c0_14] : memref<4x128xf32, #tpu.memory_space<vmem>>, vector<4x128xf32>
    tpu.vector_store %arg4[%c0_13, %c0_14], %31 {strides = array<i32>} : memref<4x128xf32, #tpu.memory_space<vmem>>, vector<4x128xf32>,
    return
  }
  func.func @transform_0(%arg0: i32) -> (i32, i32) {
    %c0_i32 = arith.constant 0 : i32
    %c0_i32_0 = arith.constant 0 : i32
    %c0_i32_1 = arith.constant 0 : i32
    return %c0_i32, %c0_i32_0 : i32, i32
  }
  func.func @transform_1(%arg0: i32) -> (i32, i32) {
    %c0_i32 = arith.constant 0 : i32
    %c0_i32_0 = arith.constant 0 : i32
    %c0_i32_1 = arith.constant 0 : i32
    return %c0_i32, %c0_i32_0 : i32, i32
  }
  func.func @transform_2(%arg0: i32) -> (i32, i32) {
    %c0_i32 = arith.constant 0 : i32
    %c0_i32_0 = arith.constant 0 : i32
    %c0_i32_1 = arith.constant 0 : i32
    return %c0_i32, %c0_i32_0 : i32, i32
  }
  func.func @transform_3(%arg0: i32) -> (i32, i32) {
    %c0_i32 = arith.constant 0 : i32
    %c0_i32_0 = arith.constant 0 : i32
    %c0_i32_1 = arith.constant 0 : i32
    return %c0_i32, %c0_i32_0 : i32, i32
  }
}

module attributes {stable_mosaic.version = 11 : i64} {
  func.func @_fused_matmul_bn_act_kernel(%arg0: i32, %arg1: memref<2x128xbf16, #tpu.memory_space<vmem>>, %arg2: memref<128x128xbf16, #tpu.memory_space<vmem>>, %arg3: memref<3x128xf32, #tpu.memory_space<vmem>>, %arg4: memref<2x128xf32, #tpu.memory_space<vmem>>) attributes {dimension_semantics = [#tpu.dimension_semantics<arbitrary>], iteration_bounds = array<i64: 1>, scalar_prefetch = 0 : i64, scratch_operands = 0 : i64, tpu.core_type = #tpu.core_type<tc>, window_params = [{pipeline_mode = #tpu.pipeline_mode<synchronous>, transform_indices = @transform_0, window_bounds = array<i64: 2, 128>}, {pipeline_mode = #tpu.pipeline_mode<synchronous>, transform_indices = @transform_1, window_bounds = array<i64: 128, 128>}, {pipeline_mode = #tpu.pipeline_mode<synchronous>, transform_indices = @transform_2, window_bounds = array<i64: 3, 128>}, {pipeline_mode = #tpu.pipeline_mode<synchronous>, transform_indices = @transform_3, window_bounds = array<i64: 2, 128>}]} {
    %c0 = arith.constant 0 : index
    %c0_0 = arith.constant 0 : index
    %0 = vector.load %arg1[%c0, %c0_0] : memref<2x128xbf16, #tpu.memory_space<vmem>>, vector<2x128xbf16>
    %c0_1 = arith.constant 0 : index
    %c0_2 = arith.constant 0 : index
    %1 = vector.load %arg2[%c0_1, %c0_2] : memref<128x128xbf16, #tpu.memory_space<vmem>>, vector<128x128xbf16>
    %cst = arith.constant dense<0.000000e+00> : vector<2x128xf32>
    %2 = tpu.matmul %0, %1, %cst {dimension_numbers = #tpu.dot_dimension_numbers<[1], [0], [0], [1], [0, 0, 1, 1], [], []>} : vector<2x128xbf16>, vector<128x128xbf16>, vector<2x128xf32> -> vector<2x128xf32>
    %c0_3 = arith.constant 0 : index
    %c0_4 = arith.constant 0 : index
    %3 = vector.load %arg3[%c0_3, %c0_4] : memref<3x128xf32, #tpu.memory_space<vmem>>, vector<1x128xf32>
    %4 = vector.broadcast %3 : vector<1x128xf32> to vector<2x128xf32>
    %5 = arith.addf %2, %4 : vector<2x128xf32>
    %cst_5 = arith.constant dense<0.000000e+00> : vector<128xf32>
    %6 = vector.multi_reduction <add>, %5, %cst_5 [0] : vector<2x128xf32> to vector<128xf32>
    %7 = vector.shape_cast %6 : vector<128xf32> to vector<1x128xf32>
    %cst_6 = arith.constant 2.000000e+00 : f32
    %8 = vector.broadcast %cst_6 : f32 to vector<1x128xf32>
    %9 = arith.divf %7, %8 : vector<1x128xf32>
    %10 = vector.broadcast %9 : vector<1x128xf32> to vector<2x128xf32>
    %11 = arith.subf %5, %10 : vector<2x128xf32>
    %12 = arith.mulf %11, %11 : vector<2x128xf32>
    %cst_7 = arith.constant dense<0.000000e+00> : vector<128xf32>
    %13 = vector.multi_reduction <add>, %12, %cst_7 [0] : vector<2x128xf32> to vector<128xf32>
    %14 = vector.shape_cast %13 : vector<128xf32> to vector<1x128xf32>
    %cst_8 = arith.constant 2.000000e+00 : f32
    %15 = vector.broadcast %cst_8 : f32 to vector<1x128xf32>
    %16 = arith.divf %14, %15 : vector<1x128xf32>
    %17 = vector.broadcast %9 : vector<1x128xf32> to vector<2x128xf32>
    %18 = arith.subf %5, %17 : vector<2x128xf32>
    %cst_9 = arith.constant 9.99999974E-6 : f32
    %19 = vector.broadcast %cst_9 : f32 to vector<1x128xf32>
    %20 = arith.addf %16, %19 : vector<1x128xf32>
    %21 = math.rsqrt %20 : vector<1x128xf32>
    %22 = vector.broadcast %21 : vector<1x128xf32> to vector<2x128xf32>
    %23 = arith.mulf %18, %22 : vector<2x128xf32>
    %c1 = arith.constant 1 : index
    %c0_10 = arith.constant 0 : index
    %24 = vector.load %arg3[%c1, %c0_10] : memref<3x128xf32, #tpu.memory_space<vmem>>, vector<1x128xf32>
    %25 = vector.broadcast %24 : vector<1x128xf32> to vector<2x128xf32>
    %26 = arith.mulf %23, %25 : vector<2x128xf32>
    %c2 = arith.constant 2 : index
    %c0_11 = arith.constant 0 : index
    %27 = vector.load %arg3[%c2, %c0_11] : memref<3x128xf32, #tpu.memory_space<vmem>>, vector<1x128xf32>
    %28 = vector.broadcast %27 : vector<1x128xf32> to vector<2x128xf32>
    %29 = arith.addf %26, %28 : vector<2x128xf32>
    %cst_12 = arith.constant 0.000000e+00 : f32
    %30 = vector.broadcast %cst_12 : f32 to vector<2x128xf32>
    %31 = arith.maximumf %29, %30 : vector<2x128xf32>
    %c0_13 = arith.constant 0 : index
    %c0_14 = arith.constant 0 : index
    %32 = vector.load %arg4[%c0_13, %c0_14] : memref<2x128xf32, #tpu.memory_space<vmem>>, vector<2x128xf32>
    tpu.vector_store %arg4[%c0_13, %c0_14], %31 {strides = array<i32>} : memref<2x128xf32, #tpu.memory_space<vmem>>, vector<2x128xf32>,
    return
  }
  func.func @transform_0(%arg0: i32) -> (i32, i32) {
    %c0_i32 = arith.constant 0 : i32
    %c0_i32_0 = arith.constant 0 : i32
    %c0_i32_1 = arith.constant 0 : i32
    return %c0_i32, %c0_i32_0 : i32, i32
  }
  func.func @transform_1(%arg0: i32) -> (i32, i32) {
    %c0_i32 = arith.constant 0 : i32
    %c0_i32_0 = arith.constant 0 : i32
    %c0_i32_1 = arith.constant 0 : i32
    return %c0_i32, %c0_i32_0 : i32, i32
  }
  func.func @transform_2(%arg0: i32) -> (i32, i32) {
    %c0_i32 = arith.constant 0 : i32
    %c0_i32_0 = arith.constant 0 : i32
    %c0_i32_1 = arith.constant 0 : i32
    return %c0_i32, %c0_i32_0 : i32, i32
  }
  func.func @transform_3(%arg0: i32) -> (i32, i32) {
    %c0_i32 = arith.constant 0 : i32
    %c0_i32_0 = arith.constant 0 : i32
    %c0_i32_1 = arith.constant 0 : i32
    return %c0_i32, %c0_i32_0 : i32, i32
  }
}

module attributes {stable_mosaic.version = 11 : i64} {
  func.func @_fused_matmul_bn_act_kernel(%arg0: i32, %arg1: memref<2x128xbf16, #tpu.memory_space<vmem>>, %arg2: memref<128x128xbf16, #tpu.memory_space<vmem>>, %arg3: memref<3x128xf32, #tpu.memory_space<vmem>>, %arg4: memref<2x128xf32, #tpu.memory_space<vmem>>) attributes {dimension_semantics = [#tpu.dimension_semantics<arbitrary>], iteration_bounds = array<i64: 1>, scalar_prefetch = 0 : i64, scratch_operands = 0 : i64, tpu.core_type = #tpu.core_type<tc>, window_params = [{pipeline_mode = #tpu.pipeline_mode<synchronous>, transform_indices = @transform_0, window_bounds = array<i64: 2, 128>}, {pipeline_mode = #tpu.pipeline_mode<synchronous>, transform_indices = @transform_1, window_bounds = array<i64: 128, 128>}, {pipeline_mode = #tpu.pipeline_mode<synchronous>, transform_indices = @transform_2, window_bounds = array<i64: 3, 128>}, {pipeline_mode = #tpu.pipeline_mode<synchronous>, transform_indices = @transform_3, window_bounds = array<i64: 2, 128>}]} {
    %c0 = arith.constant 0 : index
    %c0_0 = arith.constant 0 : index
    %0 = vector.load %arg1[%c0, %c0_0] : memref<2x128xbf16, #tpu.memory_space<vmem>>, vector<2x128xbf16>
    %c0_1 = arith.constant 0 : index
    %c0_2 = arith.constant 0 : index
    %1 = vector.load %arg2[%c0_1, %c0_2] : memref<128x128xbf16, #tpu.memory_space<vmem>>, vector<128x128xbf16>
    %cst = arith.constant dense<0.000000e+00> : vector<2x128xf32>
    %2 = tpu.matmul %0, %1, %cst {dimension_numbers = #tpu.dot_dimension_numbers<[1], [0], [0], [1], [0, 0, 1, 1], [], []>} : vector<2x128xbf16>, vector<128x128xbf16>, vector<2x128xf32> -> vector<2x128xf32>
    %c0_3 = arith.constant 0 : index
    %c0_4 = arith.constant 0 : index
    %3 = vector.load %arg3[%c0_3, %c0_4] : memref<3x128xf32, #tpu.memory_space<vmem>>, vector<1x128xf32>
    %4 = vector.broadcast %3 : vector<1x128xf32> to vector<2x128xf32>
    %5 = arith.addf %2, %4 : vector<2x128xf32>
    %cst_5 = arith.constant dense<0.000000e+00> : vector<128xf32>
    %6 = vector.multi_reduction <add>, %5, %cst_5 [0] : vector<2x128xf32> to vector<128xf32>
    %7 = vector.shape_cast %6 : vector<128xf32> to vector<1x128xf32>
    %cst_6 = arith.constant 2.000000e+00 : f32
    %8 = vector.broadcast %cst_6 : f32 to vector<1x128xf32>
    %9 = arith.divf %7, %8 : vector<1x128xf32>
    %10 = vector.broadcast %9 : vector<1x128xf32> to vector<2x128xf32>
    %11 = arith.subf %5, %10 : vector<2x128xf32>
    %12 = arith.mulf %11, %11 : vector<2x128xf32>
    %cst_7 = arith.constant dense<0.000000e+00> : vector<128xf32>
    %13 = vector.multi_reduction <add>, %12, %cst_7 [0] : vector<2x128xf32> to vector<128xf32>
    %14 = vector.shape_cast %13 : vector<128xf32> to vector<1x128xf32>
    %cst_8 = arith.constant 2.000000e+00 : f32
    %15 = vector.broadcast %cst_8 : f32 to vector<1x128xf32>
    %16 = arith.divf %14, %15 : vector<1x128xf32>
    %17 = vector.broadcast %9 : vector<1x128xf32> to vector<2x128xf32>
    %18 = arith.subf %5, %17 : vector<2x128xf32>
    %cst_9 = arith.constant 9.99999974E-6 : f32
    %19 = vector.broadcast %cst_9 : f32 to vector<1x128xf32>
    %20 = arith.addf %16, %19 : vector<1x128xf32>
    %21 = math.rsqrt %20 : vector<1x128xf32>
    %22 = vector.broadcast %21 : vector<1x128xf32> to vector<2x128xf32>
    %23 = arith.mulf %18, %22 : vector<2x128xf32>
    %c1 = arith.constant 1 : index
    %c0_10 = arith.constant 0 : index
    %24 = vector.load %arg3[%c1, %c0_10] : memref<3x128xf32, #tpu.memory_space<vmem>>, vector<1x128xf32>
    %25 = vector.broadcast %24 : vector<1x128xf32> to vector<2x128xf32>
    %26 = arith.mulf %23, %25 : vector<2x128xf32>
    %c2 = arith.constant 2 : index
    %c0_11 = arith.constant 0 : index
    %27 = vector.load %arg3[%c2, %c0_11] : memref<3x128xf32, #tpu.memory_space<vmem>>, vector<1x128xf32>
    %28 = vector.broadcast %27 : vector<1x128xf32> to vector<2x128xf32>
    %29 = arith.addf %26, %28 : vector<2x128xf32>
    %30 = math.tanh %29 : vector<2x128xf32>
    %c0_12 = arith.constant 0 : index
    %c0_13 = arith.constant 0 : index
    %31 = vector.load %arg4[%c0_12, %c0_13] : memref<2x128xf32, #tpu.memory_space<vmem>>, vector<2x128xf32>
    tpu.vector_store %arg4[%c0_12, %c0_13], %30 {strides = array<i32>} : memref<2x128xf32, #tpu.memory_space<vmem>>, vector<2x128xf32>,
    return
  }
  func.func @transform_0(%arg0: i32) -> (i32, i32) {
    %c0_i32 = arith.constant 0 : i32
    %c0_i32_0 = arith.constant 0 : i32
    %c0_i32_1 = arith.constant 0 : i32
    return %c0_i32, %c0_i32_0 : i32, i32
  }
  func.func @transform_1(%arg0: i32) -> (i32, i32) {
    %c0_i32 = arith.constant 0 : i32
    %c0_i32_0 = arith.constant 0 : i32
    %c0_i32_1 = arith.constant 0 : i32
    return %c0_i32, %c0_i32_0 : i32, i32
  }
  func.func @transform_2(%arg0: i32) -> (i32, i32) {
    %c0_i32 = arith.constant 0 : i32
    %c0_i32_0 = arith.constant 0 : i32
    %c0_i32_1 = arith.constant 0 : i32
    return %c0_i32, %c0_i32_0 : i32, i32
  }
  func.func @transform_3(%arg0: i32) -> (i32, i32) {
    %c0_i32 = arith.constant 0 : i32
    %c0_i32_0 = arith.constant 0 : i32
    %c0_i32_1 = arith.constant 0 : i32
    return %c0_i32, %c0_i32_0 : i32, i32
  }
}

module attributes {stable_mosaic.version = 11 : i64} {
  func.func @_fused_matmul_bn_act_kernel(%arg0: i32, %arg1: memref<2x128xbf16, #tpu.memory_space<vmem>>, %arg2: memref<128x384xbf16, #tpu.memory_space<vmem>>, %arg3: memref<1x384xf32, #tpu.memory_space<vmem>>, %arg4: memref<2x384xf32, #tpu.memory_space<vmem>>) attributes {dimension_semantics = [#tpu.dimension_semantics<arbitrary>], iteration_bounds = array<i64: 1>, scalar_prefetch = 0 : i64, scratch_operands = 0 : i64, tpu.core_type = #tpu.core_type<tc>, window_params = [{pipeline_mode = #tpu.pipeline_mode<synchronous>, transform_indices = @transform_0, window_bounds = array<i64: 2, 128>}, {pipeline_mode = #tpu.pipeline_mode<synchronous>, transform_indices = @transform_1, window_bounds = array<i64: 128, 384>}, {pipeline_mode = #tpu.pipeline_mode<synchronous>, transform_indices = @transform_2, window_bounds = array<i64: 1, 384>}, {pipeline_mode = #tpu.pipeline_mode<synchronous>, transform_indices = @transform_3, window_bounds = array<i64: 2, 384>}]} {
    %c0 = arith.constant 0 : index
    %c0_0 = arith.constant 0 : index
    %0 = vector.load %arg1[%c0, %c0_0] : memref<2x128xbf16, #tpu.memory_space<vmem>>, vector<2x128xbf16>
    %c0_1 = arith.constant 0 : index
    %c0_2 = arith.constant 0 : index
    %1 = vector.load %arg2[%c0_1, %c0_2] : memref<128x384xbf16, #tpu.memory_space<vmem>>, vector<128x384xbf16>
    %cst = arith.constant dense<0.000000e+00> : vector<2x384xf32>
    %2 = tpu.matmul %0, %1, %cst {dimension_numbers = #tpu.dot_dimension_numbers<[1], [0], [0], [1], [0, 0, 1, 1], [], []>} : vector<2x128xbf16>, vector<128x384xbf16>, vector<2x384xf32> -> vector<2x384xf32>
    %c0_3 = arith.constant 0 : index
    %c0_4 = arith.constant 0 : index
    %3 = vector.load %arg3[%c0_3, %c0_4] : memref<1x384xf32, #tpu.memory_space<vmem>>, vector<1x384xf32>
    %4 = vector.broadcast %3 : vector<1x384xf32> to vector<2x384xf32>
    %5 = arith.addf %2, %4 : vector<2x384xf32>
    %c0_5 = arith.constant 0 : index
    %c0_6 = arith.constant 0 : index
    %6 = vector.load %arg4[%c0_5, %c0_6] : memref<2x384xf32, #tpu.memory_space<vmem>>, vector<2x384xf32>
    tpu.vector_store %arg4[%c0_5, %c0_6], %5 {strides = array<i32>} : memref<2x384xf32, #tpu.memory_space<vmem>>, vector<2x384xf32>,
    return
  }
  func.func @transform_0(%arg0: i32) -> (i32, i32) {
    %c0_i32 = arith.constant 0 : i32
    %c0_i32_0 = arith.constant 0 : i32
    %c0_i32_1 = arith.constant 0 : i32
    return %c0_i32, %c0_i32_0 : i32, i32
  }
  func.func @transform_1(%arg0: i32) -> (i32, i32) {
    %c0_i32 = arith.constant 0 : i32
    %c0_i32_0 = arith.constant 0 : i32
    %c0_i32_1 = arith.constant 0 : i32
    return %c0_i32, %c0_i32_0 : i32, i32
  }
  func.func @transform_2(%arg0: i32) -> (i32, i32) {
    %c0_i32 = arith.constant 0 : i32
    %c0_i32_0 = arith.constant 0 : i32
    %c0_i32_1 = arith.constant 0 : i32
    return %c0_i32, %c0_i32_0 : i32, i32
  }
  func.func @transform_3(%arg0: i32) -> (i32, i32) {
    %c0_i32 = arith.constant 0 : i32
    %c0_i32_0 = arith.constant 0 : i32
    %c0_i32_1 = arith.constant 0 : i32
    return %c0_i32, %c0_i32_0 : i32, i32
  }
}

module attributes {stable_mosaic.version = 11 : i64} {
  func.func @_gru_kernel(%arg0: i32, %arg1: memref<1x2x384xf32, #tpu.memory_space<vmem>>, %arg2: memref<128x384xbf16, #tpu.memory_space<vmem>>, %arg3: memref<1x384xf32, #tpu.memory_space<vmem>>, %arg4: memref<1x2x128xf32, #tpu.memory_space<vmem>>, %arg5: memref<2x128xf32, #tpu.memory_space<vmem>>) attributes {dimension_semantics = [#tpu.dimension_semantics<arbitrary>], iteration_bounds = array<i64: 1>, scalar_prefetch = 0 : i64, scratch_operands = 1 : i64, tpu.core_type = #tpu.core_type<tc>, window_params = [{transform_indices = @transform_0, window_bounds = array<i64: 1, 2, 384>}, {pipeline_mode = #tpu.pipeline_mode<synchronous>, transform_indices = @transform_1, window_bounds = array<i64: 128, 384>}, {pipeline_mode = #tpu.pipeline_mode<synchronous>, transform_indices = @transform_2, window_bounds = array<i64: 1, 384>}, {transform_indices = @transform_3, window_bounds = array<i64: 1, 2, 128>}]} {
    %c0_i32 = arith.constant 0 : i32
    %0 = arith.cmpi eq, %arg0, %c0_i32 : i32
    %1 = arith.extui %0 : i1 to i32
    %c0_i32_0 = arith.constant 0 : i32
    %2 = arith.cmpi ne, %1, %c0_i32_0 : i32
    scf.if %2 {
      %cst_17 = arith.constant 0.000000e+00 : f32
      %42 = vector.broadcast %cst_17 : f32 to vector<2x128xf32>
      %c0_18 = arith.constant 0 : index
      %c0_19 = arith.constant 0 : index
      %43 = vector.load %arg5[%c0_18, %c0_19] : memref<2x128xf32, #tpu.memory_space<vmem>>, vector<2x128xf32>
      tpu.vector_store %arg5[%c0_18, %c0_19], %42 {strides = array<i32>} : memref<2x128xf32, #tpu.memory_space<vmem>>, vector<2x128xf32>,
    } else {
    }
    %c0 = arith.constant 0 : index
    %c0_1 = arith.constant 0 : index
    %3 = vector.load %arg5[%c0, %c0_1] : memref<2x128xf32, #tpu.memory_space<vmem>>, vector<2x128xf32>
    %c0_2 = arith.constant 0 : index
    %c0_3 = arith.constant 0 : index
    %c0_4 = arith.constant 0 : index
    %4 = vector.load %arg1[%c0_2, %c0_3, %c0_4] : memref<1x2x384xf32, #tpu.memory_space<vmem>>, vector<1x2x384xf32>
    %5 = vector.shape_cast %4 : vector<1x2x384xf32> to vector<2x384xf32>
    %6 = arith.truncf %3 : vector<2x128xf32> to vector<2x128xbf16>
    %c0_5 = arith.constant 0 : index
    %c0_6 = arith.constant 0 : index
    %7 = vector.load %arg2[%c0_5, %c0_6] : memref<128x384xbf16, #tpu.memory_space<vmem>>, vector<128x384xbf16>
    %cst = arith.constant dense<0.000000e+00> : vector<2x384xf32>
    %8 = tpu.matmul %6, %7, %cst {dimension_numbers = #tpu.dot_dimension_numbers<[1], [0], [0], [1], [0, 0, 1, 1], [], []>} : vector<2x128xbf16>, vector<128x384xbf16>, vector<2x384xf32> -> vector<2x384xf32>
    %c0_7 = arith.constant 0 : index
    %c0_8 = arith.constant 0 : index
    %9 = vector.load %arg3[%c0_7, %c0_8] : memref<1x384xf32, #tpu.memory_space<vmem>>, vector<1x384xf32>
    %10 = vector.broadcast %9 : vector<1x384xf32> to vector<2x384xf32>
    %11 = arith.addf %8, %10 : vector<2x384xf32>
    %12 = vector.extract_strided_slice %5 {offsets = [0, 0], sizes = [2, 128], strides = [1, 1]} : vector<2x384xf32> to vector<2x128xf32>
    %13 = vector.extract_strided_slice %11 {offsets = [0, 0], sizes = [2, 128], strides = [1, 1]} : vector<2x384xf32> to vector<2x128xf32>
    %14 = arith.addf %12, %13 : vector<2x128xf32>
    %15 = arith.negf %14 : vector<2x128xf32>
    %16 = math.exp %15 : vector<2x128xf32>
    %cst_9 = arith.constant 1.000000e+00 : f32
    %17 = vector.broadcast %cst_9 : f32 to vector<2x128xf32>
    %18 = arith.addf %17, %16 : vector<2x128xf32>
    %19 = arith.divf %17, %18 : vector<2x128xf32>
    %20 = vector.extract_strided_slice %5 {offsets = [0, 128], sizes = [2, 128], strides = [1, 1]} : vector<2x384xf32> to vector<2x128xf32>
    %21 = vector.extract_strided_slice %11 {offsets = [0, 128], sizes = [2, 128], strides = [1, 1]} : vector<2x384xf32> to vector<2x128xf32>
    %22 = arith.addf %20, %21 : vector<2x128xf32>
    %23 = arith.negf %22 : vector<2x128xf32>
    %24 = math.exp %23 : vector<2x128xf32>
    %cst_10 = arith.constant 1.000000e+00 : f32
    %25 = vector.broadcast %cst_10 : f32 to vector<2x128xf32>
    %26 = arith.addf %25, %24 : vector<2x128xf32>
    %27 = arith.divf %25, %26 : vector<2x128xf32>
    %28 = vector.extract_strided_slice %5 {offsets = [0, 256], sizes = [2, 128], strides = [1, 1]} : vector<2x384xf32> to vector<2x128xf32>
    %29 = vector.extract_strided_slice %11 {offsets = [0, 256], sizes = [2, 128], strides = [1, 1]} : vector<2x384xf32> to vector<2x128xf32>
    %30 = arith.mulf %19, %29 : vector<2x128xf32>
    %31 = arith.addf %28, %30 : vector<2x128xf32>
    %32 = math.tanh %31 : vector<2x128xf32>
    %cst_11 = arith.constant 1.000000e+00 : f32
    %33 = vector.broadcast %cst_11 : f32 to vector<2x128xf32>
    %34 = arith.subf %33, %27 : vector<2x128xf32>
    %35 = arith.mulf %34, %32 : vector<2x128xf32>
    %36 = arith.mulf %27, %3 : vector<2x128xf32>
    %37 = arith.addf %35, %36 : vector<2x128xf32>
    %c0_12 = arith.constant 0 : index
    %c0_13 = arith.constant 0 : index
    %38 = vector.load %arg5[%c0_12, %c0_13] : memref<2x128xf32, #tpu.memory_space<vmem>>, vector<2x128xf32>
    tpu.vector_store %arg5[%c0_12, %c0_13], %37 {strides = array<i32>} : memref<2x128xf32, #tpu.memory_space<vmem>>, vector<2x128xf32>,
    %c0_14 = arith.constant 0 : index
    %c0_15 = arith.constant 0 : index
    %c0_16 = arith.constant 0 : index
    %39 = vector.load %arg4[%c0_14, %c0_15, %c0_16] : memref<1x2x128xf32, #tpu.memory_space<vmem>>, vector<1x2x128xf32>
    %40 = vector.shape_cast %39 : vector<1x2x128xf32> to vector<2x128xf32>
    %41 = vector.shape_cast %37 : vector<2x128xf32> to vector<1x2x128xf32>
    tpu.vector_store %arg4[%c0_14, %c0_15, %c0_16], %41 {strides = array<i32>} : memref<1x2x128xf32, #tpu.memory_space<vmem>>, vector<1x2x128xf32>,
    return
  }
  func.func @transform_0(%arg0: i32) -> (i32, i32, i32) {
    %c0_i32 = arith.constant 0 : i32
    %c0_i32_0 = arith.constant 0 : i32
    %c0_i32_1 = arith.constant 0 : i32
    return %arg0, %c0_i32, %c0_i32_0 : i32, i32, i32
  }
  func.func @transform_1(%arg0: i32) -> (i32, i32) {
    %c0_i32 = arith.constant 0 : i32
    %c0_i32_0 = arith.constant 0 : i32
    %c0_i32_1 = arith.constant 0 : i32
    return %c0_i32, %c0_i32_0 : i32, i32
  }
  func.func @transform_2(%arg0: i32) -> (i32, i32) {
    %c0_i32 = arith.constant 0 : i32
    %c0_i32_0 = arith.constant 0 : i32
    %c0_i32_1 = arith.constant 0 : i32
    return %c0_i32, %c0_i32_0 : i32, i32
  }
  func.func @transform_3(%arg0: i32) -> (i32, i32, i32) {
    %c0_i32 = arith.constant 0 : i32
    %c0_i32_0 = arith.constant 0 : i32
    %c0_i32_1 = arith.constant 0 : i32
    return %arg0, %c0_i32, %c0_i32_0 : i32, i32, i32
  }
}

module attributes {stable_mosaic.version = 11 : i64} {
  func.func @_gru_kernel(%arg0: i32, %arg1: memref<1x1x384xf32, #tpu.memory_space<vmem>>, %arg2: memref<128x384xbf16, #tpu.memory_space<vmem>>, %arg3: memref<1x384xf32, #tpu.memory_space<vmem>>, %arg4: memref<1x1x128xf32, #tpu.memory_space<vmem>>, %arg5: memref<1x128xf32, #tpu.memory_space<vmem>>) attributes {dimension_semantics = [#tpu.dimension_semantics<arbitrary>], iteration_bounds = array<i64: 2>, scalar_prefetch = 0 : i64, scratch_operands = 1 : i64, tpu.core_type = #tpu.core_type<tc>, window_params = [{transform_indices = @transform_0, window_bounds = array<i64: 1, 1, 384>}, {pipeline_mode = #tpu.pipeline_mode<synchronous>, transform_indices = @transform_1, window_bounds = array<i64: 128, 384>}, {pipeline_mode = #tpu.pipeline_mode<synchronous>, transform_indices = @transform_2, window_bounds = array<i64: 1, 384>}, {transform_indices = @transform_3, window_bounds = array<i64: 1, 1, 128>}]} {
    %c0_i32 = arith.constant 0 : i32
    %0 = arith.cmpi eq, %arg0, %c0_i32 : i32
    %1 = arith.extui %0 : i1 to i32
    %c0_i32_0 = arith.constant 0 : i32
    %2 = arith.cmpi ne, %1, %c0_i32_0 : i32
    scf.if %2 {
      %cst_17 = arith.constant 0.000000e+00 : f32
      %41 = vector.broadcast %cst_17 : f32 to vector<1x128xf32>
      %c0_18 = arith.constant 0 : index
      %c0_19 = arith.constant 0 : index
      %42 = vector.load %arg5[%c0_18, %c0_19] : memref<1x128xf32, #tpu.memory_space<vmem>>, vector<1x128xf32>
      tpu.vector_store %arg5[%c0_18, %c0_19], %41 {strides = array<i32>} : memref<1x128xf32, #tpu.memory_space<vmem>>, vector<1x128xf32>,
    } else {
    }
    %c0 = arith.constant 0 : index
    %c0_1 = arith.constant 0 : index
    %3 = vector.load %arg5[%c0, %c0_1] : memref<1x128xf32, #tpu.memory_space<vmem>>, vector<1x128xf32>
    %c0_2 = arith.constant 0 : index
    %c0_3 = arith.constant 0 : index
    %c0_4 = arith.constant 0 : index
    %4 = vector.load %arg1[%c0_2, %c0_3, %c0_4] : memref<1x1x384xf32, #tpu.memory_space<vmem>>, vector<1x1x384xf32>
    %5 = vector.shape_cast %4 : vector<1x1x384xf32> to vector<1x384xf32>
    %6 = arith.truncf %3 : vector<1x128xf32> to vector<1x128xbf16>
    %c0_5 = arith.constant 0 : index
    %c0_6 = arith.constant 0 : index
    %7 = vector.load %arg2[%c0_5, %c0_6] : memref<128x384xbf16, #tpu.memory_space<vmem>>, vector<128x384xbf16>
    %cst = arith.constant dense<0.000000e+00> : vector<1x384xf32>
    %8 = tpu.matmul %6, %7, %cst {dimension_numbers = #tpu.dot_dimension_numbers<[1], [0], [0], [1], [0, 0, 1, 1], [], []>} : vector<1x128xbf16>, vector<128x384xbf16>, vector<1x384xf32> -> vector<1x384xf32>
    %c0_7 = arith.constant 0 : index
    %c0_8 = arith.constant 0 : index
    %9 = vector.load %arg3[%c0_7, %c0_8] : memref<1x384xf32, #tpu.memory_space<vmem>>, vector<1x384xf32>
    %10 = arith.addf %8, %9 : vector<1x384xf32>
    %11 = vector.extract_strided_slice %5 {offsets = [0, 0], sizes = [1, 128], strides = [1, 1]} : vector<1x384xf32> to vector<1x128xf32>
    %12 = vector.extract_strided_slice %10 {offsets = [0, 0], sizes = [1, 128], strides = [1, 1]} : vector<1x384xf32> to vector<1x128xf32>
    %13 = arith.addf %11, %12 : vector<1x128xf32>
    %14 = arith.negf %13 : vector<1x128xf32>
    %15 = math.exp %14 : vector<1x128xf32>
    %cst_9 = arith.constant 1.000000e+00 : f32
    %16 = vector.broadcast %cst_9 : f32 to vector<1x128xf32>
    %17 = arith.addf %16, %15 : vector<1x128xf32>
    %18 = arith.divf %16, %17 : vector<1x128xf32>
    %19 = vector.extract_strided_slice %5 {offsets = [0, 128], sizes = [1, 128], strides = [1, 1]} : vector<1x384xf32> to vector<1x128xf32>
    %20 = vector.extract_strided_slice %10 {offsets = [0, 128], sizes = [1, 128], strides = [1, 1]} : vector<1x384xf32> to vector<1x128xf32>
    %21 = arith.addf %19, %20 : vector<1x128xf32>
    %22 = arith.negf %21 : vector<1x128xf32>
    %23 = math.exp %22 : vector<1x128xf32>
    %cst_10 = arith.constant 1.000000e+00 : f32
    %24 = vector.broadcast %cst_10 : f32 to vector<1x128xf32>
    %25 = arith.addf %24, %23 : vector<1x128xf32>
    %26 = arith.divf %24, %25 : vector<1x128xf32>
    %27 = vector.extract_strided_slice %5 {offsets = [0, 256], sizes = [1, 128], strides = [1, 1]} : vector<1x384xf32> to vector<1x128xf32>
    %28 = vector.extract_strided_slice %10 {offsets = [0, 256], sizes = [1, 128], strides = [1, 1]} : vector<1x384xf32> to vector<1x128xf32>
    %29 = arith.mulf %18, %28 : vector<1x128xf32>
    %30 = arith.addf %27, %29 : vector<1x128xf32>
    %31 = math.tanh %30 : vector<1x128xf32>
    %cst_11 = arith.constant 1.000000e+00 : f32
    %32 = vector.broadcast %cst_11 : f32 to vector<1x128xf32>
    %33 = arith.subf %32, %26 : vector<1x128xf32>
    %34 = arith.mulf %33, %31 : vector<1x128xf32>
    %35 = arith.mulf %26, %3 : vector<1x128xf32>
    %36 = arith.addf %34, %35 : vector<1x128xf32>
    %c0_12 = arith.constant 0 : index
    %c0_13 = arith.constant 0 : index
    %37 = vector.load %arg5[%c0_12, %c0_13] : memref<1x128xf32, #tpu.memory_space<vmem>>, vector<1x128xf32>
    tpu.vector_store %arg5[%c0_12, %c0_13], %36 {strides = array<i32>} : memref<1x128xf32, #tpu.memory_space<vmem>>, vector<1x128xf32>,
    %c0_14 = arith.constant 0 : index
    %c0_15 = arith.constant 0 : index
    %c0_16 = arith.constant 0 : index
    %38 = vector.load %arg4[%c0_14, %c0_15, %c0_16] : memref<1x1x128xf32, #tpu.memory_space<vmem>>, vector<1x1x128xf32>
    %39 = vector.shape_cast %38 : vector<1x1x128xf32> to vector<1x128xf32>
    %40 = vector.shape_cast %36 : vector<1x128xf32> to vector<1x1x128xf32>
    tpu.vector_store %arg4[%c0_14, %c0_15, %c0_16], %40 {strides = array<i32>} : memref<1x1x128xf32, #tpu.memory_space<vmem>>, vector<1x1x128xf32>,
    return
  }
  func.func @transform_0(%arg0: i32) -> (i32, i32, i32) {
    %c0_i32 = arith.constant 0 : i32
    %c0_i32_0 = arith.constant 0 : i32
    %c0_i32_1 = arith.constant 0 : i32
    return %arg0, %c0_i32, %c0_i32_0 : i32, i32, i32
  }
  func.func @transform_1(%arg0: i32) -> (i32, i32) {
    %c0_i32 = arith.constant 0 : i32
    %c0_i32_0 = arith.constant 0 : i32
    %c0_i32_1 = arith.constant 0 : i32
    return %c0_i32, %c0_i32_0 : i32, i32
  }
  func.func @transform_2(%arg0: i32) -> (i32, i32) {
    %c0_i32 = arith.constant 0 : i32
    %c0_i32_0 = arith.constant 0 : i32
    %c0_i32_1 = arith.constant 0 : i32
    return %c0_i32, %c0_i32_0 : i32, i32
  }
  func.func @transform_3(%arg0: i32) -> (i32, i32, i32) {
    %c0_i32 = arith.constant 0 : i32
    %c0_i32_0 = arith.constant 0 : i32
    %c0_i32_1 = arith.constant 0 : i32
    return %arg0, %c0_i32, %c0_i32_0 : i32, i32, i32
  }
}

module attributes {stable_mosaic.version = 11 : i64} {
  func.func @_fused_matmul_bn_act_kernel(%arg0: i32, %arg1: memref<2x256xbf16, #tpu.memory_space<vmem>>, %arg2: memref<256x384xbf16, #tpu.memory_space<vmem>>, %arg3: memref<1x384xf32, #tpu.memory_space<vmem>>, %arg4: memref<2x384xf32, #tpu.memory_space<vmem>>) attributes {dimension_semantics = [#tpu.dimension_semantics<arbitrary>], iteration_bounds = array<i64: 1>, scalar_prefetch = 0 : i64, scratch_operands = 0 : i64, tpu.core_type = #tpu.core_type<tc>, window_params = [{pipeline_mode = #tpu.pipeline_mode<synchronous>, transform_indices = @transform_0, window_bounds = array<i64: 2, 256>}, {pipeline_mode = #tpu.pipeline_mode<synchronous>, transform_indices = @transform_1, window_bounds = array<i64: 256, 384>}, {pipeline_mode = #tpu.pipeline_mode<synchronous>, transform_indices = @transform_2, window_bounds = array<i64: 1, 384>}, {pipeline_mode = #tpu.pipeline_mode<synchronous>, transform_indices = @transform_3, window_bounds = array<i64: 2, 384>}]} {
    %c0 = arith.constant 0 : index
    %c0_0 = arith.constant 0 : index
    %0 = vector.load %arg1[%c0, %c0_0] : memref<2x256xbf16, #tpu.memory_space<vmem>>, vector<2x256xbf16>
    %c0_1 = arith.constant 0 : index
    %c0_2 = arith.constant 0 : index
    %1 = vector.load %arg2[%c0_1, %c0_2] : memref<256x384xbf16, #tpu.memory_space<vmem>>, vector<256x384xbf16>
    %cst = arith.constant dense<0.000000e+00> : vector<2x384xf32>
    %2 = tpu.matmul %0, %1, %cst {dimension_numbers = #tpu.dot_dimension_numbers<[1], [0], [0], [1], [0, 0, 1, 1], [], []>} : vector<2x256xbf16>, vector<256x384xbf16>, vector<2x384xf32> -> vector<2x384xf32>
    %c0_3 = arith.constant 0 : index
    %c0_4 = arith.constant 0 : index
    %3 = vector.load %arg3[%c0_3, %c0_4] : memref<1x384xf32, #tpu.memory_space<vmem>>, vector<1x384xf32>
    %4 = vector.broadcast %3 : vector<1x384xf32> to vector<2x384xf32>
    %5 = arith.addf %2, %4 : vector<2x384xf32>
    %c0_5 = arith.constant 0 : index
    %c0_6 = arith.constant 0 : index
    %6 = vector.load %arg4[%c0_5, %c0_6] : memref<2x384xf32, #tpu.memory_space<vmem>>, vector<2x384xf32>
    tpu.vector_store %arg4[%c0_5, %c0_6], %5 {strides = array<i32>} : memref<2x384xf32, #tpu.memory_space<vmem>>, vector<2x384xf32>,
    return
  }
  func.func @transform_0(%arg0: i32) -> (i32, i32) {
    %c0_i32 = arith.constant 0 : i32
    %c0_i32_0 = arith.constant 0 : i32
    %c0_i32_1 = arith.constant 0 : i32
    return %c0_i32, %c0_i32_0 : i32, i32
  }
  func.func @transform_1(%arg0: i32) -> (i32, i32) {
    %c0_i32 = arith.constant 0 : i32
    %c0_i32_0 = arith.constant 0 : i32
    %c0_i32_1 = arith.constant 0 : i32
    return %c0_i32, %c0_i32_0 : i32, i32
  }
  func.func @transform_2(%arg0: i32) -> (i32, i32) {
    %c0_i32 = arith.constant 0 : i32
    %c0_i32_0 = arith.constant 0 : i32
    %c0_i32_1 = arith.constant 0 : i32
    return %c0_i32, %c0_i32_0 : i32, i32
  }
  func.func @transform_3(%arg0: i32) -> (i32, i32) {
    %c0_i32 = arith.constant 0 : i32
    %c0_i32_0 = arith.constant 0 : i32
    %c0_i32_1 = arith.constant 0 : i32
    return %c0_i32, %c0_i32_0 : i32, i32
  }
}

</mosaic_0001>

<bundles_post_ra>
// kernel: _lambda_.12
= control target key start
LH: loop header
LB: loop body
LE: loop exit
PB: predicated region body
PF: predicated region fallthrough
CT: control target
= control target key end

     0   :  { %s2075_s1 = inlined_call_operand.vmem [shape: bf16[128,128], index: 1, kind: input, shape index: {}]   ;;  %s2076_s0 = inlined_call_operand.vmem [shape: bf16[384,128], index: 0, kind: input, shape index: {}]   ;;  %s2077_s2 = inlined_call_operand.vmem [shape: f32[3,128], index: 2, kind: input, shape index: {}]   ;;  %s2078_s3 = inlined_call_operand.vmem [shape: f32[384,128], index: 3, kind: output, shape index: {}]  }
   0x1   :  { %v1109_v0 = vld [vmem:[%s2075_s1] sm:$0xff]   ;;  %v1110_v1 = vld [vmem:[%s2075_s1 + $0x8] sm:$0xff]   ;;  %v1111_v2 = vld [vmem:[%s2075_s1 + $0x10] sm:$0xff]  }
   0x2   :  { %1029 = vmatprep.subr.bf16.mxu0 %v1109_v0  ;;  %1093 = vmatprep.subr.bf16.mxu1 %v1109_v0  ;;  %v1112_v3 = vld [vmem:[%s2075_s1 + $0x18] sm:$0xff]   ;;  %v1117_v4 = vld [vmem:[%s2076_s0] sm:$0xff]   ;;  %v1114_v6 = vld [vmem:[%s2075_s1 + $0x28] sm:$0xff]  }
   0x3   :  { %1030 = vmatpush3.bf16.msra.mxu0 %v1109_v0  ;;  %1101 = vmatpush3.bf16.msra.mxu1 %v1109_v0  ;;  %v1113_v5 = vld [vmem:[%s2075_s1 + $0x20] sm:$0xff]   ;;  %v1115_v7 = vld [vmem:[%s2075_s1 + $0x30] sm:$0xff]   ;;  %v1116_v9 = vld [vmem:[%s2075_s1 + $0x38] sm:$0xff]  }
   0x4   :  { %1031 = vmatprep.subr.bf16.mxu0 %v1110_v1  ;;  %1094 = vmatprep.subr.bf16.mxu1 %v1110_v1  ;;  %v1129_v8 = vld [vmem:[%s2076_s0 + $0x60] sm:$0xff]   ;;  %v1118_v10 = vld [vmem:[%s2076_s0 + $0x8] sm:$0xff]   ;;  %v1119_v11 = vld [vmem:[%s2076_s0 + $0x10] sm:$0xff]  }
   0x5   :  { %1045 = vmatprep.mubr.bf16.mxu0 %v1117_v4  ;;  %1069 = vmatprep.mubr.bf16.mxu1 %v1129_v8  ;;  %v1130_v12 = vld [vmem:[%s2076_s0 + $0x68] sm:$0xff]   ;;  %v1131_v13 = vld [vmem:[%s2076_s0 + $0x70] sm:$0xff]   ;;  %v1120_v14 = vld [vmem:[%s2076_s0 + $0x18] sm:$0xff]  }
   0x6   :  { %v1132_v15 = vld [vmem:[%s2076_s0 + $0x78] sm:$0xff]   ;;  %v1121_v16 = vld [vmem:[%s2076_s0 + $0x20] sm:$0xff]   ;;  %v1122_v18 = vld [vmem:[%s2076_s0 + $0x28] sm:$0xff]  }
   0x7   :  { %1032 = vmatpush3.bf16.msra.mxu0 %v1110_v1  ;;  %1102 = vmatpush3.bf16.msra.mxu1 %v1110_v1  ;;  %v1133_v17 = vld [vmem:[%s2076_s0 + $0x80] sm:$0xff]   ;;  %v1134_v19 = vld [vmem:[%s2076_s0 + $0x88] sm:$0xff]   ;;  %v1123_v20 = vld [vmem:[%s2076_s0 + $0x30] sm:$0xff]  }
   0x8   :  { %1033 = vmatprep.subr.bf16.mxu0 %v1111_v2  ;;  %1095 = vmatprep.subr.bf16.mxu1 %v1111_v2  ;;  %v1135_v21 = vld [vmem:[%s2076_s0 + $0x90] sm:$0xff]   ;;  %v1124_v22 = vld [vmem:[%s2076_s0 + $0x38] sm:$0xff]   ;;  %v1125_v24 = vld [vmem:[%s2076_s0 + $0x40] sm:$0xff]  }
   0x9   :  { %v1136_v23 = vld [vmem:[%s2076_s0 + $0x98] sm:$0xff]   ;;  %v1137_v25 = vld [vmem:[%s2076_s0 + $0xa0] sm:$0xff]   ;;  %v1126_v26 = vld [vmem:[%s2076_s0 + $0x48] sm:$0xff]  }
   0xa   :  { %v1138_v27 = vld [vmem:[%s2076_s0 + $0xa8] sm:$0xff]   ;;  %v1127_v28 = vld [vmem:[%s2076_s0 + $0x50] sm:$0xff]   ;;  %v1128_v30 = vld [vmem:[%s2076_s0 + $0x58] sm:$0xff]  }
   0xb   :  { %1034 = vmatpush3.bf16.msra.mxu0 %v1111_v2  ;;  %1103 = vmatpush3.bf16.msra.mxu1 %v1111_v2  ;;  %v1139_v29 = vld [vmem:[%s2076_s0 + $0xb0] sm:$0xff]   ;;  %v1140_v31 = vld [vmem:[%s2076_s0 + $0xb8] sm:$0xff]   ;;  %v1264_v34 = vld [vmem:[%s2077_s2] ss:$0 sm:$0xff] }
   0xc   :  { %1035 = vmatprep.subr.bf16.mxu0 %v1112_v3  ;;  %1096 = vmatprep.subr.bf16.mxu1 %v1112_v3 }
   0xf   :  { %1036 = vmatpush3.bf16.msra.mxu0 %v1112_v3  ;;  %1104 = vmatpush3.bf16.msra.mxu1 %v1112_v3 }
  0x10   :  { %1037 = vmatprep.subr.bf16.mxu0 %v1113_v5  ;;  %1097 = vmatprep.subr.bf16.mxu1 %v1113_v5 }
  0x13   :  { %1038 = vmatpush3.bf16.msra.mxu0 %v1113_v5  ;;  %1105 = vmatpush3.bf16.msra.mxu1 %v1113_v5 }
  0x14   :  { %1039 = vmatprep.subr.bf16.mxu0 %v1114_v6  ;;  %1098 = vmatprep.subr.bf16.mxu1 %v1114_v6 }
  0x17   :  { %1040 = vmatpush3.bf16.msra.mxu0 %v1114_v6  ;;  %1106 = vmatpush3.bf16.msra.mxu1 %v1114_v6 }
  0x18   :  { %1041 = vmatprep.subr.bf16.mxu0 %v1115_v7  ;;  %1099 = vmatprep.subr.bf16.mxu1 %v1115_v7 }
  0x1b   :  { %1042 = vmatpush3.bf16.msra.mxu0 %v1115_v7  ;;  %1107 = vmatpush3.bf16.msra.mxu1 %v1115_v7 }
  0x1c   :  { %1043 = vmatprep.subr.bf16.mxu0 %v1116_v9  ;;  %1100 = vmatprep.subr.bf16.mxu1 %v1116_v9 }
  0x1f   :  { %1044 = vmatpush3.bf16.msra.mxu0 %v1116_v9  ;;  %1108 = vmatpush3.bf16.msra.mxu1 %v1116_v9 }
  0x22   :  { %1046 = vmatmul.mubr.bf16.vlgmr.msra.gmra.mrb[0].mxu0 %v1118_v10  ;;  %1070 = vmatmul.mubr.bf16.vlgmr.msra.gmra.mrb[0].mxu1 %v1130_v12 }
  0x23   :  { %1049 = vmatprep.mubr.bf16.mxu0 %v1119_v11  ;;  %1073 = vmatprep.mubr.bf16.mxu1 %v1131_v13 }
  0x2a   :  { %1050 = vmatmul.mubr.bf16.gmra.mrb[4].mxu0 %v1120_v14  ;;  %1074 = vmatmul.mubr.bf16.gmra.mrb[4].mxu1 %v1132_v15 }
  0x2b   :  { %1053 = vmatprep.mubr.bf16.mxu0 %v1121_v16  ;;  %1077 = vmatprep.mubr.bf16.mxu1 %v1133_v17 }
  0x32   :  { %1054 = vmatmul.mubr.bf16.gmra.mrb[8].mxu0 %v1122_v18  ;;  %1078 = vmatmul.mubr.bf16.gmra.mrb[8].mxu1 %v1134_v19 }
  0x33   :  { %1057 = vmatprep.mubr.bf16.mxu0 %v1123_v20  ;;  %1081 = vmatprep.mubr.bf16.mxu1 %v1135_v21 }
  0x3a   :  { %1058 = vmatmul.mubr.bf16.gmra.mrb[12].mxu0 %v1124_v22  ;;  %1082 = vmatmul.mubr.bf16.gmra.mrb[12].mxu1 %v1136_v23 }
  0x3b   :  { %1061 = vmatprep.mubr.bf16.mxu0 %v1125_v24  ;;  %1085 = vmatprep.mubr.bf16.mxu1 %v1137_v25 }
  0x42   :  { %1062 = vmatmul.mubr.bf16.gmra.mrb[16].mxu0 %v1126_v26  ;;  %1086 = vmatmul.mubr.bf16.gmra.mrb[16].mxu1 %v1138_v27 }
  0x43   :  { %1065 = vmatprep.mubr.bf16.mxu0 %v1127_v28  ;;  %1089 = vmatprep.mubr.bf16.mxu1 %v1139_v29 }
  0x4a   :  { %1066 = vmatmul.mubr.bf16.gmra.mrb[20].mxu0 %v1128_v30  ;;  %1090 = vmatmul.mubr.bf16.gmra.mrb[20].mxu1 %v1140_v31 }
  0xf5   :  { %v1047_v32 = vpop.f32.mrb[0].mxu0  ;;  %v1259_v33 = vpop.f32.mrb[0].mxu1 }
  0xf6   :  { %v310_v35 = vpop.f32.mrb[1].mxu0  ;;  %v1266_v36 = vpop.f32.mrb[1].mxu1  ;;  %v1279_v43 = vadd.f32 %v1047_v32, %v1264_v34 }
  0xf7   :  { %v1048_v37 = vpop.f32.mrb[2].mxu0  ;;  %v1268_v38 = vpop.f32.mrb[2].mxu1  ;;  %v1273_v41 = vadd.f32 %v1264_v34, %v310_v35 }
  0xf8   :  { %v313_v39 = vpop.f32.mrb[3].mxu0  ;;  %v1270_v40 = vpop.f32.mrb[3].mxu1  ;;  %v1284_v45 = vadd.f32 %v1048_v37, %v1264_v34 }
  0xf9   :  { %v1276_v42 = vadd.f32 %v1264_v34, %v313_v39 }
  0xfb   :  { %v501_v44 = vadd.f32 %v1276_v42, %v1273_v41 }
  0xfd   :  { %v502_v46 = vadd.f32 %v501_v44, %v1279_v43  ;;  %v1051_v47 = vpop.f32.mrb[4].mxu0  ;;  %v1287_v48 = vpop.f32.mrb[4].mxu1 }
  0xfe   :  { %v326_v49 = vpop.f32.mrb[5].mxu0  ;;  %v1289_v50 = vpop.f32.mrb[5].mxu1  ;;  %v1304_v59 = vadd.f32 %v1051_v47, %v1264_v34 }
  0xff   :  { %v1292_v51 = vadd.f32 %v1264_v34, %v326_v49  ;;  %v503_v52 = vadd.f32 %v502_v46, %v1284_v45  ;;  %v1052_v53 = vpop.f32.mrb[6].mxu0  ;;  %v1295_v54 = vpop.f32.mrb[6].mxu1 }
 0x100   :  { %v329_v55 = vpop.f32.mrb[7].mxu0  ;;  %v1297_v56 = vpop.f32.mrb[7].mxu1  ;;  %v1308_v61 = vadd.f32 %v1052_v53, %v1264_v34 }
 0x101   :  { %v504_v57 = vadd.f32 %v503_v52, %v1292_v51  ;;  %v1301_v58 = vadd.f32 %v1264_v34, %v329_v55 }
 0x103   :  { %v505_v60 = vadd.f32 %v504_v57, %v1301_v58 }
 0x105   :  { %v506_v62 = vadd.f32 %v505_v60, %v1304_v59  ;;  %v1055_v63 = vpop.f32.mrb[8].mxu0  ;;  %v1079_v0 = vpop.f32.mrb[8].mxu1 }
 0x106   :  { %v342_v1 = vpop.f32.mrb[9].mxu0  ;;  %v1312_v2 = vadd.f32 %v1079_v0, %v1264_v34  ;;  %v1314_v3 = vpop.f32.mrb[9].mxu1  ;;  %v1331_v14 = vadd.f32 %v1055_v63, %v1264_v34 }
 0x107   :  { %v1317_v4 = vadd.f32 %v1264_v34, %v342_v1  ;;  %v507_v5 = vadd.f32 %v506_v62, %v1308_v61  ;;  %v1056_v6 = vpop.f32.mrb[10].mxu0  ;;  %v1080_v7 = vpop.f32.mrb[10].mxu1 }
 0x108   :  { %v345_v8 = vpop.f32.mrb[11].mxu0  ;;  %v1321_v9 = vadd.f32 %v1080_v7, %v1264_v34  ;;  %v441_v10 = vpop.f32.mrb[11].mxu1  ;;  %v1335_v16 = vadd.f32 %v1056_v6, %v1264_v34 }
 0x109   :  { %v508_v11 = vadd.f32 %v507_v5, %v1317_v4  ;;  %v1325_v12 = vadd.f32 %v1264_v34, %v345_v8  ;;  %v1328_v13 = vadd.f32 %v1264_v34, %v441_v10 }
 0x10b   :  { %v509_v15 = vadd.f32 %v508_v11, %v1325_v12 }
 0x10d   :  { %v510_v17 = vadd.f32 %v509_v15, %v1331_v14  ;;  %v1059_v18 = vpop.f32.mrb[12].mxu0  ;;  %v1083_v19 = vpop.f32.mrb[12].mxu1 }
 0x10e   :  { %v358_v20 = vpop.f32.mrb[13].mxu0  ;;  %v1339_v21 = vadd.f32 %v1083_v19, %v1264_v34  ;;  %v454_v22 = vpop.f32.mrb[13].mxu1  ;;  %v1359_v37 = vadd.f32 %v1059_v18, %v1264_v34 }
 0x10f   :  { %v1342_v23 = vadd.f32 %v1264_v34, %v358_v20  ;;  %v511_v24 = vadd.f32 %v510_v17, %v1335_v16  ;;  %v1060_v25 = vpop.f32.mrb[14].mxu0  ;;  %v1346_v26 = vadd.f32 %v1264_v34, %v454_v22  ;;  %v1084_v27 = vpop.f32.mrb[14].mxu1 }
 0x110   :  { %v361_v28 = vpop.f32.mrb[15].mxu0  ;;  %v1349_v29 = vadd.f32 %v1084_v27, %v1264_v34  ;;  %v457_v30 = vpop.f32.mrb[15].mxu1  ;;  %v1363_v44 = vadd.f32 %v1060_v25, %v1264_v34 }
 0x111   :  { %v512_v31 = vadd.f32 %v511_v24, %v1342_v23  ;;  %v1353_v32 = vadd.f32 %v1264_v34, %v361_v28  ;;  %v1356_v35 = vadd.f32 %v1264_v34, %v457_v30 }
 0x113   :  { %v513_v39 = vadd.f32 %v512_v31, %v1353_v32 }
 0x115   :  { %v514_v46 = vadd.f32 %v513_v39, %v1359_v37  ;;  %v1063_v47 = vpop.f32.mrb[16].mxu0  ;;  %v1087_v49 = vpop.f32.mrb[16].mxu1 }
 0x116   :  { %v374_v52 = vpop.f32.mrb[17].mxu0  ;;  %v1367_v53 = vadd.f32 %v1087_v49, %v1264_v34  ;;  %v470_v55 = vpop.f32.mrb[17].mxu1  ;;  %v1387_v11 = vadd.f32 %v1063_v47, %v1264_v34 }
 0x117   :  { %v1370_v57 = vadd.f32 %v1264_v34, %v374_v52  ;;  %v515_v60 = vadd.f32 %v514_v46, %v1363_v44  ;;  %v1064_v62 = vpop.f32.mrb[18].mxu0  ;;  %v1374_v63 = vadd.f32 %v1264_v34, %v470_v55  ;;  %v1088_v0 = vpop.f32.mrb[18].mxu1 }
 0x118   :  { %v377_v1 = vpop.f32.mrb[19].mxu0  ;;  %v1377_v5 = vadd.f32 %v1088_v0, %v1264_v34  ;;  %v473_v6 = vpop.f32.mrb[19].mxu1  ;;  %v1391_v17 = vadd.f32 %v1064_v62, %v1264_v34 }
 0x119   :  { %v516_v7 = vadd.f32 %v515_v60, %v1370_v57  ;;  %v1381_v8 = vadd.f32 %v1264_v34, %v377_v1  ;;  %v1384_v10 = vadd.f32 %v1264_v34, %v473_v6 }
 0x11b   :  { %v517_v15 = vadd.f32 %v516_v7, %v1381_v8  ;;  %v1424_v7 = vadd.f32 %v1264_v34, %v1266_v36  ;;  %v423_v36 = vadd.f32 %v1264_v34, %v1289_v50 }
 0x11d   :  { %v518_v18 = vadd.f32 %v517_v15, %v1387_v11  ;;  %v1067_v19 = vpop.f32.mrb[20].mxu0  ;;  %v1091_v20 = vpop.f32.mrb[20].mxu1 }
 0x11e   :  { %v390_v22 = vpop.f32.mrb[21].mxu0  ;;  %v1395_v24 = vadd.f32 %v1091_v20, %v1264_v34  ;;  %v486_v25 = vpop.f32.mrb[21].mxu1  ;;  %v1415_v62 = vadd.f32 %v1067_v19, %v1264_v34  ;;  %v1430_v20 = vadd.f32 %v1264_v34, %v1270_v40  ;;  %v415_v19 = vadd.f32 %v1259_v33, %v1264_v34 }
 0x11f   :  { %v1398_v27 = vadd.f32 %v1264_v34, %v390_v22  ;;  %v519_v28 = vadd.f32 %v518_v18, %v1391_v17  ;;  %v1068_v30 = vpop.f32.mrb[22].mxu0  ;;  %v1402_v31 = vadd.f32 %v1264_v34, %v486_v25  ;;  %v1092_v39 = vpop.f32.mrb[22].mxu1  ;;  %v418_v25 = vadd.f32 %v1268_v38, %v1264_v34 }
 0x120   :  { %v393_v46 = vpop.f32.mrb[23].mxu0  ;;  %v1405_v47 = vadd.f32 %v1092_v39, %v1264_v34  ;;  %v489_v49 = vpop.f32.mrb[23].mxu1  ;;  %v1419_v1 = vadd.f32 %v1068_v30, %v1264_v34  ;;  %v431_v40 = vadd.f32 %v1287_v48, %v1264_v34  ;;  %v434_v33 = vadd.f32 %v1295_v54, %v1264_v34 }
 0x121   :  { %v520_v52 = vadd.f32 %v519_v28, %v1398_v27  ;;  %v1409_v55 = vadd.f32 %v1264_v34, %v393_v46  ;;  %v1412_v60 = vadd.f32 %v1264_v34, %v489_v49  ;;  %v426_v46 = vadd.f32 %v1264_v34, %v1297_v56 }
 0x122   :  { %v439_v38 = vadd.f32 %v1264_v34, %v1314_v3 }
 0x123   :  { %v521_v0 = vadd.f32 %v520_v52, %v1409_v55 }
 0x125   :  { %v522_v6 = vadd.f32 %v521_v0, %v1415_v62 }
 0x127   :  { %v523_v15 = vadd.f32 %v522_v6, %v1419_v1 }
 0x129   :  { %v524_v18 = vadd.f32 %v523_v15, %v1424_v7 }
 0x12b   :  { %v525_v22 = vadd.f32 %v524_v18, %v1430_v20 }
 0x12d   :  { %v526_v28 = vadd.f32 %v525_v22, %v415_v19 }
 0x12f   :  { %v527_v30 = vadd.f32 %v526_v28, %v418_v25 }
 0x131   :  { %v528_v39 = vadd.f32 %v527_v30, %v423_v36 }
 0x133   :  { %v529_v49 = vadd.f32 %v528_v39, %v426_v46 }
 0x135   :  { %v530_v52 = vadd.f32 %v529_v49, %v431_v40 }
 0x137   :  { %v531_v0 = vadd.f32 %v530_v52, %v434_v33 }
 0x139   :  { %v532_v6 = vadd.f32 %v531_v0, %v439_v38 }
 0x13b   :  { %v533_v50 = vadd.f32 %v532_v6, %v1328_v13 }
 0x13d   :  { %v534_v15 = vadd.f32 %v533_v50, %v1312_v2 }
 0x13f   :  { %v535_v18 = vadd.f32 %v534_v15, %v1321_v9 }
 0x141   :  { %v536_v56 = vadd.f32 %v535_v18, %v1346_v26 }
 0x143   :  { %v537_v48 = vadd.f32 %v536_v56, %v1356_v35 }
 0x145   :  { %v538_v22 = vadd.f32 %v537_v48, %v1339_v21 }
 0x147   :  { %v539_v54 = vadd.f32 %v538_v22, %v1349_v29 }
 0x149   :  { %v540_v28 = vadd.f32 %v539_v54, %v1374_v63 }
 0x14b   :  { %v541_v34 = vadd.f32 %v540_v28, %v1384_v10 }
 0x14d   :  { %v542_v3 = vadd.f32 %v541_v34, %v1367_v53 }
 0x14f   :  { %v543_v30 = vadd.f32 %v542_v3, %v1377_v5 }
 0x151   :  { %v544_v39 = vadd.f32 %v543_v30, %v1402_v31 }
 0x153   :  { %v545_v49 = vadd.f32 %v544_v39, %v1412_v60 }
 0x155   :  { %v546_v52 = vadd.f32 %v545_v49, %v1395_v24 }
 0x157   :  { %v547_v0 = vadd.f32 %v546_v52, %v1405_v47 }
 0x159   :  { %v548_v6 = vrot.slane %v547_v0, 4 }
 0x15b   :  { %v549_v50 = vadd.f32 %v548_v6, %v547_v0 }
 0x15d   :  { %v550_v15 = vrot.slane %v549_v50, 2 }
 0x15f   :  { %v551_v18 = vadd.f32 %v550_v15, %v549_v50 }
 0x161   :  { %v552_v56 = vrot.slane %v551_v18, 1 }
 0x163   :  { %v553_v48 = vadd.f32 %v552_v56, %v551_v18 }
 0x165   :  { %v1462_v22 = vmul.f32 0.0026041667, %v553_v48 }
 0x167   :  { %v1465_v54 = vsub.f32 %v415_v19, %v1462_v22  ;;  %v1468_v28 = vsub.f32 %v418_v25, %v1462_v22  ;;  %v1471_v34 = vsub.f32 %v423_v36, %v1462_v22  ;;  %v1474_v3 = vsub.f32 %v426_v46, %v1462_v22 }
 0x168   :  { %v1477_v30 = vsub.f32 %v431_v40, %v1462_v22  ;;  %v1480_v39 = vsub.f32 %v434_v33, %v1462_v22  ;;  %v1483_v49 = vsub.f32 %v439_v38, %v1462_v22  ;;  %v1487_v19 = vsub.f32 %v1328_v13, %v1462_v22 }
 0x169   :  { %v1491_v25 = vsub.f32 %v1312_v2, %v1462_v22  ;;  %v1495_v36 = vsub.f32 %v1321_v9, %v1462_v22  ;;  %v1499_v46 = vsub.f32 %v1346_v26, %v1462_v22  ;;  %v1503_v40 = vsub.f32 %v1356_v35, %v1462_v22 }
 0x16a   :  { %v1507_v13 = vsub.f32 %v1339_v21, %v1462_v22  ;;  %v1511_v2 = vsub.f32 %v1349_v29, %v1462_v22  ;;  %v1515_v9 = vsub.f32 %v1374_v63, %v1462_v22  ;;  %v1519_v26 = vsub.f32 %v1384_v10, %v1462_v22 }
 0x16b   :  { %v1523_v35 = vsub.f32 %v1367_v53, %v1462_v22  ;;  %v1527_v21 = vsub.f32 %v1377_v5, %v1462_v22  ;;  %v1531_v29 = vsub.f32 %v1402_v31, %v1462_v22  ;;  %v1535_v63 = vsub.f32 %v1412_v60, %v1462_v22 }
 0x16c   :  { %v1539_v10 = vsub.f32 %v1395_v24, %v1462_v22  ;;  %v1543_v53 = vsub.f32 %v1405_v47, %v1462_v22  ;;  %v1547_v5 = vsub.f32 %v1273_v41, %v1462_v22  ;;  %v1551_v31 = vsub.f32 %v1276_v42, %v1462_v22 }
 0x16d   :  { %2081 = vst [vmem:[#allocation2_spill] sm:$0xff] %v1531_v29  ;;  %2082 = vst [vmem:[#allocation3_spill] sm:$0xff] %v1535_v63  ;;  %v1555_v60 = vsub.f32 %v1279_v43, %v1462_v22  ;;  %v1563_v47 = vsub.f32 %v1284_v45, %v1462_v22  ;;  %v1567_v41 = vsub.f32 %v1292_v51, %v1462_v22 }
 0x16e   :  { %v604_v24 = vmul.f32 %v1547_v5, %v1547_v5  ;;  %v605_v33 = vmul.f32 %v1551_v31, %v1551_v31  ;;  %v1573_v43 = vsub.f32 %v1301_v58, %v1462_v22  ;;  %v1579_v45 = vsub.f32 %v1304_v59, %v1462_v22 }
 0x16f   :  { %v606_v42 = vmul.f32 %v1555_v60, %v1555_v60  ;;  %v607_v52 = vmul.f32 %v1563_v47, %v1563_v47  ;;  %v608_v51 = vmul.f32 %v1567_v41, %v1567_v41  ;;  %v1585_v50 = vsub.f32 %v1308_v61, %v1462_v22 }
 0x170   :  { %v652_v38 = vadd.f32 %v605_v33, %v604_v24  ;;  %v609_v58 = vmul.f32 %v1573_v43, %v1573_v43  ;;  %v1591_v18 = vsub.f32 %v1317_v4, %v1462_v22  ;;  %v610_v59 = vmul.f32 %v1579_v45, %v1579_v45 }
 0x171   :  { %v1597_v48 = vsub.f32 %v1325_v12, %v1462_v22  ;;  %v611_v61 = vmul.f32 %v1585_v50, %v1585_v50  ;;  %v1603_v33 = vsub.f32 %v1331_v14, %v1462_v22 }
 0x172   :  { %v653_v0 = vadd.f32 %v652_v38, %v606_v42  ;;  %v612_v4 = vmul.f32 %v1591_v18, %v1591_v18  ;;  %v1609_v38 = vsub.f32 %v1335_v16, %v1462_v22 }
 0x173   :  { %v613_v12 = vmul.f32 %v1597_v48, %v1597_v48  ;;  %v614_v14 = vmul.f32 %v1603_v33, %v1603_v33 }
 0x174   :  { %v654_v6 = vadd.f32 %v653_v0, %v607_v52  ;;  %v1615_v0 = vsub.f32 %v1342_v23, %v1462_v22  ;;  %v615_v16 = vmul.f32 %v1609_v38, %v1609_v38 }
 0x176   :  { %v655_v15 = vadd.f32 %v654_v6, %v608_v51  ;;  %v1621_v6 = vsub.f32 %v1353_v32, %v1462_v22  ;;  %v616_v23 = vmul.f32 %v1615_v0, %v1615_v0 }
 0x178   :  { %v656_v56 = vadd.f32 %v655_v15, %v609_v58  ;;  %v1627_v15 = vsub.f32 %v1359_v37, %v1462_v22  ;;  %v617_v32 = vmul.f32 %v1621_v6, %v1621_v6 }
 0x17a   :  { %v657_v24 = vadd.f32 %v656_v56, %v610_v59  ;;  %v1633_v56 = vsub.f32 %v1363_v44, %v1462_v22  ;;  %v618_v37 = vmul.f32 %v1627_v15, %v1627_v15 }
 0x17c   :  { %v658_v42 = vadd.f32 %v657_v24, %v611_v61  ;;  %v1639_v24 = vsub.f32 %v1370_v57, %v1462_v22  ;;  %v619_v44 = vmul.f32 %v1633_v56, %v1633_v56 }
 0x17e   :  { %v659_v52 = vadd.f32 %v658_v42, %v612_v4  ;;  %v1645_v42 = vsub.f32 %v1381_v8, %v1462_v22  ;;  %v620_v57 = vmul.f32 %v1639_v24, %v1639_v24 }
 0x180   :  { %v660_v51 = vadd.f32 %v659_v52, %v613_v12  ;;  %v1651_v52 = vsub.f32 %v1387_v11, %v1462_v22  ;;  %v621_v8 = vmul.f32 %v1645_v42, %v1645_v42 }
 0x182   :  { %v661_v58 = vadd.f32 %v660_v51, %v614_v14  ;;  %v1657_v51 = vsub.f32 %v1391_v17, %v1462_v22  ;;  %v622_v11 = vmul.f32 %v1651_v52, %v1651_v52 }
 0x184   :  { %v662_v59 = vadd.f32 %v661_v58, %v615_v16  ;;  %v1663_v58 = vsub.f32 %v1398_v27, %v1462_v22  ;;  %v623_v17 = vmul.f32 %v1657_v51, %v1657_v51 }
 0x186   :  { %v663_v61 = vadd.f32 %v662_v59, %v616_v23  ;;  %v1669_v59 = vsub.f32 %v1409_v55, %v1462_v22  ;;  %v624_v27 = vmul.f32 %v1663_v58, %v1663_v58 }
 0x188   :  { %v664_v4 = vadd.f32 %v663_v61, %v617_v32  ;;  %v1675_v61 = vsub.f32 %v1415_v62, %v1462_v22  ;;  %v625_v55 = vmul.f32 %v1669_v59, %v1669_v59 }
 0x18a   :  { %v665_v12 = vadd.f32 %v664_v4, %v618_v37  ;;  %v1681_v4 = vsub.f32 %v1419_v1, %v1462_v22  ;;  %v626_v62 = vmul.f32 %v1675_v61, %v1675_v61 }
 0x18c   :  { %v666_v14 = vadd.f32 %v665_v12, %v619_v44  ;;  %v1687_v12 = vsub.f32 %v1424_v7, %v1462_v22  ;;  %v627_v1 = vmul.f32 %v1681_v4, %v1681_v4 }
 0x18e   :  { %v667_v16 = vadd.f32 %v666_v14, %v620_v57  ;;  %v1693_v14 = vsub.f32 %v1430_v20, %v1462_v22  ;;  %v631_v20 = vmul.f32 %v1468_v28, %v1468_v28 }
 0x190   :  { %v668_v23 = vadd.f32 %v667_v16, %v621_v8  ;;  %v628_v16 = vmul.f32 %v1687_v12, %v1687_v12  ;;  %v629_v7 = vmul.f32 %v1693_v14, %v1693_v14 }
 0x192   :  { %v669_v32 = vadd.f32 %v668_v23, %v622_v11 }
 0x194   :  { %v670_v37 = vadd.f32 %v669_v32, %v623_v17  ;;  %v630_v17 = vmul.f32 %v1465_v54, %v1465_v54 }
 0x196   :  { %v671_v44 = vadd.f32 %v670_v37, %v624_v27  ;;  %v632_v27 = vmul.f32 %v1471_v34, %v1471_v34 }
 0x198   :  { %v672_v57 = vadd.f32 %v671_v44, %v625_v55  ;;  %v633_v55 = vmul.f32 %v1474_v3, %v1474_v3 }
 0x19a   :  { %v673_v8 = vadd.f32 %v672_v57, %v626_v62  ;;  %v634_v62 = vmul.f32 %v1477_v30, %v1477_v30 }
 0x19c   :  { %v674_v11 = vadd.f32 %v673_v8, %v627_v1  ;;  %v635_v1 = vmul.f32 %v1480_v39, %v1480_v39 }
 0x19e   :  { %v675_v23 = vadd.f32 %v674_v11, %v628_v16  ;;  %v636_v16 = vmul.f32 %v1483_v49, %v1483_v49 }
 0x1a0   :  { %v676_v32 = vadd.f32 %v675_v23, %v629_v7  ;;  %v637_v7 = vmul.f32 %v1487_v19, %v1487_v19 }
 0x1a2   :  { %v677_v22 = vadd.f32 %v676_v32, %v630_v17  ;;  %v638_v17 = vmul.f32 %v1491_v25, %v1491_v25 }
 0x1a4   :  { %v678_v37 = vadd.f32 %v677_v22, %v631_v20  ;;  %v639_v20 = vmul.f32 %v1495_v36, %v1495_v36 }
 0x1a6   :  { %v679_v44 = vadd.f32 %v678_v37, %v632_v27  ;;  %v640_v27 = vmul.f32 %v1499_v46, %v1499_v46 }
 0x1a8   :  { %v680_v57 = vadd.f32 %v679_v44, %v633_v55  ;;  %v641_v55 = vmul.f32 %v1503_v40, %v1503_v40 }
 0x1aa   :  { %v681_v8 = vadd.f32 %v680_v57, %v634_v62  ;;  %v642_v62 = vmul.f32 %v1507_v13, %v1507_v13 }
 0x1ac   :  { %v682_v11 = vadd.f32 %v681_v8, %v635_v1  ;;  %v643_v1 = vmul.f32 %v1511_v2, %v1511_v2 }
 0x1ae   :  { %v683_v23 = vadd.f32 %v682_v11, %v636_v16  ;;  %v644_v16 = vmul.f32 %v1515_v9, %v1515_v9 }
 0x1b0   :  { %v684_v32 = vadd.f32 %v683_v23, %v637_v7  ;;  %v645_v7 = vmul.f32 %v1519_v26, %v1519_v26 }
 0x1b2   :  { %v685_v22 = vadd.f32 %v684_v32, %v638_v17  ;;  %v646_v17 = vmul.f32 %v1523_v35, %v1523_v35 }
 0x1b4   :  { %v686_v37 = vadd.f32 %v685_v22, %v639_v20  ;;  %v647_v20 = vmul.f32 %v1527_v21, %v1527_v21 }
 0x1b6   :  { %v687_v44 = vadd.f32 %v686_v37, %v640_v27  ;;  %v648_v27 = vmul.f32 %v1531_v29, %v1531_v29 }
 0x1b8   :  { %v688_v57 = vadd.f32 %v687_v44, %v641_v55  ;;  %v649_v55 = vmul.f32 %v1535_v63, %v1535_v63 }
 0x1ba   :  { %v689_v8 = vadd.f32 %v688_v57, %v642_v62  ;;  %v650_v62 = vmul.f32 %v1539_v10, %v1539_v10 }
 0x1bc   :  { %v690_v11 = vadd.f32 %v689_v8, %v643_v1  ;;  %v651_v1 = vmul.f32 %v1543_v53, %v1543_v53 }
 0x1be   :  { %v691_v23 = vadd.f32 %v690_v11, %v644_v16 }
 0x1c0   :  { %v692_v32 = vadd.f32 %v691_v23, %v645_v7 }
 0x1c2   :  { %v693_v22 = vadd.f32 %v692_v32, %v646_v17 }
 0x1c4   :  { %v694_v37 = vadd.f32 %v693_v22, %v647_v20 }
 0x1c6   :  { %v695_v44 = vadd.f32 %v694_v37, %v648_v27 }
 0x1c8   :  { %v696_v57 = vadd.f32 %v695_v44, %v649_v55 }
 0x1ca   :  { %v697_v8 = vadd.f32 %v696_v57, %v650_v62 }
 0x1cc   :  { %v698_v16 = vadd.f32 %v697_v8, %v651_v1 }
 0x1ce   :  { %v699_v11 = vrot.slane %v698_v16, 4 }
 0x1d0   :  { %v700_v7 = vadd.f32 %v699_v11, %v698_v16 }
 0x1d2   :  { %v701_v23 = vrot.slane %v700_v7, 2 }
 0x1d4   :  { %v702_v17 = vadd.f32 %v701_v23, %v700_v7  ;;  %v2084_v7 = vld [vmem:[#allocation3_spill] sm:$0xff] }
 0x1d6   :  { %v703_v32 = vrot.slane %v702_v17, 1 }
 0x1d8   :  { %v704_v29 = vadd.f32 %v703_v32, %v702_v17 }
 0x1da   :  { %v705_v20 = vmul.f32 0.0026041667, %v704_v29 }
 0x1dc   :  { %v706_v22 = vadd.f32 1e-05, %v705_v20 }
 0x1de   :  { %1141 = vrsqrt.f32 %v706_v22 }
 0x1e8   :  { %v1142_v63 = vpop.eup %1141 }
 0x1e9   :  { %v708_v27 = vmul.f32 %v1142_v63, %v1547_v5  ;;  %v709_v37 = vmul.f32 %v1142_v63, %v1551_v31  ;;  %v710_v55 = vmul.f32 %v1142_v63, %v1555_v60  ;;  %v711_v44 = vmul.f32 %v1142_v63, %v1563_v47 }
 0x1ea   :  { %v712_v62 = vmul.f32 %v1142_v63, %v1567_v41  ;;  %v713_v57 = vmul.f32 %v1142_v63, %v1573_v43  ;;  %v714_v1 = vmul.f32 %v1142_v63, %v1579_v45  ;;  %v715_v8 = vmul.f32 %v1142_v63, %v1585_v50 }
 0x1eb   :  { %v716_v29 = vmul.f32 %v1142_v63, %v1591_v18  ;;  %v717_v16 = vmul.f32 %v1142_v63, %v1597_v48  ;;  %v718_v5 = vmul.f32 %v1142_v63, %v1603_v33  ;;  %v719_v31 = vmul.f32 %v1142_v63, %v1609_v38 }
 0x1ec   :  { %v720_v60 = vmul.f32 %v1142_v63, %v1615_v0  ;;  %v721_v47 = vmul.f32 %v1142_v63, %v1621_v6  ;;  %v722_v41 = vmul.f32 %v1142_v63, %v1627_v15  ;;  %v723_v43 = vmul.f32 %v1142_v63, %v1633_v56 }
 0x1ed   :  { %v724_v45 = vmul.f32 %v1142_v63, %v1639_v24  ;;  %v725_v50 = vmul.f32 %v1142_v63, %v1645_v42  ;;  %v726_v18 = vmul.f32 %v1142_v63, %v1651_v52  ;;  %v727_v48 = vmul.f32 %v1142_v63, %v1657_v51 }
 0x1ee   :  { %v728_v33 = vmul.f32 %v1142_v63, %v1663_v58  ;;  %v729_v38 = vmul.f32 %v1142_v63, %v1669_v59  ;;  %v730_v0 = vmul.f32 %v1142_v63, %v1675_v61  ;;  %v731_v6 = vmul.f32 %v1142_v63, %v1681_v4 }
 0x1ef   :  { %v732_v15 = vmul.f32 %v1142_v63, %v1687_v12  ;;  %v733_v56 = vmul.f32 %v1142_v63, %v1693_v14  ;;  %v734_v24 = vmul.f32 %v1142_v63, %v1465_v54  ;;  %v735_v42 = vmul.f32 %v1142_v63, %v1468_v28  ;;  %v995_v54 = vld [vmem:[%s2077_s2 + $0x1] ss:$0 sm:$0xff] }
 0x1f0   :  { %v736_v52 = vmul.f32 %v1142_v63, %v1471_v34  ;;  %v737_v51 = vmul.f32 %v1142_v63, %v1474_v3  ;;  %v738_v58 = vmul.f32 %v1142_v63, %v1477_v30  ;;  %v739_v59 = vmul.f32 %v1142_v63, %v1480_v39 }
 0x1f1   :  { %v740_v61 = vmul.f32 %v1142_v63, %v1483_v49  ;;  %v741_v4 = vmul.f32 %v1142_v63, %v1487_v19  ;;  %v742_v12 = vmul.f32 %v1142_v63, %v1491_v25  ;;  %v743_v14 = vmul.f32 %v1142_v63, %v1495_v36  ;;  %v2083_v36 = vld [vmem:[#allocation2_spill] sm:$0xff] }
 0x1f2   :  { %v744_v28 = vmul.f32 %v1142_v63, %v1499_v46  ;;  %v745_v34 = vmul.f32 %v1142_v63, %v1503_v40  ;;  %v746_v3 = vmul.f32 %v1142_v63, %v1507_v13  ;;  %v747_v30 = vmul.f32 %v1142_v63, %v1511_v2 }
 0x1f3   :  { %v748_v39 = vmul.f32 %v1142_v63, %v1515_v9  ;;  %v749_v49 = vmul.f32 %v1142_v63, %v1519_v26  ;;  %v750_v19 = vmul.f32 %v1142_v63, %v1523_v35  ;;  %v751_v25 = vmul.f32 %v1142_v63, %v1527_v21 }
 0x1f4   :  { %v752_v11 = vmul.f32 %v1142_v63, %v2083_v36  ;;  %v753_v23 = vmul.f32 %v1142_v63, %v2084_v7  ;;  %v754_v46 = vmul.f32 %v1142_v63, %v1539_v10  ;;  %v755_v40 = vmul.f32 %v1142_v63, %v1543_v53 }
 0x1f5   :  { %v761_v17 = vmul.f32 %v995_v54, %v708_v27  ;;  %v762_v13 = vmul.f32 %v995_v54, %v709_v37  ;;  %v763_v32 = vmul.f32 %v995_v54, %v710_v55  ;;  %v764_v2 = vmul.f32 %v995_v54, %v711_v44 }
 0x1f6   :  { %v765_v20 = vmul.f32 %v995_v54, %v712_v62  ;;  %v766_v9 = vmul.f32 %v995_v54, %v713_v57  ;;  %v767_v22 = vmul.f32 %v995_v54, %v714_v1  ;;  %v768_v26 = vmul.f32 %v995_v54, %v715_v8 }
 0x1f7   :  { %v769_v35 = vmul.f32 %v995_v54, %v716_v29  ;;  %v770_v21 = vmul.f32 %v995_v54, %v717_v16  ;;  %v771_v36 = vmul.f32 %v995_v54, %v718_v5  ;;  %v772_v7 = vmul.f32 %v995_v54, %v719_v31 }
 0x1f8   :  { %v773_v10 = vmul.f32 %v995_v54, %v720_v60  ;;  %v774_v53 = vmul.f32 %v995_v54, %v721_v47  ;;  %v775_v63 = vmul.f32 %v995_v54, %v722_v41  ;;  %v776_v27 = vmul.f32 %v995_v54, %v723_v43 }
 0x1f9   :  { %v777_v37 = vmul.f32 %v995_v54, %v724_v45  ;;  %v778_v55 = vmul.f32 %v995_v54, %v725_v50  ;;  %v779_v44 = vmul.f32 %v995_v54, %v726_v18  ;;  %v780_v62 = vmul.f32 %v995_v54, %v727_v48 }
 0x1fa   :  { %v781_v57 = vmul.f32 %v995_v54, %v728_v33  ;;  %v782_v1 = vmul.f32 %v995_v54, %v729_v38  ;;  %v783_v8 = vmul.f32 %v995_v54, %v730_v0  ;;  %v784_v29 = vmul.f32 %v995_v54, %v731_v6  ;;  %v996_v38 = vld [vmem:[%s2077_s2 + $0x2] ss:$0 sm:$0xff] }
 0x1fb   :  { %v785_v16 = vmul.f32 %v995_v54, %v732_v15  ;;  %v786_v5 = vmul.f32 %v995_v54, %v733_v56  ;;  %v787_v31 = vmul.f32 %v995_v54, %v734_v24  ;;  %v788_v60 = vmul.f32 %v995_v54, %v735_v42 }
 0x1fc   :  { %v789_v47 = vmul.f32 %v995_v54, %v736_v52  ;;  %v790_v41 = vmul.f32 %v995_v54, %v737_v51  ;;  %v791_v43 = vmul.f32 %v995_v54, %v738_v58  ;;  %v792_v45 = vmul.f32 %v995_v54, %v739_v59 }
 0x1fd   :  { %v793_v50 = vmul.f32 %v995_v54, %v740_v61  ;;  %v794_v18 = vmul.f32 %v995_v54, %v741_v4  ;;  %v795_v48 = vmul.f32 %v995_v54, %v742_v12  ;;  %v796_v33 = vmul.f32 %v995_v54, %v743_v14 }
 0x1fe   :  { %v797_v0 = vmul.f32 %v995_v54, %v744_v28  ;;  %v798_v6 = vmul.f32 %v995_v54, %v745_v34  ;;  %v799_v15 = vmul.f32 %v995_v54, %v746_v3  ;;  %v800_v56 = vmul.f32 %v995_v54, %v747_v30 }
 0x1ff   :  { %v801_v24 = vmul.f32 %v995_v54, %v748_v39  ;;  %v802_v42 = vmul.f32 %v995_v54, %v749_v49  ;;  %v803_v52 = vmul.f32 %v995_v54, %v750_v19  ;;  %v804_v51 = vmul.f32 %v995_v54, %v751_v25 }
 0x200   :  { %v805_v58 = vmul.f32 %v995_v54, %v752_v11  ;;  %v806_v59 = vmul.f32 %v995_v54, %v753_v23  ;;  %v807_v61 = vmul.f32 %v995_v54, %v754_v46  ;;  %v808_v4 = vmul.f32 %v995_v54, %v755_v40 }
 0x201   :  { %v814_v12 = vadd.f32 %v996_v38, %v761_v17  ;;  %v815_v14 = vadd.f32 %v996_v38, %v762_v13  ;;  %v816_v28 = vadd.f32 %v996_v38, %v763_v32  ;;  %v817_v34 = vadd.f32 %v996_v38, %v764_v2 }
 0x202   :  { %v1799_v3 = vadd.f32 %v996_v38, %v765_v20  ;;  %v1801_v30 = vadd.f32 %v996_v38, %v766_v9  ;;  %v1803_v39 = vadd.f32 %v996_v38, %v767_v22  ;;  %v1805_v49 = vadd.f32 %v996_v38, %v768_v26 }
 0x203   :  { %v1807_v19 = vadd.f32 %v996_v38, %v769_v35  ;;  %v1809_v25 = vadd.f32 %v996_v38, %v770_v21  ;;  %v1811_v11 = vadd.f32 %v996_v38, %v771_v36  ;;  %v1813_v23 = vadd.f32 %v996_v38, %v772_v7 }
 0x204   :  { %v1815_v54 = vadd.f32 %v996_v38, %v773_v10  ;;  %v1817_v46 = vadd.f32 %v996_v38, %v774_v53  ;;  %v1819_v40 = vadd.f32 %v996_v38, %v775_v63  ;;  %v1821_v17 = vadd.f32 %v996_v38, %v776_v27 }
 0x205   :  { %v1823_v13 = vadd.f32 %v996_v38, %v777_v37  ;;  %v1825_v32 = vadd.f32 %v996_v38, %v778_v55  ;;  %v1827_v2 = vadd.f32 %v996_v38, %v779_v44  ;;  %v1829_v20 = vadd.f32 %v996_v38, %v780_v62 }
 0x206   :  { %v1831_v9 = vadd.f32 %v996_v38, %v781_v57  ;;  %v1833_v22 = vadd.f32 %v996_v38, %v782_v1  ;;  %v1835_v26 = vadd.f32 %v996_v38, %v783_v8  ;;  %v1837_v35 = vadd.f32 %v996_v38, %v784_v29 }
 0x207   :  { %v1839_v21 = vadd.f32 %v996_v38, %v785_v16  ;;  %v1841_v36 = vadd.f32 %v996_v38, %v786_v5  ;;  %v1843_v7 = vadd.f32 %v996_v38, %v787_v31  ;;  %v1845_v10 = vadd.f32 %v996_v38, %v788_v60 }
 0x208   :  { %v1847_v53 = vadd.f32 %v996_v38, %v789_v47  ;;  %v1849_v63 = vadd.f32 %v996_v38, %v790_v41  ;;  %v1851_v27 = vadd.f32 %v996_v38, %v791_v43  ;;  %v1853_v37 = vadd.f32 %v996_v38, %v792_v45 }
 0x209   :  { %v1855_v55 = vadd.f32 %v996_v38, %v793_v50  ;;  %v1857_v44 = vadd.f32 %v996_v38, %v794_v18  ;;  %v1859_v62 = vadd.f32 %v996_v38, %v795_v48  ;;  %v1861_v57 = vadd.f32 %v996_v38, %v796_v33 }
 0x20a   :  { %v1863_v1 = vadd.f32 %v996_v38, %v797_v0  ;;  %v1865_v8 = vadd.f32 %v996_v38, %v798_v6  ;;  %v1867_v29 = vadd.f32 %v996_v38, %v799_v15  ;;  %v1869_v16 = vadd.f32 %v996_v38, %v800_v56 }
 0x20b   :  { %v1871_v5 = vadd.f32 %v996_v38, %v801_v24  ;;  %v1873_v31 = vadd.f32 %v996_v38, %v802_v42  ;;  %v1875_v60 = vadd.f32 %v996_v38, %v803_v52  ;;  %v1877_v47 = vadd.f32 %v996_v38, %v804_v51 }
 0x20c   :  { %v1879_v41 = vadd.f32 %v996_v38, %v805_v58  ;;  %v1881_v43 = vadd.f32 %v996_v38, %v806_v59  ;;  %v1883_v45 = vadd.f32 %v996_v38, %v807_v61  ;;  %v1885_v50 = vadd.f32 %v996_v38, %v808_v4 }
 0x20d   :  { %v862_v18 = vmax.f32 %v814_v12, 0.0  ;;  %v863_v48 = vmax.f32 %v815_v14, 0.0  ;;  %v864_v33 = vmax.f32 %v816_v28, 0.0  ;;  %v865_v0 = vmax.f32 %v817_v34, 0.0 }
 0x20e   :  { %v866_v6 = vmax.f32 %v1799_v3, 0.0  ;;  %v867_v15 = vmax.f32 %v1801_v30, 0.0  ;;  %v868_v56 = vmax.f32 %v1803_v39, 0.0  ;;  %v869_v24 = vmax.f32 %v1805_v49, 0.0 }
 0x20f   :  { %v870_v42 = vmax.f32 %v1807_v19, 0.0  ;;  %v871_v52 = vmax.f32 %v1809_v25, 0.0  ;;  %v872_v51 = vmax.f32 %v1811_v11, 0.0  ;;  %v873_v38 = vmax.f32 %v1813_v23, 0.0  ;;  %910 = vst [vmem:[%s2078_s3] sm:$0xff] %v862_v18  ;;  %911 = vst [vmem:[%s2078_s3 + $0x8] sm:$0xff] %v863_v48 }
 0x210   :  { %912 = vst [vmem:[%s2078_s3 + $0x10] sm:$0xff] %v864_v33  ;;  %913 = vst [vmem:[%s2078_s3 + $0x18] sm:$0xff] %v865_v0  ;;  %v874_v58 = vmax.f32 %v1815_v54, 0.0  ;;  %v875_v59 = vmax.f32 %v1817_v46, 0.0  ;;  %v876_v61 = vmax.f32 %v1819_v40, 0.0  ;;  %v877_v4 = vmax.f32 %v1821_v17, 0.0 }
 0x211   :  { %914 = vst [vmem:[%s2078_s3 + $0x20] sm:$0xff] %v866_v6  ;;  %915 = vst [vmem:[%s2078_s3 + $0x28] sm:$0xff] %v867_v15  ;;  %v878_v12 = vmax.f32 %v1823_v13, 0.0  ;;  %v879_v14 = vmax.f32 %v1825_v32, 0.0  ;;  %v880_v28 = vmax.f32 %v1827_v2, 0.0  ;;  %v881_v34 = vmax.f32 %v1829_v20, 0.0 }
 0x212   :  { %916 = vst [vmem:[%s2078_s3 + $0x30] sm:$0xff] %v868_v56  ;;  %917 = vst [vmem:[%s2078_s3 + $0x38] sm:$0xff] %v869_v24  ;;  %v882_v3 = vmax.f32 %v1831_v9, 0.0  ;;  %v883_v30 = vmax.f32 %v1833_v22, 0.0  ;;  %v884_v39 = vmax.f32 %v1835_v26, 0.0  ;;  %v885_v49 = vmax.f32 %v1837_v35, 0.0 }
 0x213   :  { %918 = vst [vmem:[%s2078_s3 + $0x40] sm:$0xff] %v870_v42  ;;  %919 = vst [vmem:[%s2078_s3 + $0x48] sm:$0xff] %v871_v52  ;;  %v886_v19 = vmax.f32 %v1839_v21, 0.0  ;;  %v887_v25 = vmax.f32 %v1841_v36, 0.0  ;;  %v888_v11 = vmax.f32 %v1843_v7, 0.0  ;;  %v889_v23 = vmax.f32 %v1845_v10, 0.0 }
 0x214   :  { %920 = vst [vmem:[%s2078_s3 + $0x50] sm:$0xff] %v872_v51  ;;  %921 = vst [vmem:[%s2078_s3 + $0x58] sm:$0xff] %v873_v38  ;;  %v890_v54 = vmax.f32 %v1847_v53, 0.0  ;;  %v891_v46 = vmax.f32 %v1849_v63, 0.0  ;;  %v892_v40 = vmax.f32 %v1851_v27, 0.0  ;;  %v893_v17 = vmax.f32 %v1853_v37, 0.0 }
 0x215   :  { %922 = vst [vmem:[%s2078_s3 + $0x60] sm:$0xff] %v874_v58  ;;  %923 = vst [vmem:[%s2078_s3 + $0x68] sm:$0xff] %v875_v59  ;;  %v894_v13 = vmax.f32 %v1855_v55, 0.0  ;;  %v895_v32 = vmax.f32 %v1857_v44, 0.0  ;;  %v896_v2 = vmax.f32 %v1859_v62, 0.0  ;;  %v897_v20 = vmax.f32 %v1861_v57, 0.0 }
 0x216   :  { %924 = vst [vmem:[%s2078_s3 + $0x70] sm:$0xff] %v876_v61  ;;  %925 = vst [vmem:[%s2078_s3 + $0x78] sm:$0xff] %v877_v4  ;;  %v898_v9 = vmax.f32 %v1863_v1, 0.0  ;;  %v899_v22 = vmax.f32 %v1865_v8, 0.0  ;;  %v900_v26 = vmax.f32 %v1867_v29, 0.0  ;;  %v901_v35 = vmax.f32 %v1869_v16, 0.0 }
 0x217   :  { %926 = vst [vmem:[%s2078_s3 + $0x80] sm:$0xff] %v878_v12  ;;  %927 = vst [vmem:[%s2078_s3 + $0x88] sm:$0xff] %v879_v14  ;;  %v902_v21 = vmax.f32 %v1871_v5, 0.0  ;;  %v903_v36 = vmax.f32 %v1873_v31, 0.0  ;;  %v904_v7 = vmax.f32 %v1875_v60, 0.0  ;;  %v905_v10 = vmax.f32 %v1877_v47, 0.0 }
 0x218   :  { %928 = vst [vmem:[%s2078_s3 + $0x90] sm:$0xff] %v880_v28  ;;  %929 = vst [vmem:[%s2078_s3 + $0x98] sm:$0xff] %v881_v34  ;;  %v906_v53 = vmax.f32 %v1879_v41, 0.0  ;;  %v907_v63 = vmax.f32 %v1881_v43, 0.0  ;;  %v908_v27 = vmax.f32 %v1883_v45, 0.0  ;;  %v909_v37 = vmax.f32 %v1885_v50, 0.0 }
 0x219   :  { %930 = vst [vmem:[%s2078_s3 + $0xa0] sm:$0xff] %v882_v3  ;;  %931 = vst [vmem:[%s2078_s3 + $0xa8] sm:$0xff] %v883_v30 }
 0x21a   :  { %932 = vst [vmem:[%s2078_s3 + $0xb0] sm:$0xff] %v884_v39  ;;  %933 = vst [vmem:[%s2078_s3 + $0xb8] sm:$0xff] %v885_v49 }
 0x21b   :  { %934 = vst [vmem:[%s2078_s3 + $0xc0] sm:$0xff] %v886_v19  ;;  %935 = vst [vmem:[%s2078_s3 + $0xc8] sm:$0xff] %v887_v25 }
 0x21c   :  { %936 = vst [vmem:[%s2078_s3 + $0xd0] sm:$0xff] %v888_v11  ;;  %937 = vst [vmem:[%s2078_s3 + $0xd8] sm:$0xff] %v889_v23 }
 0x21d   :  { %938 = vst [vmem:[%s2078_s3 + $0xe0] sm:$0xff] %v890_v54  ;;  %939 = vst [vmem:[%s2078_s3 + $0xe8] sm:$0xff] %v891_v46 }
 0x21e   :  { %940 = vst [vmem:[%s2078_s3 + $0xf0] sm:$0xff] %v892_v40  ;;  %941 = vst [vmem:[%s2078_s3 + $0xf8] sm:$0xff] %v893_v17 }
 0x21f   :  { %942 = vst [vmem:[%s2078_s3 + $0x100] sm:$0xff] %v894_v13  ;;  %943 = vst [vmem:[%s2078_s3 + $0x108] sm:$0xff] %v895_v32 }
 0x220   :  { %944 = vst [vmem:[%s2078_s3 + $0x110] sm:$0xff] %v896_v2  ;;  %945 = vst [vmem:[%s2078_s3 + $0x118] sm:$0xff] %v897_v20 }
 0x221   :  { %946 = vst [vmem:[%s2078_s3 + $0x120] sm:$0xff] %v898_v9  ;;  %947 = vst [vmem:[%s2078_s3 + $0x128] sm:$0xff] %v899_v22 }
 0x222   :  { %948 = vst [vmem:[%s2078_s3 + $0x130] sm:$0xff] %v900_v26  ;;  %949 = vst [vmem:[%s2078_s3 + $0x138] sm:$0xff] %v901_v35 }
 0x223   :  { %950 = vst [vmem:[%s2078_s3 + $0x140] sm:$0xff] %v902_v21  ;;  %951 = vst [vmem:[%s2078_s3 + $0x148] sm:$0xff] %v903_v36 }
 0x224   :  { %952 = vst [vmem:[%s2078_s3 + $0x150] sm:$0xff] %v904_v7  ;;  %953 = vst [vmem:[%s2078_s3 + $0x158] sm:$0xff] %v905_v10 }
 0x225   :  { %954 = vst [vmem:[%s2078_s3 + $0x160] sm:$0xff] %v906_v53  ;;  %955 = vst [vmem:[%s2078_s3 + $0x168] sm:$0xff] %v907_v63 }
 0x226   :  { %956 = vst [vmem:[%s2078_s3 + $0x170] sm:$0xff] %v908_v27  ;;  %957 = vst [vmem:[%s2078_s3 + $0x178] sm:$0xff] %v909_v37 }

// kernel: _lambda_.13
= control target key start
LH: loop header
LB: loop body
LE: loop exit
PB: predicated region body
PF: predicated region fallthrough
CT: control target
= control target key end

     0   :  { %s548_s1 = inlined_call_operand.vmem [shape: bf16[128,128], index: 1, kind: input, shape index: {}]   ;;  %s549_s0 = inlined_call_operand.vmem [shape: bf16[96,128], index: 0, kind: input, shape index: {}]   ;;  %s550_s2 = inlined_call_operand.vmem [shape: f32[3,128], index: 2, kind: input, shape index: {}]   ;;  %s551_s3 = inlined_call_operand.vmem [shape: f32[96,128], index: 3, kind: output, shape index: {}]  }
   0x1   :  { %v425_v0 = vld [vmem:[%s548_s1] sm:$0xff]   ;;  %v426_v1 = vld [vmem:[%s548_s1 + $0x8] sm:$0xff]   ;;  %v427_v2 = vld [vmem:[%s548_s1 + $0x10] sm:$0xff]  }
   0x2   :  { %381 = vmatprep.subr.bf16.mxu0 %v425_v0  ;;  %409 = vmatprep.subr.bf16.mxu1 %v425_v0  ;;  %v428_v3 = vld [vmem:[%s548_s1 + $0x18] sm:$0xff]   ;;  %v433_v4 = vld [vmem:[%s549_s0] sm:$0xff]   ;;  %v435_v5 = vld [vmem:[%s549_s0 + $0x10] sm:$0xff]  }
   0x3   :  { %382 = vmatpush3.bf16.msra.mxu0 %v425_v0  ;;  %417 = vmatpush3.bf16.msra.mxu1 %v425_v0  ;;  %v429_v6 = vld [vmem:[%s548_s1 + $0x20] sm:$0xff]   ;;  %v430_v7 = vld [vmem:[%s548_s1 + $0x28] sm:$0xff]   ;;  %v431_v8 = vld [vmem:[%s548_s1 + $0x30] sm:$0xff]  }
   0x4   :  { %383 = vmatprep.subr.bf16.mxu0 %v426_v1  ;;  %410 = vmatprep.subr.bf16.mxu1 %v426_v1  ;;  %v432_v9 = vld [vmem:[%s548_s1 + $0x38] sm:$0xff]   ;;  %v434_v10 = vld [vmem:[%s549_s0 + $0x8] sm:$0xff]   ;;  %v437_v12 = vld [vmem:[%s549_s0 + $0x20] sm:$0xff]  }
   0x5   :  { %397 = vmatprep.mubr.bf16.mxu0 %v433_v4  ;;  %401 = vmatprep.mubr.bf16.mxu1 %v435_v5  ;;  %v436_v11 = vld [vmem:[%s549_s0 + $0x18] sm:$0xff]   ;;  %v438_v13 = vld [vmem:[%s549_s0 + $0x28] sm:$0xff]   ;;  %v350_v16 = vld [vmem:[%s550_s2] ss:$0 sm:$0xff] }
   0x7   :  { %384 = vmatpush3.bf16.msra.mxu0 %v426_v1  ;;  %418 = vmatpush3.bf16.msra.mxu1 %v426_v1 }
   0x8   :  { %385 = vmatprep.subr.bf16.mxu0 %v427_v2  ;;  %411 = vmatprep.subr.bf16.mxu1 %v427_v2 }
   0xb   :  { %386 = vmatpush3.bf16.msra.mxu0 %v427_v2  ;;  %419 = vmatpush3.bf16.msra.mxu1 %v427_v2 }
   0xc   :  { %387 = vmatprep.subr.bf16.mxu0 %v428_v3  ;;  %412 = vmatprep.subr.bf16.mxu1 %v428_v3 }
   0xf   :  { %388 = vmatpush3.bf16.msra.mxu0 %v428_v3  ;;  %420 = vmatpush3.bf16.msra.mxu1 %v428_v3 }
  0x10   :  { %389 = vmatprep.subr.bf16.mxu0 %v429_v6  ;;  %413 = vmatprep.subr.bf16.mxu1 %v429_v6 }
  0x13   :  { %390 = vmatpush3.bf16.msra.mxu0 %v429_v6  ;;  %421 = vmatpush3.bf16.msra.mxu1 %v429_v6 }
  0x14   :  { %391 = vmatprep.subr.bf16.mxu0 %v430_v7  ;;  %414 = vmatprep.subr.bf16.mxu1 %v430_v7 }
  0x17   :  { %392 = vmatpush3.bf16.msra.mxu0 %v430_v7  ;;  %422 = vmatpush3.bf16.msra.mxu1 %v430_v7 }
  0x18   :  { %393 = vmatprep.subr.bf16.mxu0 %v431_v8  ;;  %415 = vmatprep.subr.bf16.mxu1 %v431_v8 }
  0x1b   :  { %394 = vmatpush3.bf16.msra.mxu0 %v431_v8  ;;  %423 = vmatpush3.bf16.msra.mxu1 %v431_v8 }
  0x1c   :  { %395 = vmatprep.subr.bf16.mxu0 %v432_v9  ;;  %416 = vmatprep.subr.bf16.mxu1 %v432_v9 }
  0x1f   :  { %396 = vmatpush3.bf16.msra.mxu0 %v432_v9  ;;  %424 = vmatpush3.bf16.msra.mxu1 %v432_v9 }
  0x22   :  { %398 = vmatmul.mubr.bf16.vlgmr.msra.gmra.mrb[0].mxu0 %v434_v10  ;;  %402 = vmatmul.mubr.bf16.vlgmr.msra.gmra.mrb[0].mxu1 %v436_v11 }
  0x23   :  { %405 = vmatprep.mubr.bf16.mxu1 %v437_v12 }
  0x2a   :  { %406 = vmatmul.mubr.bf16.gmra.mrb[4].mxu1 %v438_v13 }
  0xf5   :  { %v399_v14 = vpop.f32.mrb[0].mxu0  ;;  %v403_v15 = vpop.f32.mrb[0].mxu1 }
  0xf6   :  { %v166_v17 = vpop.f32.mrb[1].mxu0  ;;  %v182_v18 = vpop.f32.mrb[1].mxu1  ;;  %v175_v25 = vadd.f32 %v399_v14, %v350_v16  ;;  %v191_v37 = vadd.f32 %v403_v15, %v350_v16 }
  0xf7   :  { %v400_v19 = vpop.f32.mrb[2].mxu0  ;;  %v404_v20 = vpop.f32.mrb[2].mxu1  ;;  %v167_v23 = vadd.f32 %v350_v16, %v166_v17  ;;  %v183_v29 = vadd.f32 %v350_v16, %v182_v18 }
  0xf8   :  { %v169_v21 = vpop.f32.mrb[3].mxu0  ;;  %v185_v22 = vpop.f32.mrb[3].mxu1  ;;  %v178_v27 = vadd.f32 %v400_v19, %v350_v16  ;;  %v194_v39 = vadd.f32 %v404_v20, %v350_v16 }
  0xf9   :  { %v170_v24 = vadd.f32 %v350_v16, %v169_v21  ;;  %v186_v36 = vadd.f32 %v350_v16, %v185_v22 }
  0xfb   :  { %v213_v26 = vadd.f32 %v170_v24, %v167_v23 }
  0xfd   :  { %v214_v28 = vadd.f32 %v213_v26, %v175_v25  ;;  %v407_v30 = vpop.f32.mrb[4].mxu1 }
  0xfe   :  { %v198_v31 = vpop.f32.mrb[5].mxu1  ;;  %v207_v45 = vadd.f32 %v407_v30, %v350_v16 }
  0xff   :  { %v215_v32 = vadd.f32 %v214_v28, %v178_v27  ;;  %v408_v33 = vpop.f32.mrb[6].mxu1  ;;  %v199_v41 = vadd.f32 %v350_v16, %v198_v31 }
 0x100   :  { %v201_v34 = vpop.f32.mrb[7].mxu1  ;;  %v210_v47 = vadd.f32 %v408_v33, %v350_v16 }
 0x101   :  { %v216_v35 = vadd.f32 %v215_v32, %v183_v29  ;;  %v202_v44 = vadd.f32 %v350_v16, %v201_v34 }
 0x103   :  { %v217_v38 = vadd.f32 %v216_v35, %v186_v36 }
 0x105   :  { %v218_v40 = vadd.f32 %v217_v38, %v191_v37 }
 0x107   :  { %v219_v42 = vadd.f32 %v218_v40, %v194_v39 }
 0x109   :  { %v220_v43 = vadd.f32 %v219_v42, %v199_v41 }
 0x10b   :  { %v221_v46 = vadd.f32 %v220_v43, %v202_v44 }
 0x10d   :  { %v222_v48 = vadd.f32 %v221_v46, %v207_v45 }
 0x10f   :  { %v223_v49 = vadd.f32 %v222_v48, %v210_v47 }
 0x111   :  { %v224_v50 = vrot.slane %v223_v49, 4 }
 0x113   :  { %v225_v51 = vadd.f32 %v224_v50, %v223_v49  ;;  %v366_v50 = vld [vmem:[%s550_s2 + $0x2] ss:$0 sm:$0xff] }
 0x115   :  { %v226_v52 = vrot.slane %v225_v51, 2 }
 0x117   :  { %v227_v53 = vadd.f32 %v226_v52, %v225_v51 }
 0x119   :  { %v228_v54 = vrot.slane %v227_v53, 1 }
 0x11b   :  { %v229_v55 = vadd.f32 %v228_v54, %v227_v53 }
 0x11d   :  { %v231_v56 = vmul.f32 0.010416667, %v229_v55 }
 0x11f   :  { %v232_v57 = vsub.f32 %v167_v23, %v231_v56  ;;  %v233_v58 = vsub.f32 %v170_v24, %v231_v56  ;;  %v234_v59 = vsub.f32 %v175_v25, %v231_v56  ;;  %v235_v60 = vsub.f32 %v178_v27, %v231_v56 }
 0x120   :  { %v236_v61 = vsub.f32 %v183_v29, %v231_v56  ;;  %v237_v62 = vsub.f32 %v186_v36, %v231_v56  ;;  %v238_v63 = vsub.f32 %v191_v37, %v231_v56  ;;  %v239_v0 = vsub.f32 %v194_v39, %v231_v56  ;;  %v365_v37 = vld [vmem:[%s550_s2 + $0x1] ss:$0 sm:$0xff] }
 0x121   :  { %v240_v1 = vsub.f32 %v199_v41, %v231_v56  ;;  %v241_v2 = vsub.f32 %v202_v44, %v231_v56  ;;  %v242_v3 = vsub.f32 %v207_v45, %v231_v56  ;;  %v243_v4 = vsub.f32 %v210_v47, %v231_v56 }
 0x122   :  { %v244_v5 = vmul.f32 %v232_v57, %v232_v57  ;;  %v245_v6 = vmul.f32 %v233_v58, %v233_v58  ;;  %v246_v7 = vmul.f32 %v234_v59, %v234_v59  ;;  %v247_v9 = vmul.f32 %v235_v60, %v235_v60 }
 0x123   :  { %v248_v11 = vmul.f32 %v236_v61, %v236_v61  ;;  %v249_v13 = vmul.f32 %v237_v62, %v237_v62  ;;  %v250_v15 = vmul.f32 %v238_v63, %v238_v63  ;;  %v251_v17 = vmul.f32 %v239_v0, %v239_v0 }
 0x124   :  { %v256_v8 = vadd.f32 %v245_v6, %v244_v5  ;;  %v252_v19 = vmul.f32 %v240_v1, %v240_v1  ;;  %v253_v21 = vmul.f32 %v241_v2, %v241_v2  ;;  %v254_v23 = vmul.f32 %v242_v3, %v242_v3 }
 0x125   :  { %v255_v25 = vmul.f32 %v243_v4, %v243_v4 }
 0x126   :  { %v257_v10 = vadd.f32 %v256_v8, %v246_v7 }
 0x128   :  { %v258_v12 = vadd.f32 %v257_v10, %v247_v9 }
 0x12a   :  { %v259_v14 = vadd.f32 %v258_v12, %v248_v11 }
 0x12c   :  { %v260_v16 = vadd.f32 %v259_v14, %v249_v13 }
 0x12e   :  { %v261_v18 = vadd.f32 %v260_v16, %v250_v15 }
 0x130   :  { %v262_v20 = vadd.f32 %v261_v18, %v251_v17 }
 0x132   :  { %v263_v22 = vadd.f32 %v262_v20, %v252_v19 }
 0x134   :  { %v264_v24 = vadd.f32 %v263_v22, %v253_v21 }
 0x136   :  { %v265_v26 = vadd.f32 %v264_v24, %v254_v23 }
 0x138   :  { %v266_v27 = vadd.f32 %v265_v26, %v255_v25 }
 0x13a   :  { %v267_v28 = vrot.slane %v266_v27, 4 }
 0x13c   :  { %v268_v29 = vadd.f32 %v267_v28, %v266_v27 }
 0x13e   :  { %v269_v30 = vrot.slane %v268_v29, 2 }
 0x140   :  { %v270_v31 = vadd.f32 %v269_v30, %v268_v29 }
 0x142   :  { %v271_v32 = vrot.slane %v270_v31, 1 }
 0x144   :  { %v272_v33 = vadd.f32 %v271_v32, %v270_v31 }
 0x146   :  { %v273_v34 = vmul.f32 0.010416667, %v272_v33 }
 0x148   :  { %v274_v35 = vadd.f32 1e-05, %v273_v34 }
 0x14a   :  { %439 = vrsqrt.f32 %v274_v35 }
 0x154   :  { %v440_v36 = vpop.eup %439 }
 0x155   :  { %v276_v38 = vmul.f32 %v440_v36, %v232_v57  ;;  %v277_v39 = vmul.f32 %v440_v36, %v233_v58  ;;  %v278_v40 = vmul.f32 %v440_v36, %v234_v59  ;;  %v279_v41 = vmul.f32 %v440_v36, %v235_v60 }
 0x156   :  { %v280_v42 = vmul.f32 %v440_v36, %v236_v61  ;;  %v281_v43 = vmul.f32 %v440_v36, %v237_v62  ;;  %v282_v44 = vmul.f32 %v440_v36, %v238_v63  ;;  %v283_v45 = vmul.f32 %v440_v36, %v239_v0 }
 0x157   :  { %v284_v46 = vmul.f32 %v440_v36, %v240_v1  ;;  %v285_v47 = vmul.f32 %v440_v36, %v241_v2  ;;  %v286_v48 = vmul.f32 %v440_v36, %v242_v3  ;;  %v287_v49 = vmul.f32 %v440_v36, %v243_v4 }
 0x158   :  { %v293_v51 = vmul.f32 %v365_v37, %v276_v38  ;;  %v294_v52 = vmul.f32 %v365_v37, %v277_v39  ;;  %v295_v53 = vmul.f32 %v365_v37, %v278_v40  ;;  %v296_v54 = vmul.f32 %v365_v37, %v279_v41 }
 0x159   :  { %v297_v55 = vmul.f32 %v365_v37, %v280_v42  ;;  %v298_v56 = vmul.f32 %v365_v37, %v281_v43  ;;  %v299_v57 = vmul.f32 %v365_v37, %v282_v44  ;;  %v300_v58 = vmul.f32 %v365_v37, %v283_v45 }
 0x15a   :  { %v301_v59 = vmul.f32 %v365_v37, %v284_v46  ;;  %v302_v60 = vmul.f32 %v365_v37, %v285_v47  ;;  %v303_v61 = vmul.f32 %v365_v37, %v286_v48  ;;  %v304_v62 = vmul.f32 %v365_v37, %v287_v49 }
 0x15b   :  { %v310_v63 = vadd.f32 %v366_v50, %v293_v51  ;;  %v311_v0 = vadd.f32 %v366_v50, %v294_v52  ;;  %v312_v1 = vadd.f32 %v366_v50, %v295_v53  ;;  %v313_v2 = vadd.f32 %v366_v50, %v296_v54 }
 0x15c   :  { %v314_v3 = vadd.f32 %v366_v50, %v297_v55  ;;  %v315_v4 = vadd.f32 %v366_v50, %v298_v56  ;;  %v316_v5 = vadd.f32 %v366_v50, %v299_v57  ;;  %v317_v6 = vadd.f32 %v366_v50, %v300_v58 }
 0x15d   :  { %v318_v7 = vadd.f32 %v366_v50, %v301_v59  ;;  %v319_v8 = vadd.f32 %v366_v50, %v302_v60  ;;  %v320_v9 = vadd.f32 %v366_v50, %v303_v61  ;;  %v321_v10 = vadd.f32 %v366_v50, %v304_v62 }
 0x15e   :  { %v322_v11 = vmax.f32 %v310_v63, 0.0  ;;  %v323_v12 = vmax.f32 %v311_v0, 0.0  ;;  %v324_v13 = vmax.f32 %v312_v1, 0.0  ;;  %v325_v14 = vmax.f32 %v313_v2, 0.0 }
 0x15f   :  { %v326_v15 = vmax.f32 %v314_v3, 0.0  ;;  %v327_v16 = vmax.f32 %v315_v4, 0.0  ;;  %v328_v17 = vmax.f32 %v316_v5, 0.0  ;;  %v329_v18 = vmax.f32 %v317_v6, 0.0 }
 0x160   :  { %v330_v19 = vmax.f32 %v318_v7, 0.0  ;;  %v331_v20 = vmax.f32 %v319_v8, 0.0  ;;  %v332_v21 = vmax.f32 %v320_v9, 0.0  ;;  %v333_v22 = vmax.f32 %v321_v10, 0.0  ;;  %334 = vst [vmem:[%s551_s3] sm:$0xff] %v322_v11  ;;  %335 = vst [vmem:[%s551_s3 + $0x8] sm:$0xff] %v323_v12 }
 0x161   :  { %336 = vst [vmem:[%s551_s3 + $0x10] sm:$0xff] %v324_v13  ;;  %337 = vst [vmem:[%s551_s3 + $0x18] sm:$0xff] %v325_v14 }
 0x162   :  { %338 = vst [vmem:[%s551_s3 + $0x20] sm:$0xff] %v326_v15  ;;  %339 = vst [vmem:[%s551_s3 + $0x28] sm:$0xff] %v327_v16 }
 0x163   :  { %340 = vst [vmem:[%s551_s3 + $0x30] sm:$0xff] %v328_v17  ;;  %341 = vst [vmem:[%s551_s3 + $0x38] sm:$0xff] %v329_v18 }
 0x164   :  { %342 = vst [vmem:[%s551_s3 + $0x40] sm:$0xff] %v330_v19  ;;  %343 = vst [vmem:[%s551_s3 + $0x48] sm:$0xff] %v331_v20 }
 0x165   :  { %344 = vst [vmem:[%s551_s3 + $0x50] sm:$0xff] %v332_v21  ;;  %345 = vst [vmem:[%s551_s3 + $0x58] sm:$0xff] %v333_v22 }

// kernel: _lambda_.14
= control target key start
LH: loop header
LB: loop body
LE: loop exit
PB: predicated region body
PF: predicated region fallthrough
CT: control target
= control target key end

     0   :  { %v754_v21 = vmov 1966171168   ;;  %v124_v23 = vlaneseq  ;;  %s928_s1 = inlined_call_operand.vmem [shape: bf16[768,128], index: 1, kind: input, shape index: {}]   ;;  %s929_s0 = inlined_call_operand.vmem [shape: bf16[2,768], index: 0, kind: input, shape index: {}]   ;;  %s930_s2 = inlined_call_operand.vmem [shape: f32[1,128], index: 2, kind: input, shape index: {}]   ;;  %s931_s3 = inlined_call_operand.vmem [shape: f32[2,128], index: 3, kind: output, shape index: {}]  }
   0x1   :  { %v703_v0 = vld [vmem:[%s928_s1 + $0x40] sm:$0xff]   ;;  %v707_v4 = vld [vmem:[%s928_s1 + $0x48] sm:$0xff]   ;;  %v711_v8 = vld [vmem:[%s928_s1 + $0x50] sm:$0xff]   ;;  %v122_v22 = vunpack.c.l.s4 %v754_v21 }
   0x2   :  { %v704_v1 = vld [vmem:[%s928_s1] sm:$0xff]   ;;  %636 = vmatprep.subr.bf16.mxu0 %v703_v0  ;;  %v708_v5 = vld [vmem:[%s928_s1 + $0x8] sm:$0xff]   ;;  %v712_v9 = vld [vmem:[%s928_s1 + $0x10] sm:$0xff]   ;;  %v125_v29 = vshrl.u32 %v124_v23, 7 }
   0x3   :  { %v705_v2 = vld [vmem:[%s928_s1 + $0xc0] sm:$0xff]   ;;  %637 = vmatpush3.bf16.msra.mxu0 %v704_v1  ;;  %v709_v6 = vld [vmem:[%s928_s1 + $0xc8] sm:$0xff]   ;;  %v713_v10 = vld [vmem:[%s928_s1 + $0xd0] sm:$0xff]   ;;  %v123_v28 = vunpack.c.0.s8 %v122_v22 }
   0x4   :  { %v706_v3 = vld [vmem:[%s928_s1 + $0x80] sm:$0xff]   ;;  %658 = vmatprep.subr.bf16.mxu1 %v705_v2  ;;  %638 = vmatprep.subr.bf16.mxu0 %v707_v4  ;;  %v710_v7 = vld [vmem:[%s928_s1 + $0x88] sm:$0xff]   ;;  %v714_v11 = vld [vmem:[%s928_s1 + $0x90] sm:$0xff]  }
   0x5   :  { %659 = vmatpush3.bf16.msra.mxu1 %v706_v3  ;;  %v715_v12 = vld [vmem:[%s928_s1 + $0x58] sm:$0xff]   ;;  %v719_v16 = vld [vmem:[%s928_s1 + $0x60] sm:$0xff]   ;;  %v723_v20 = vld [vmem:[%s928_s1 + $0x68] sm:$0xff]   ;;  %v126_v34 = vsub.s32 %v123_v28, %v125_v29 }
   0x6   :  { %660 = vmatprep.subr.bf16.mxu1 %v709_v6  ;;  %v716_v13 = vld [vmem:[%s928_s1 + $0x18] sm:$0xff]   ;;  %v720_v17 = vld [vmem:[%s928_s1 + $0x20] sm:$0xff]   ;;  %v724_v24 = vld [vmem:[%s928_s1 + $0x28] sm:$0xff]  }
   0x7   :  { %639 = vmatpush3.bf16.msra.mxu0 %v708_v5  ;;  %v717_v14 = vld [vmem:[%s928_s1 + $0xd8] sm:$0xff]   ;;  %v721_v18 = vld [vmem:[%s928_s1 + $0xe0] sm:$0xff]   ;;  %v725_v25 = vld [vmem:[%s928_s1 + $0xe8] sm:$0xff]  }
   0x8   :  { %640 = vmatprep.subr.bf16.mxu0 %v711_v8  ;;  %v718_v15 = vld [vmem:[%s928_s1 + $0x98] sm:$0xff]   ;;  %v722_v19 = vld [vmem:[%s928_s1 + $0xa0] sm:$0xff]   ;;  %v726_v26 = vld [vmem:[%s928_s1 + $0xa8] sm:$0xff]  }
   0x9   :  { %661 = vmatpush3.bf16.msra.mxu1 %v710_v7  ;;  %v727_v27 = vld [vmem:[%s928_s1 + $0x70] sm:$0xff]   ;;  %v731_v33 = vld [vmem:[%s928_s1 + $0x78] sm:$0xff]   ;;  %v15_v37 = vld [vmem:[%s929_s0] sm:$0x3f] }
   0xa   :  { %662 = vmatprep.subr.bf16.mxu1 %v713_v10  ;;  %v728_v30 = vld [vmem:[%s928_s1 + $0x30] sm:$0xff]   ;;  %v732_v35 = vld [vmem:[%s928_s1 + $0x38] sm:$0xff]   ;;  %v120_v38 = vcombine.high %v15_v37, %v15_v37  ;;  %v127_v39 = vrot.slane %v15_v37, %v126_v34  ;;  %v736_v41 = vld [vmem:[%s928_s1 + $0x140] sm:$0xff]  }
   0xb   :  { %641 = vmatpush3.bf16.msra.mxu0 %v712_v9  ;;  %v729_v31 = vld [vmem:[%s928_s1 + $0xf0] sm:$0xff]   ;;  %v733_v36 = vld [vmem:[%s928_s1 + $0xf8] sm:$0xff]   ;;  %v737_v46 = vld [vmem:[%s928_s1 + $0x100] sm:$0xff]  }
   0xc   :  { %642 = vmatprep.subr.bf16.mxu0 %v715_v12  ;;  %v730_v32 = vld [vmem:[%s928_s1 + $0xb0] sm:$0xff]   ;;  %v735_v40 = vld [vmem:[%s928_s1 + $0xb8] sm:$0xff]   ;;  %v135_v42 = vcombine.high %v127_v39, %v127_v39  ;;  %v143_v43 = vrot.slane %v127_v39, %v126_v34  ;;  %v134_v44 = vrot.slane %v120_v38, %v126_v34  ;;  %v738_v49 = vld [vmem:[%s928_s1 + $0x148] sm:$0xff]  }
   0xd   :  { %663 = vmatpush3.bf16.msra.mxu1 %v714_v11  ;;  %v739_v52 = vld [vmem:[%s928_s1 + $0x108] sm:$0xff]   ;;  %v740_v53 = vld [vmem:[%s928_s1 + $0x150] sm:$0xff]   ;;  %v742_v55 = vld [vmem:[%s928_s1 + $0x158] sm:$0xff]  }
   0xe   :  { %664 = vmatprep.subr.bf16.mxu1 %v717_v14  ;;  %v157_v45 = vrot.slane %v135_v42, %v126_v34  ;;  %v136_v47 = vcombine.high %v134_v44, %v134_v44  ;;  %v165_v48 = vcombine.high %v143_v43, %v143_v43  ;;  %v741_v54 = vld [vmem:[%s928_s1 + $0x110] sm:$0xff]   ;;  %v743_v56 = vld [vmem:[%s928_s1 + $0x118] sm:$0xff]   ;;  %v744_v57 = vld [vmem:[%s928_s1 + $0x160] sm:$0xff]   ;;  %v150_v1 = vrot.slane %v134_v44, %v126_v34 }
   0xf   :  { %643 = vmatpush3.bf16.msra.mxu0 %v716_v13  ;;  %v745_v58 = vld [vmem:[%s928_s1 + $0x120] sm:$0xff]   ;;  %v746_v59 = vld [vmem:[%s928_s1 + $0x168] sm:$0xff]   ;;  %v748_v61 = vld [vmem:[%s928_s1 + $0x170] sm:$0xff]  }
  0x10   :  { %644 = vmatprep.subr.bf16.mxu0 %v719_v16  ;;  %493 = vmatprep.mubr.bf16.mxu0 %v157_v45  ;;  %v166_v50 = vcombine.high %v157_v45, %v157_v45  ;;  %v164_v51 = vrot.slane %v136_v47, %v126_v34  ;;  %v747_v60 = vld [vmem:[%s928_s1 + $0x128] sm:$0xff]   ;;  %v749_v62 = vld [vmem:[%s928_s1 + $0x130] sm:$0xff]   ;;  %v750_v63 = vld [vmem:[%s928_s1 + $0x178] sm:$0xff]  }
  0x11   :  { %665 = vmatpush3.bf16.msra.mxu1 %v718_v15  ;;  %v751_v0 = vld [vmem:[%s928_s1 + $0x138] sm:$0xff]   ;;  %v587_v3 = vld [vmem:[%s930_s2] ss:$0 sm:$0xff] }
  0x12   :  { %666 = vmatprep.subr.bf16.mxu1 %v721_v18  ;;  %533 = vmatprep.mubr.bf16.mxu1 %v166_v50 }
  0x13   :  { %645 = vmatpush3.bf16.msra.mxu0 %v720_v17 }
  0x14   :  { %646 = vmatprep.subr.bf16.mxu0 %v723_v20 }
  0x15   :  { %667 = vmatpush3.bf16.msra.mxu1 %v722_v19 }
  0x16   :  { %668 = vmatprep.subr.bf16.mxu1 %v725_v25 }
  0x17   :  { %647 = vmatpush3.bf16.msra.mxu0 %v724_v24 }
  0x18   :  { %648 = vmatprep.subr.bf16.mxu0 %v727_v27 }
  0x19   :  { %669 = vmatpush3.bf16.msra.mxu1 %v726_v26 }
  0x1a   :  { %670 = vmatprep.subr.bf16.mxu1 %v729_v31 }
  0x1b   :  { %649 = vmatpush3.bf16.msra.mxu0 %v728_v30 }
  0x1c   :  { %650 = vmatprep.subr.bf16.mxu0 %v731_v33 }
  0x1d   :  { %671 = vmatpush3.bf16.msra.mxu1 %v730_v32 }
  0x1e   :  { %672 = vmatprep.subr.bf16.mxu1 %v733_v36 }
  0x1f   :  { %651 = vmatpush3.bf16.msra.mxu0 %v732_v35 }
  0x20   :  { %680 = vmatprep.subr.bf16.mxu0 %v736_v41 }
  0x21   :  { %673 = vmatpush3.bf16.msra.mxu1 %v735_v40 }
  0x22   :  { %494 = vmatmul.mubr.bf16.vlgmr.msra.gmra.mrb[0].mxu0 %v143_v43 }
  0x23   :  { %681 = vmatpush3.bf16.msra.mxu0 %v737_v46  ;;  %573 = vmatprep.mubr.bf16.mxu0 %v164_v51 }
  0x24   :  { %534 = vmatmul.mubr.bf16.vlgmr.msra.gmra.mrb[0].mxu1 %v165_v48  ;;  %682 = vmatprep.subr.bf16.mxu0 %v738_v49 }
  0x27   :  { %683 = vmatpush3.bf16.msra.mxu0 %v739_v52 }
  0x28   :  { %684 = vmatprep.subr.bf16.mxu0 %v740_v53 }
  0x2b   :  { %685 = vmatpush3.bf16.msra.mxu0 %v741_v54 }
  0x2c   :  { %686 = vmatprep.subr.bf16.mxu0 %v742_v55 }
  0x2f   :  { %687 = vmatpush3.bf16.msra.mxu0 %v743_v56 }
  0x30   :  { %688 = vmatprep.subr.bf16.mxu0 %v744_v57 }
  0x33   :  { %689 = vmatpush3.bf16.msra.mxu0 %v745_v58 }
  0x34   :  { %690 = vmatprep.subr.bf16.mxu0 %v746_v59 }
  0x37   :  { %691 = vmatpush3.bf16.msra.mxu0 %v747_v60 }
  0x38   :  { %692 = vmatprep.subr.bf16.mxu0 %v748_v61 }
  0x3b   :  { %693 = vmatpush3.bf16.msra.mxu0 %v749_v62 }
  0x3c   :  { %694 = vmatprep.subr.bf16.mxu0 %v750_v63 }
  0x3f   :  { %695 = vmatpush3.bf16.msra.mxu0 %v751_v0 }
  0x42   :  { %574 = vmatmul.mubr.bf16.vlgmr.msra.gmra.mrb[4].mxu0 %v150_v1 }
  0xf5   :  { %v652_v2 = vpop.f32.mrb[0].mxu0 }
  0xf6   :  { %v653_v4 = vpop.f32.mrb[1].mxu0 }
  0xf7   :  { %v654_v5 = vadd.f32 %v653_v4, %v652_v2  ;;  %v655_v6 = vpop.f32.mrb[2].mxu0  ;;  %v674_v7 = vpop.f32.mrb[0].mxu1 }
  0xf8   :  { %v656_v8 = vpop.f32.mrb[3].mxu0  ;;  %v675_v9 = vpop.f32.mrb[1].mxu1 }
  0xf9   :  { %v496_v10 = vadd.f32 %v654_v5, %v587_v3  ;;  %v676_v11 = vadd.f32 %v675_v9, %v674_v7  ;;  %v677_v12 = vpop.f32.mrb[2].mxu1 }
  0xfa   :  { %v678_v13 = vpop.f32.mrb[3].mxu1 }
  0xfb   :  { %v536_v14 = vadd.f32 %v676_v11, %v496_v10 }
 0x115   :  { %v696_v15 = vpop.f32.mrb[4].mxu0 }
 0x116   :  { %v697_v16 = vpop.f32.mrb[5].mxu0 }
 0x117   :  { %v698_v17 = vadd.f32 %v697_v16, %v696_v15  ;;  %v699_v18 = vpop.f32.mrb[6].mxu0 }
 0x118   :  { %v700_v19 = vpop.f32.mrb[7].mxu0 }
 0x119   :  { %v576_v20 = vadd.f32 %v698_v17, %v536_v14 }
 0x11b   :  { %752 = vtanh.f32 %v576_v20 }
 0x125   :  { %v753_v21 = vpop.eup %752 }
 0x126   :  { %582 = vst [vmem:[%s931_s3] sm:$0x3] %v753_v21 }

// kernel: _lambda_.15
= control target key start
LH: loop header
LB: loop body
LE: loop exit
PB: predicated region body
PF: predicated region fallthrough
CT: control target
= control target key end

     0   :  { %v234_v0 = vmov 0.0   ;;  %vm235_vm0 = vmmov 0   ;;  %s298_s1 = inlined_call_operand.vmem [shape: bf16[128,128], index: 1, kind: input, shape index: {}]   ;;  %s299_s0 = inlined_call_operand.vmem [shape: bf16[16,128], index: 0, kind: input, shape index: {}]   ;;  %s300_s2 = inlined_call_operand.vmem [shape: f32[3,128], index: 2, kind: input, shape index: {}]   ;;  %s301_s3 = inlined_call_operand.vmem [shape: f32[16,128], index: 3, kind: output, shape index: {}]  }
   0x1   :  { %201 = vmatprep.subr.bf16.mxu0 %v234_v0  ;;  %v223_v1 = vld [vmem:[%s298_s1] sm:$0xff]   ;;  %217 = vmatprep.mubr.msk.bf16.mxu0 %vm235_vm0, %v234_v0  ;;  %v224_v2 = vld [vmem:[%s298_s1 + $0x8] sm:$0xff]   ;;  %v225_v3 = vld [vmem:[%s298_s1 + $0x10] sm:$0xff]  }
   0x2   :  { %202 = vmatpush3.bf16.msra.mxu0 %v223_v1  ;;  %v226_v4 = vld [vmem:[%s298_s1 + $0x18] sm:$0xff]   ;;  %v227_v5 = vld [vmem:[%s298_s1 + $0x20] sm:$0xff]   ;;  %v228_v6 = vld [vmem:[%s298_s1 + $0x28] sm:$0xff]  }
   0x3   :  { %203 = vmatprep.subr.bf16.mxu0 %v234_v0  ;;  %v229_v7 = vld [vmem:[%s298_s1 + $0x30] sm:$0xff]   ;;  %v230_v8 = vld [vmem:[%s298_s1 + $0x38] sm:$0xff]   ;;  %v231_v9 = vld [vmem:[%s299_s0] sm:$0xff]  }
   0x4   :  { %v180_v10 = vld [vmem:[%s300_s2] ss:$0 sm:$0xff]  ;;  %v190_v39 = vld [vmem:[%s300_s2 + $0x1] ss:$0 sm:$0xff]  ;;  %v191_v42 = vld [vmem:[%s300_s2 + $0x2] ss:$0 sm:$0xff] }
   0x6   :  { %204 = vmatpush3.bf16.msra.mxu0 %v224_v2 }
   0x7   :  { %205 = vmatprep.subr.bf16.mxu0 %v234_v0 }
   0xa   :  { %206 = vmatpush3.bf16.msra.mxu0 %v225_v3 }
   0xb   :  { %207 = vmatprep.subr.bf16.mxu0 %v234_v0 }
   0xe   :  { %208 = vmatpush3.bf16.msra.mxu0 %v226_v4 }
   0xf   :  { %209 = vmatprep.subr.bf16.mxu0 %v234_v0 }
  0x12   :  { %210 = vmatpush3.bf16.msra.mxu0 %v227_v5 }
  0x13   :  { %211 = vmatprep.subr.bf16.mxu0 %v234_v0 }
  0x16   :  { %212 = vmatpush3.bf16.msra.mxu0 %v228_v6 }
  0x17   :  { %213 = vmatprep.subr.bf16.mxu0 %v234_v0 }
  0x1a   :  { %214 = vmatpush3.bf16.msra.mxu0 %v229_v7 }
  0x1b   :  { %215 = vmatprep.subr.bf16.mxu0 %v234_v0 }
  0x1e   :  { %216 = vmatpush3.bf16.msra.mxu0 %v230_v8 }
  0x21   :  { %218 = vmatmul.mubr.bf16.vlgmr.msra.gmra.mrb[0].mxu0 %v231_v9 }
  0xf4   :  { %v126_v11 = vpop.f32.mrb[0].mxu0 }
  0xf5   :  { %v219_v12 = vpop.f32.mrb[1].mxu0  ;;  %v127_v14 = vadd.f32 %v180_v10, %v126_v11 }
  0xf6   :  { %v129_v13 = vpop.f32.mrb[2].mxu0 }
  0xf7   :  { %v130_v15 = vadd.f32 %v180_v10, %v129_v13  ;;  %v220_v16 = vpop.f32.mrb[3].mxu0 }
  0xf9   :  { %v133_v17 = vadd.f32 %v130_v15, %v127_v14 }
  0xfb   :  { %v134_v18 = vrot.slane %v133_v17, 4 }
  0xfd   :  { %v135_v19 = vadd.f32 %v134_v18, %v133_v17 }
  0xff   :  { %v136_v20 = vrot.slane %v135_v19, 2 }
 0x101   :  { %v137_v21 = vadd.f32 %v136_v20, %v135_v19 }
 0x103   :  { %v138_v22 = vrot.slane %v137_v21, 1 }
 0x105   :  { %v139_v23 = vadd.f32 %v138_v22, %v137_v21 }
 0x107   :  { %v141_v24 = vmul.f32 0.0625, %v139_v23 }
 0x109   :  { %v142_v25 = vsub.f32 %v127_v14, %v141_v24  ;;  %v143_v26 = vsub.f32 %v130_v15, %v141_v24 }
 0x10b   :  { %v144_v27 = vmul.f32 %v142_v25, %v142_v25  ;;  %v145_v28 = vmul.f32 %v143_v26, %v143_v26 }
 0x10d   :  { %v146_v29 = vadd.f32 %v145_v28, %v144_v27 }
 0x10f   :  { %v147_v30 = vrot.slane %v146_v29, 4 }
 0x111   :  { %v148_v31 = vadd.f32 %v147_v30, %v146_v29 }
 0x113   :  { %v149_v32 = vrot.slane %v148_v31, 2 }
 0x115   :  { %v150_v33 = vadd.f32 %v149_v32, %v148_v31 }
 0x117   :  { %v151_v34 = vrot.slane %v150_v33, 1 }
 0x119   :  { %v152_v35 = vadd.f32 %v151_v34, %v150_v33 }
 0x11b   :  { %v153_v36 = vmul.f32 0.0625, %v152_v35 }
 0x11d   :  { %v154_v37 = vadd.f32 1e-05, %v153_v36 }
 0x11f   :  { %232 = vrsqrt.f32 %v154_v37 }
 0x129   :  { %v233_v38 = vpop.eup %232 }
 0x12a   :  { %v156_v40 = vmul.f32 %v233_v38, %v142_v25  ;;  %v157_v41 = vmul.f32 %v233_v38, %v143_v26 }
 0x12c   :  { %v163_v43 = vmul.f32 %v190_v39, %v156_v40  ;;  %v164_v44 = vmul.f32 %v190_v39, %v157_v41 }
 0x12e   :  { %v170_v45 = vadd.f32 %v191_v42, %v163_v43  ;;  %v171_v46 = vadd.f32 %v191_v42, %v164_v44 }
 0x130   :  { %v172_v47 = vmax.f32 %v170_v45, 0.0  ;;  %v173_v48 = vmax.f32 %v171_v46, 0.0 }
 0x132   :  { %174 = vst [vmem:[%s301_s3] sm:$0xff] %v172_v47  ;;  %175 = vst [vmem:[%s301_s3 + $0x8] sm:$0xff] %v173_v48 }

// kernel: _lambda_.16
= control target key start
LH: loop header
LB: loop body
LE: loop exit
PB: predicated region body
PF: predicated region fallthrough
CT: control target
= control target key end

     0   :  { %v215_v0 = vmov 0.0   ;;  %vm216_vm0 = vmmov 0   ;;  %s276_s1 = inlined_call_operand.vmem [shape: bf16[128,128], index: 1, kind: input, shape index: {}]   ;;  %s277_s0 = inlined_call_operand.vmem [shape: bf16[8,128], index: 0, kind: input, shape index: {}]   ;;  %s278_s2 = inlined_call_operand.vmem [shape: f32[3,128], index: 2, kind: input, shape index: {}]   ;;  %s279_s3 = inlined_call_operand.vmem [shape: f32[8,128], index: 3, kind: output, shape index: {}]  }
   0x1   :  { %183 = vmatprep.subr.bf16.mxu0 %v215_v0  ;;  %v205_v1 = vld [vmem:[%s276_s1] sm:$0xff]   ;;  %199 = vmatprep.mubr.msk.bf16.mxu0 %vm216_vm0, %v215_v0  ;;  %v206_v2 = vld [vmem:[%s276_s1 + $0x8] sm:$0xff]   ;;  %v207_v3 = vld [vmem:[%s276_s1 + $0x10] sm:$0xff]  }
   0x2   :  { %184 = vmatpush3.bf16.msra.mxu0 %v205_v1  ;;  %v208_v4 = vld [vmem:[%s276_s1 + $0x18] sm:$0xff]   ;;  %v209_v5 = vld [vmem:[%s276_s1 + $0x20] sm:$0xff]   ;;  %v210_v6 = vld [vmem:[%s276_s1 + $0x28] sm:$0xff]  }
   0x3   :  { %185 = vmatprep.subr.bf16.mxu0 %v215_v0  ;;  %v211_v7 = vld [vmem:[%s276_s1 + $0x30] sm:$0xff]   ;;  %v212_v8 = vld [vmem:[%s276_s1 + $0x38] sm:$0xff]   ;;  %v15_v9 = vld [vmem:[%s277_s0] sm:$0xf] }
   0x4   :  { %v163_v10 = vld [vmem:[%s278_s2] ss:$0 sm:$0xff]  ;;  %v172_v34 = vld [vmem:[%s278_s2 + $0x1] ss:$0 sm:$0xff]  ;;  %v173_v36 = vld [vmem:[%s278_s2 + $0x2] ss:$0 sm:$0xff] }
   0x6   :  { %186 = vmatpush3.bf16.msra.mxu0 %v206_v2 }
   0x7   :  { %187 = vmatprep.subr.bf16.mxu0 %v215_v0 }
   0xa   :  { %188 = vmatpush3.bf16.msra.mxu0 %v207_v3 }
   0xb   :  { %189 = vmatprep.subr.bf16.mxu0 %v215_v0 }
   0xe   :  { %190 = vmatpush3.bf16.msra.mxu0 %v208_v4 }
   0xf   :  { %191 = vmatprep.subr.bf16.mxu0 %v215_v0 }
  0x12   :  { %192 = vmatpush3.bf16.msra.mxu0 %v209_v5 }
  0x13   :  { %193 = vmatprep.subr.bf16.mxu0 %v215_v0 }
  0x16   :  { %194 = vmatpush3.bf16.msra.mxu0 %v210_v6 }
  0x17   :  { %195 = vmatprep.subr.bf16.mxu0 %v215_v0 }
  0x1a   :  { %196 = vmatpush3.bf16.msra.mxu0 %v211_v7 }
  0x1b   :  { %197 = vmatprep.subr.bf16.mxu0 %v215_v0 }
  0x1e   :  { %198 = vmatpush3.bf16.msra.mxu0 %v212_v8 }
  0x21   :  { %200 = vmatmul.mubr.bf16.vlgmr.msra.gmra.mrb[0].mxu0 %v15_v9 }
  0xf4   :  { %v119_v11 = vpop.f32.mrb[0].mxu0 }
  0xf5   :  { %v120_v12 = vadd.f32 %v163_v10, %v119_v11  ;;  %v201_v13 = vpop.f32.mrb[1].mxu0 }
  0xf6   :  { %v122_v14 = vpop.f32.mrb[2].mxu0 }
  0xf7   :  { %v125_v15 = vrot.slane %v120_v12, 4  ;;  %v202_v16 = vpop.f32.mrb[3].mxu0 }
  0xf9   :  { %v126_v17 = vadd.f32 %v125_v15, %v120_v12 }
  0xfb   :  { %v127_v18 = vrot.slane %v126_v17, 2 }
  0xfd   :  { %v128_v19 = vadd.f32 %v127_v18, %v126_v17 }
  0xff   :  { %v129_v20 = vrot.slane %v128_v19, 1 }
 0x101   :  { %v130_v21 = vadd.f32 %v129_v20, %v128_v19 }
 0x103   :  { %v132_v22 = vmul.f32 0.125, %v130_v21 }
 0x105   :  { %v133_v23 = vsub.f32 %v120_v12, %v132_v22 }
 0x107   :  { %v134_v24 = vmul.f32 %v133_v23, %v133_v23 }
 0x109   :  { %v135_v25 = vrot.slane %v134_v24, 4 }
 0x10b   :  { %v136_v26 = vadd.f32 %v135_v25, %v134_v24 }
 0x10d   :  { %v137_v27 = vrot.slane %v136_v26, 2 }
 0x10f   :  { %v138_v28 = vadd.f32 %v137_v27, %v136_v26 }
 0x111   :  { %v139_v29 = vrot.slane %v138_v28, 1 }
 0x113   :  { %v140_v30 = vadd.f32 %v139_v29, %v138_v28 }
 0x115   :  { %v141_v31 = vmul.f32 0.125, %v140_v30 }
 0x117   :  { %v142_v32 = vadd.f32 1e-05, %v141_v31 }
 0x119   :  { %213 = vrsqrt.f32 %v142_v32 }
 0x123   :  { %v214_v33 = vpop.eup %213 }
 0x124   :  { %v144_v35 = vmul.f32 %v214_v33, %v133_v23 }
 0x126   :  { %v150_v37 = vmul.f32 %v172_v34, %v144_v35 }
 0x128   :  { %v156_v38 = vadd.f32 %v173_v36, %v150_v37 }
 0x12a   :  { %v157_v39 = vmax.f32 %v156_v38, 0.0 }
 0x12c   :  { %158 = vst [vmem:[%s279_s3] sm:$0xff] %v157_v39 }

// kernel: _lambda_.17
= control target key start
LH: loop header
LB: loop body
LE: loop exit
PB: predicated region body
PF: predicated region fallthrough
CT: control target
= control target key end

     0   :  { %v218_v0 = vmov 0.0   ;;  %vm219_vm0 = vmmov 0   ;;  %vm125_vm1 = vcmask 1043456   ;;  %s279_s1 = inlined_call_operand.vmem [shape: bf16[128,128], index: 1, kind: input, shape index: {}]   ;;  %s280_s0 = inlined_call_operand.vmem [shape: bf16[4,128], index: 0, kind: input, shape index: {}]   ;;  %s281_s2 = inlined_call_operand.vmem [shape: f32[3,128], index: 2, kind: input, shape index: {}]   ;;  %s282_s3 = inlined_call_operand.vmem [shape: f32[4,128], index: 3, kind: output, shape index: {}]  }
   0x1   :  { %186 = vmatprep.subr.bf16.mxu0 %v218_v0  ;;  %v208_v1 = vld [vmem:[%s279_s1] sm:$0xff]   ;;  %202 = vmatprep.mubr.msk.bf16.mxu0 %vm219_vm0, %v218_v0  ;;  %v209_v2 = vld [vmem:[%s279_s1 + $0x8] sm:$0xff]   ;;  %v210_v3 = vld [vmem:[%s279_s1 + $0x10] sm:$0xff]  }
   0x2   :  { %187 = vmatpush3.bf16.msra.mxu0 %v208_v1  ;;  %v211_v4 = vld [vmem:[%s279_s1 + $0x18] sm:$0xff]   ;;  %v212_v5 = vld [vmem:[%s279_s1 + $0x20] sm:$0xff]   ;;  %v213_v6 = vld [vmem:[%s279_s1 + $0x28] sm:$0xff]  }
   0x3   :  { %188 = vmatprep.subr.bf16.mxu0 %v218_v0  ;;  %v214_v7 = vld [vmem:[%s279_s1 + $0x30] sm:$0xff]   ;;  %v215_v8 = vld [vmem:[%s279_s1 + $0x38] sm:$0xff]   ;;  %v15_v9 = vld [vmem:[%s280_s0] sm:$0x3] }
   0x4   :  { %v166_v10 = vld [vmem:[%s281_s2] ss:$0 sm:$0xff]  ;;  %v175_v36 = vld [vmem:[%s281_s2 + $0x1] ss:$0 sm:$0xff]  ;;  %v176_v38 = vld [vmem:[%s281_s2 + $0x2] ss:$0 sm:$0xff] }
   0x6   :  { %189 = vmatpush3.bf16.msra.mxu0 %v209_v2 }
   0x7   :  { %190 = vmatprep.subr.bf16.mxu0 %v218_v0 }
   0xa   :  { %191 = vmatpush3.bf16.msra.mxu0 %v210_v3 }
   0xb   :  { %192 = vmatprep.subr.bf16.mxu0 %v218_v0 }
   0xe   :  { %193 = vmatpush3.bf16.msra.mxu0 %v211_v4 }
   0xf   :  { %194 = vmatprep.subr.bf16.mxu0 %v218_v0 }
  0x12   :  { %195 = vmatpush3.bf16.msra.mxu0 %v212_v5 }
  0x13   :  { %196 = vmatprep.subr.bf16.mxu0 %v218_v0 }
  0x16   :  { %197 = vmatpush3.bf16.msra.mxu0 %v213_v6 }
  0x17   :  { %198 = vmatprep.subr.bf16.mxu0 %v218_v0 }
  0x1a   :  { %199 = vmatpush3.bf16.msra.mxu0 %v214_v7 }
  0x1b   :  { %200 = vmatprep.subr.bf16.mxu0 %v218_v0 }
  0x1e   :  { %201 = vmatpush3.bf16.msra.mxu0 %v215_v8 }
  0x21   :  { %203 = vmatmul.mubr.bf16.vlgmr.msra.gmra.mrb[0].mxu0 %v15_v9 }
  0xf4   :  { %v119_v11 = vpop.f32.mrb[0].mxu0 }
  0xf5   :  { %v120_v12 = vadd.f32 %v166_v10, %v119_v11  ;;  %v204_v13 = vpop.f32.mrb[1].mxu0 }
  0xf6   :  { %v122_v14 = vpop.f32.mrb[2].mxu0 }
  0xf7   :  { %v126_v15 = vsel %vm125_vm1, %v120_v12, 0.0  ;;  %v205_v16 = vpop.f32.mrb[3].mxu0 }
  0xf8   :  { %v127_v17 = vrot.slane %v126_v15, 4 }
  0xfa   :  { %v128_v18 = vadd.f32 %v127_v17, %v126_v15 }
  0xfc   :  { %v129_v19 = vrot.slane %v128_v18, 2 }
  0xfe   :  { %v130_v20 = vadd.f32 %v129_v19, %v128_v18 }
 0x100   :  { %v131_v21 = vrot.slane %v130_v20, 1 }
 0x102   :  { %v132_v22 = vadd.f32 %v131_v21, %v130_v20 }
 0x104   :  { %v134_v23 = vmul.f32 0.25, %v132_v22 }
 0x106   :  { %v135_v24 = vsub.f32 %v120_v12, %v134_v23 }
 0x108   :  { %v136_v25 = vmul.f32 %v135_v24, %v135_v24 }
 0x10a   :  { %v137_v26 = vsel %vm125_vm1, %v136_v25, 0.0 }
 0x10b   :  { %v138_v27 = vrot.slane %v137_v26, 4 }
 0x10d   :  { %v139_v28 = vadd.f32 %v138_v27, %v137_v26 }
 0x10f   :  { %v140_v29 = vrot.slane %v139_v28, 2 }
 0x111   :  { %v141_v30 = vadd.f32 %v140_v29, %v139_v28 }
 0x113   :  { %v142_v31 = vrot.slane %v141_v30, 1 }
 0x115   :  { %v143_v32 = vadd.f32 %v142_v31, %v141_v30 }
 0x117   :  { %v144_v33 = vmul.f32 0.25, %v143_v32 }
 0x119   :  { %v145_v34 = vadd.f32 1e-05, %v144_v33 }
 0x11b   :  { %216 = vrsqrt.f32 %v145_v34 }
 0x125   :  { %v217_v35 = vpop.eup %216 }
 0x126   :  { %v147_v37 = vmul.f32 %v217_v35, %v135_v24 }
 0x128   :  { %v153_v39 = vmul.f32 %v175_v36, %v147_v37 }
 0x12a   :  { %v159_v40 = vadd.f32 %v176_v38, %v153_v39 }
 0x12c   :  { %v160_v41 = vmax.f32 %v159_v40, 0.0 }
 0x12e   :  { %161 = vst [vmem:[%s282_s3] sm:$0xf] %v160_v41 }

// kernel: _lambda_.18
= control target key start
LH: loop header
LB: loop body
LE: loop exit
PB: predicated region body
PF: predicated region fallthrough
CT: control target
= control target key end

     0   :  { %v218_v0 = vmov 0.0   ;;  %vm219_vm0 = vmmov 0   ;;  %vm125_vm1 = vcmask 1041408   ;;  %s279_s1 = inlined_call_operand.vmem [shape: bf16[128,128], index: 1, kind: input, shape index: {}]   ;;  %s280_s0 = inlined_call_operand.vmem [shape: bf16[2,128], index: 0, kind: input, shape index: {}]   ;;  %s281_s2 = inlined_call_operand.vmem [shape: f32[3,128], index: 2, kind: input, shape index: {}]   ;;  %s282_s3 = inlined_call_operand.vmem [shape: f32[2,128], index: 3, kind: output, shape index: {}]  }
   0x1   :  { %186 = vmatprep.subr.bf16.mxu0 %v218_v0  ;;  %v208_v1 = vld [vmem:[%s279_s1] sm:$0xff]   ;;  %202 = vmatprep.mubr.msk.bf16.mxu0 %vm219_vm0, %v218_v0  ;;  %v209_v2 = vld [vmem:[%s279_s1 + $0x8] sm:$0xff]   ;;  %v210_v3 = vld [vmem:[%s279_s1 + $0x10] sm:$0xff]  }
   0x2   :  { %187 = vmatpush3.bf16.msra.mxu0 %v208_v1  ;;  %v211_v4 = vld [vmem:[%s279_s1 + $0x18] sm:$0xff]   ;;  %v212_v5 = vld [vmem:[%s279_s1 + $0x20] sm:$0xff]   ;;  %v213_v6 = vld [vmem:[%s279_s1 + $0x28] sm:$0xff]  }
   0x3   :  { %188 = vmatprep.subr.bf16.mxu0 %v218_v0  ;;  %v214_v7 = vld [vmem:[%s279_s1 + $0x30] sm:$0xff]   ;;  %v215_v8 = vld [vmem:[%s279_s1 + $0x38] sm:$0xff]   ;;  %v15_v9 = vld [vmem:[%s280_s0] sm:$0x1] }
   0x4   :  { %v166_v10 = vld [vmem:[%s281_s2] ss:$0 sm:$0xff]  ;;  %v175_v36 = vld [vmem:[%s281_s2 + $0x1] ss:$0 sm:$0xff]  ;;  %v176_v38 = vld [vmem:[%s281_s2 + $0x2] ss:$0 sm:$0xff] }
   0x6   :  { %189 = vmatpush3.bf16.msra.mxu0 %v209_v2 }
   0x7   :  { %190 = vmatprep.subr.bf16.mxu0 %v218_v0 }
   0xa   :  { %191 = vmatpush3.bf16.msra.mxu0 %v210_v3 }
   0xb   :  { %192 = vmatprep.subr.bf16.mxu0 %v218_v0 }
   0xe   :  { %193 = vmatpush3.bf16.msra.mxu0 %v211_v4 }
   0xf   :  { %194 = vmatprep.subr.bf16.mxu0 %v218_v0 }
  0x12   :  { %195 = vmatpush3.bf16.msra.mxu0 %v212_v5 }
  0x13   :  { %196 = vmatprep.subr.bf16.mxu0 %v218_v0 }
  0x16   :  { %197 = vmatpush3.bf16.msra.mxu0 %v213_v6 }
  0x17   :  { %198 = vmatprep.subr.bf16.mxu0 %v218_v0 }
  0x1a   :  { %199 = vmatpush3.bf16.msra.mxu0 %v214_v7 }
  0x1b   :  { %200 = vmatprep.subr.bf16.mxu0 %v218_v0 }
  0x1e   :  { %201 = vmatpush3.bf16.msra.mxu0 %v215_v8 }
  0x21   :  { %203 = vmatmul.mubr.bf16.vlgmr.msra.gmra.mrb[0].mxu0 %v15_v9 }
  0xf4   :  { %v119_v11 = vpop.f32.mrb[0].mxu0 }
  0xf5   :  { %v120_v12 = vadd.f32 %v166_v10, %v119_v11  ;;  %v204_v13 = vpop.f32.mrb[1].mxu0 }
  0xf6   :  { %v122_v14 = vpop.f32.mrb[2].mxu0 }
  0xf7   :  { %v126_v15 = vsel %vm125_vm1, %v120_v12, 0.0  ;;  %v205_v16 = vpop.f32.mrb[3].mxu0 }
  0xf8   :  { %v127_v17 = vrot.slane %v126_v15, 4 }
  0xfa   :  { %v128_v18 = vadd.f32 %v127_v17, %v126_v15 }
  0xfc   :  { %v129_v19 = vrot.slane %v128_v18, 2 }
  0xfe   :  { %v130_v20 = vadd.f32 %v129_v19, %v128_v18 }
 0x100   :  { %v131_v21 = vrot.slane %v130_v20, 1 }
 0x102   :  { %v132_v22 = vadd.f32 %v131_v21, %v130_v20 }
 0x104   :  { %v134_v23 = vmul.f32 0.5, %v132_v22 }
 0x106   :  { %v135_v24 = vsub.f32 %v120_v12, %v134_v23 }
 0x108   :  { %v136_v25 = vmul.f32 %v135_v24, %v135_v24 }
 0x10a   :  { %v137_v26 = vsel %vm125_vm1, %v136_v25, 0.0 }
 0x10b   :  { %v138_v27 = vrot.slane %v137_v26, 4 }
 0x10d   :  { %v139_v28 = vadd.f32 %v138_v27, %v137_v26 }
 0x10f   :  { %v140_v29 = vrot.slane %v139_v28, 2 }
 0x111   :  { %v141_v30 = vadd.f32 %v140_v29, %v139_v28 }
 0x113   :  { %v142_v31 = vrot.slane %v141_v30, 1 }
 0x115   :  { %v143_v32 = vadd.f32 %v142_v31, %v141_v30 }
 0x117   :  { %v144_v33 = vmul.f32 0.5, %v143_v32 }
 0x119   :  { %v145_v34 = vadd.f32 1e-05, %v144_v33 }
 0x11b   :  { %216 = vrsqrt.f32 %v145_v34 }
 0x125   :  { %v217_v35 = vpop.eup %216 }
 0x126   :  { %v147_v37 = vmul.f32 %v217_v35, %v135_v24 }
 0x128   :  { %v153_v39 = vmul.f32 %v175_v36, %v147_v37 }
 0x12a   :  { %v159_v40 = vadd.f32 %v176_v38, %v153_v39 }
 0x12c   :  { %v160_v41 = vmax.f32 %v159_v40, 0.0 }
 0x12e   :  { %161 = vst [vmem:[%s282_s3] sm:$0x3] %v160_v41 }

// kernel: _lambda_.19
= control target key start
LH: loop header
LB: loop body
LE: loop exit
PB: predicated region body
PF: predicated region fallthrough
CT: control target
= control target key end

     0   :  { %v220_v0 = vmov 0.0   ;;  %vm221_vm0 = vmmov 0   ;;  %vm125_vm1 = vcmask 1041408   ;;  %s281_s1 = inlined_call_operand.vmem [shape: bf16[128,128], index: 1, kind: input, shape index: {}]   ;;  %s282_s0 = inlined_call_operand.vmem [shape: bf16[2,128], index: 0, kind: input, shape index: {}]   ;;  %s283_s2 = inlined_call_operand.vmem [shape: f32[3,128], index: 2, kind: input, shape index: {}]   ;;  %s284_s3 = inlined_call_operand.vmem [shape: f32[2,128], index: 3, kind: output, shape index: {}]  }
   0x1   :  { %186 = vmatprep.subr.bf16.mxu0 %v220_v0  ;;  %v208_v1 = vld [vmem:[%s281_s1] sm:$0xff]   ;;  %202 = vmatprep.mubr.msk.bf16.mxu0 %vm221_vm0, %v220_v0  ;;  %v209_v2 = vld [vmem:[%s281_s1 + $0x8] sm:$0xff]   ;;  %v210_v3 = vld [vmem:[%s281_s1 + $0x10] sm:$0xff]  }
   0x2   :  { %187 = vmatpush3.bf16.msra.mxu0 %v208_v1  ;;  %v211_v4 = vld [vmem:[%s281_s1 + $0x18] sm:$0xff]   ;;  %v212_v5 = vld [vmem:[%s281_s1 + $0x20] sm:$0xff]   ;;  %v213_v6 = vld [vmem:[%s281_s1 + $0x28] sm:$0xff]  }
   0x3   :  { %188 = vmatprep.subr.bf16.mxu0 %v220_v0  ;;  %v214_v7 = vld [vmem:[%s281_s1 + $0x30] sm:$0xff]   ;;  %v215_v8 = vld [vmem:[%s281_s1 + $0x38] sm:$0xff]   ;;  %v15_v9 = vld [vmem:[%s282_s0] sm:$0x1] }
   0x4   :  { %v166_v10 = vld [vmem:[%s283_s2] ss:$0 sm:$0xff]  ;;  %v175_v36 = vld [vmem:[%s283_s2 + $0x1] ss:$0 sm:$0xff]  ;;  %v176_v38 = vld [vmem:[%s283_s2 + $0x2] ss:$0 sm:$0xff] }
   0x6   :  { %189 = vmatpush3.bf16.msra.mxu0 %v209_v2 }
   0x7   :  { %190 = vmatprep.subr.bf16.mxu0 %v220_v0 }
   0xa   :  { %191 = vmatpush3.bf16.msra.mxu0 %v210_v3 }
   0xb   :  { %192 = vmatprep.subr.bf16.mxu0 %v220_v0 }
   0xe   :  { %193 = vmatpush3.bf16.msra.mxu0 %v211_v4 }
   0xf   :  { %194 = vmatprep.subr.bf16.mxu0 %v220_v0 }
  0x12   :  { %195 = vmatpush3.bf16.msra.mxu0 %v212_v5 }
  0x13   :  { %196 = vmatprep.subr.bf16.mxu0 %v220_v0 }
  0x16   :  { %197 = vmatpush3.bf16.msra.mxu0 %v213_v6 }
  0x17   :  { %198 = vmatprep.subr.bf16.mxu0 %v220_v0 }
  0x1a   :  { %199 = vmatpush3.bf16.msra.mxu0 %v214_v7 }
  0x1b   :  { %200 = vmatprep.subr.bf16.mxu0 %v220_v0 }
  0x1e   :  { %201 = vmatpush3.bf16.msra.mxu0 %v215_v8 }
  0x21   :  { %203 = vmatmul.mubr.bf16.vlgmr.msra.gmra.mrb[0].mxu0 %v15_v9 }
  0xf4   :  { %v119_v11 = vpop.f32.mrb[0].mxu0 }
  0xf5   :  { %v120_v12 = vadd.f32 %v166_v10, %v119_v11  ;;  %v204_v13 = vpop.f32.mrb[1].mxu0 }
  0xf6   :  { %v122_v14 = vpop.f32.mrb[2].mxu0 }
  0xf7   :  { %v126_v15 = vsel %vm125_vm1, %v120_v12, 0.0  ;;  %v205_v16 = vpop.f32.mrb[3].mxu0 }
  0xf8   :  { %v127_v17 = vrot.slane %v126_v15, 4 }
  0xfa   :  { %v128_v18 = vadd.f32 %v127_v17, %v126_v15 }
  0xfc   :  { %v129_v19 = vrot.slane %v128_v18, 2 }
  0xfe   :  { %v130_v20 = vadd.f32 %v129_v19, %v128_v18 }
 0x100   :  { %v131_v21 = vrot.slane %v130_v20, 1 }
 0x102   :  { %v132_v22 = vadd.f32 %v131_v21, %v130_v20 }
 0x104   :  { %v134_v23 = vmul.f32 0.5, %v132_v22 }
 0x106   :  { %v135_v24 = vsub.f32 %v120_v12, %v134_v23 }
 0x108   :  { %v136_v25 = vmul.f32 %v135_v24, %v135_v24 }
 0x10a   :  { %v137_v26 = vsel %vm125_vm1, %v136_v25, 0.0 }
 0x10b   :  { %v138_v27 = vrot.slane %v137_v26, 4 }
 0x10d   :  { %v139_v28 = vadd.f32 %v138_v27, %v137_v26 }
 0x10f   :  { %v140_v29 = vrot.slane %v139_v28, 2 }
 0x111   :  { %v141_v30 = vadd.f32 %v140_v29, %v139_v28 }
 0x113   :  { %v142_v31 = vrot.slane %v141_v30, 1 }
 0x115   :  { %v143_v32 = vadd.f32 %v142_v31, %v141_v30 }
 0x117   :  { %v144_v33 = vmul.f32 0.5, %v143_v32 }
 0x119   :  { %v145_v34 = vadd.f32 1e-05, %v144_v33 }
 0x11b   :  { %216 = vrsqrt.f32 %v145_v34 }
 0x125   :  { %v217_v35 = vpop.eup %216 }
 0x126   :  { %v147_v37 = vmul.f32 %v217_v35, %v135_v24 }
 0x128   :  { %v153_v39 = vmul.f32 %v175_v36, %v147_v37 }
 0x12a   :  { %v159_v40 = vadd.f32 %v176_v38, %v153_v39 }
 0x12c   :  { %218 = vtanh.f32 %v159_v40 }
 0x136   :  { %v219_v41 = vpop.eup %218 }
 0x137   :  { %161 = vst [vmem:[%s284_s3] sm:$0x3] %v219_v41 }

// kernel: _lambda_.20
= control target key start
LH: loop header
LB: loop body
LE: loop exit
PB: predicated region body
PF: predicated region fallthrough
CT: control target
= control target key end

     0   :  { %v388_v1 = vmov 0.0   ;;  %v389_v2 = vmov 0   ;;  %vm390_vm0 = vmmov 0   ;;  %v50_v27 = vlaneseq  ;;  %s493_s1 = inlined_call_operand.vmem [shape: bf16[128,384], index: 1, kind: input, shape index: {}]   ;;  %s494_s0 = inlined_call_operand.vmem [shape: bf16[2,128], index: 0, kind: input, shape index: {}]   ;;  %s495_s2 = inlined_call_operand.vmem [shape: f32[1,384], index: 2, kind: input, shape index: {}]   ;;  %s496_s3 = inlined_call_operand.vmem [shape: f32[2,384], index: 3, kind: output, shape index: {}]  }
   0x1   :  { %v356_v0 = vld [vmem:[%s493_s1 + $0x4] ss:$12 sps:$4 sm:$0xff]   ;;  %332 = vmatprep.subr.bf16.mxu1 %v388_v1  ;;  %225 = vmatprep.mubr.bf16.mxu0 %v389_v2  ;;  %v358_v3 = vld [vmem:[%s493_s1] ss:$12 sps:$4 sm:$0xff]   ;;  %v359_v4 = vld [vmem:[%s493_s1 + $0x8] ss:$12 sps:$4 sm:$0xff]  }
   0x2   :  { %348 = vmatprep.mubr.msk.bf16.mxu1 %vm390_vm0, %v388_v1  ;;  %193 = vmatprep.subr.bf16.mxu0 %v356_v0  ;;  %v360_v5 = vld [vmem:[%s493_s1 + $0x1c] ss:$12 sps:$4 sm:$0xff]   ;;  %v362_v6 = vld [vmem:[%s493_s1 + $0x18] ss:$12 sps:$4 sm:$0xff]   ;;  %v363_v7 = vld [vmem:[%s493_s1 + $0x20] ss:$12 sps:$4 sm:$0xff]  }
   0x3   :  { %194 = vmatpush1.bf16.msra.mxu0 %v358_v3  ;;  %333 = vmatpush3.bf16.msra.mxu1 %v359_v4  ;;  %v364_v8 = vld [vmem:[%s493_s1 + $0x34] ss:$12 sps:$4 sm:$0xff]   ;;  %v366_v9 = vld [vmem:[%s493_s1 + $0x30] ss:$12 sps:$4 sm:$0xff]   ;;  %v367_v10 = vld [vmem:[%s493_s1 + $0x38] ss:$12 sps:$4 sm:$0xff]  }
   0x4   :  { %195 = vmatprep.subr.bf16.mxu0 %v360_v5  ;;  %334 = vmatprep.subr.bf16.mxu1 %v388_v1  ;;  %v368_v11 = vld [vmem:[%s493_s1 + $0x4c] ss:$12 sps:$4 sm:$0xff]   ;;  %v370_v12 = vld [vmem:[%s493_s1 + $0x48] ss:$12 sps:$4 sm:$0xff]   ;;  %v371_v13 = vld [vmem:[%s493_s1 + $0x50] ss:$12 sps:$4 sm:$0xff]  }
   0x5   :  { %v372_v14 = vld [vmem:[%s493_s1 + $0x64] ss:$12 sps:$4 sm:$0xff]   ;;  %v374_v15 = vld [vmem:[%s493_s1 + $0x60] ss:$12 sps:$4 sm:$0xff]   ;;  %v375_v16 = vld [vmem:[%s493_s1 + $0x68] ss:$12 sps:$4 sm:$0xff]  }
   0x6   :  { %v376_v17 = vld [vmem:[%s493_s1 + $0x7c] ss:$12 sps:$4 sm:$0xff]   ;;  %v378_v18 = vld [vmem:[%s493_s1 + $0x78] ss:$12 sps:$4 sm:$0xff]   ;;  %v379_v19 = vld [vmem:[%s493_s1 + $0x80] ss:$12 sps:$4 sm:$0xff]  }
   0x7   :  { %196 = vmatpush1.bf16.msra.mxu0 %v362_v6  ;;  %335 = vmatpush3.bf16.msra.mxu1 %v363_v7  ;;  %v380_v20 = vld [vmem:[%s493_s1 + $0x94] ss:$12 sps:$4 sm:$0xff]   ;;  %v382_v21 = vld [vmem:[%s493_s1 + $0x90] ss:$12 sps:$4 sm:$0xff]   ;;  %v383_v22 = vld [vmem:[%s493_s1 + $0x98] ss:$12 sps:$4 sm:$0xff]  }
   0x8   :  { %197 = vmatprep.subr.bf16.mxu0 %v364_v8  ;;  %336 = vmatprep.subr.bf16.mxu1 %v388_v1  ;;  %v384_v23 = vld [vmem:[%s493_s1 + $0xac] ss:$12 sps:$4 sm:$0xff]   ;;  %v386_v24 = vld [vmem:[%s493_s1 + $0xa8] ss:$12 sps:$4 sm:$0xff]   ;;  %v387_v25 = vld [vmem:[%s493_s1 + $0xb0] ss:$12 sps:$4 sm:$0xff]  }
   0x9   :  { %v15_v26 = vld [vmem:[%s494_s0] sm:$0x1]  ;;  %v51_v28 = vshrl.u32 %v50_v27, 7  ;;  %v391_v29 = vmov 1983009808  }
   0xa   :  { %v279_v30 = vunpack.c.l.s4 %v391_v29  ;;  %v48_v32 = vld [vmem:[%s495_s2] sm:$0x7] }
   0xb   :  { %198 = vmatpush1.bf16.msra.mxu0 %v366_v9  ;;  %337 = vmatpush3.bf16.msra.mxu1 %v367_v10  ;;  %v52_v31 = vsub.s32 0, %v51_v28  ;;  %v60_v33 = vsub.s32 2, %v51_v28  ;;  %v56_v34 = vsub.s32 1, %v51_v28 }
   0xc   :  { %199 = vmatprep.subr.bf16.mxu0 %v368_v11  ;;  %338 = vmatprep.subr.bf16.mxu1 %v388_v1  ;;  %v280_v35 = vunpack.c.0.s8 %v279_v30 }
   0xd   :  { %v53_v36 = vrot.slane %v48_v32, %v52_v31  ;;  %v61_v37 = vrot.slane %v48_v32, %v60_v33  ;;  %v57_v38 = vrot.slane %v48_v32, %v56_v34 }
   0xe   :  { %v283_v40 = vsub.s32 %v280_v35, %v51_v28 }
   0xf   :  { %200 = vmatpush1.bf16.msra.mxu0 %v370_v12  ;;  %339 = vmatpush3.bf16.msra.mxu1 %v371_v13 }
  0x10   :  { %201 = vmatprep.subr.bf16.mxu0 %v372_v14  ;;  %340 = vmatprep.subr.bf16.mxu1 %v388_v1 }
  0x13   :  { %202 = vmatpush1.bf16.msra.mxu0 %v374_v15  ;;  %341 = vmatpush3.bf16.msra.mxu1 %v375_v16 }
  0x14   :  { %203 = vmatprep.subr.bf16.mxu0 %v376_v17  ;;  %342 = vmatprep.subr.bf16.mxu1 %v388_v1 }
  0x17   :  { %204 = vmatpush1.bf16.msra.mxu0 %v378_v18  ;;  %343 = vmatpush3.bf16.msra.mxu1 %v379_v19 }
  0x18   :  { %205 = vmatprep.subr.bf16.mxu0 %v380_v20  ;;  %344 = vmatprep.subr.bf16.mxu1 %v388_v1 }
  0x1b   :  { %206 = vmatpush1.bf16.msra.mxu0 %v382_v21  ;;  %345 = vmatpush3.bf16.msra.mxu1 %v383_v22 }
  0x1c   :  { %207 = vmatprep.subr.bf16.mxu0 %v384_v23  ;;  %346 = vmatprep.subr.bf16.mxu1 %v388_v1 }
  0x1f   :  { %208 = vmatpush1.bf16.msra.mxu0 %v386_v24  ;;  %347 = vmatpush3.bf16.msra.mxu1 %v387_v25 }
  0x22   :  { %226 = vmatmul.mubr.bf16.vlgmr.msra.gmra.mrb[0].mxu0 %v15_v26  ;;  %349 = vmatmul.mubr.bf16.vlgmr.msra.gmra.mrb[0].mxu1 %v15_v26 }
  0xf5   :  { %v227_v39 = vpop.f32.mrb[0].mxu0  ;;  %v268_v42 = vpop.f32.mrb[0].mxu1 }
  0xf6   :  { %v228_v41 = vadd.f32 %v227_v39, %v53_v36  ;;  %v229_v43 = vpop.f32.mrb[1].mxu0  ;;  %v269_v44 = vadd.f32 %v268_v42, %v61_v37  ;;  %v350_v46 = vpop.f32.mrb[1].mxu1 }
  0xf7   :  { %v230_v45 = vadd.f32 %v229_v43, %v57_v38  ;;  %v231_v47 = vpop.f32.mrb[2].mxu0  ;;  %v271_v48 = vpop.f32.mrb[2].mxu1 }
  0xf8   :  { %v232_v49 = vpop.f32.mrb[3].mxu0  ;;  %v291_v50 = vrot.slane %v269_v44, %v283_v40  ;;  %v351_v52 = vpop.f32.mrb[3].mxu1 }
  0xf9   :  { %v277_v51 = vcombine.low %v228_v41, %v230_v45 }
  0xfb   :  { %v284_v53 = vrot.slane %v277_v51, %v283_v40 }
  0xfd   :  { %v292_v54 = vcombine.low %v284_v53, %v291_v50 }
  0xff   :  { %294 = vst [vmem:[%s496_s3] sm:$0x3f] %v292_v54 }

// kernel: _lambda_.21
= control target key start
LH: loop header
LB: loop body
LE: loop exit
PB: predicated region body
PF: predicated region fallthrough
CT: control target
= control target key end

     0   :  { %v413_v1 = vmov 0.0   ;;  %v414_v2 = vmov 0   ;;  %vm415_vm0 = vmmov 0   ;;  %v57_v28 = vlaneseq  ;;  %s517_s1 = inlined_call_operand.vmem [shape: bf16[128,384], index: 1, kind: input, shape index: {}]   ;;  %s518_s2 = inlined_call_operand.vmem [shape: f32[1,384], index: 2, kind: input, shape index: {}]   ;;  %s519_s0 = inlined_call_operand.vmem [shape: f32[1,2,384], index: 0, kind: input, shape index: {}]   ;;  %s520_s3 = inlined_call_operand.vmem [shape: f32[1,2,128], index: 3, kind: output, shape index: {}]  }
   0x1   :  { %v371_v0 = vld [vmem:[%s517_s1 + $0x4] ss:$12 sps:$4 sm:$0xff]   ;;  %348 = vmatprep.subr.bf16.mxu1 %v413_v1  ;;  %19 = vst [vmem:[#allocation2] sm:$0x3] %v413_v1  ;;  %232 = vmatprep.mubr.bf16.mxu0 %v414_v2  ;;  %v373_v3 = vld [vmem:[%s517_s1] ss:$12 sps:$4 sm:$0xff]  }
   0x2   :  { %364 = vmatprep.mubr.msk.bf16.mxu1 %vm415_vm0, %v413_v1  ;;  %200 = vmatprep.subr.bf16.mxu0 %v371_v0  ;;  %v374_v4 = vld [vmem:[%s517_s1 + $0x1c] ss:$12 sps:$4 sm:$0xff]   ;;  %v376_v5 = vld [vmem:[%s517_s1 + $0x18] ss:$12 sps:$4 sm:$0xff]   ;;  %v377_v6 = vld [vmem:[%s517_s1 + $0x34] ss:$12 sps:$4 sm:$0xff]  }
   0x3   :  { %201 = vmatpush1.bf16.msra.mxu0 %v373_v3  ;;  %v379_v7 = vld [vmem:[%s517_s1 + $0x30] ss:$12 sps:$4 sm:$0xff]   ;;  %v380_v8 = vld [vmem:[%s517_s1 + $0x4c] ss:$12 sps:$4 sm:$0xff]   ;;  %v392_v9 = vld [vmem:[%s517_s1 + $0x8] ss:$12 sps:$4 sm:$0xff]  }
   0x4   :  { %202 = vmatprep.subr.bf16.mxu0 %v374_v4  ;;  %v382_v10 = vld [vmem:[%s517_s1 + $0x48] ss:$12 sps:$4 sm:$0xff]   ;;  %v383_v11 = vld [vmem:[%s517_s1 + $0x64] ss:$12 sps:$4 sm:$0xff]   ;;  %349 = vmatpush3.bf16.msra.mxu1 %v392_v9  ;;  %v396_v12 = vld [vmem:[%s517_s1 + $0x20] ss:$12 sps:$4 sm:$0xff]  }
   0x5   :  { %350 = vmatprep.subr.bf16.mxu1 %v413_v1  ;;  %v385_v13 = vld [vmem:[%s517_s1 + $0x60] ss:$12 sps:$4 sm:$0xff]   ;;  %v386_v14 = vld [vmem:[%s517_s1 + $0x7c] ss:$12 sps:$4 sm:$0xff]   ;;  %v397_v15 = vld [vmem:[%s517_s1 + $0x38] ss:$12 sps:$4 sm:$0xff]  }
   0x6   :  { %v388_v16 = vld [vmem:[%s517_s1 + $0x78] ss:$12 sps:$4 sm:$0xff]   ;;  %v389_v17 = vld [vmem:[%s517_s1 + $0x94] ss:$12 sps:$4 sm:$0xff]   ;;  %v398_v18 = vld [vmem:[%s517_s1 + $0x50] ss:$12 sps:$4 sm:$0xff]  }
   0x7   :  { %203 = vmatpush1.bf16.msra.mxu0 %v376_v5  ;;  %v391_v19 = vld [vmem:[%s517_s1 + $0x90] ss:$12 sps:$4 sm:$0xff]   ;;  %v393_v20 = vld [vmem:[%s517_s1 + $0xac] ss:$12 sps:$4 sm:$0xff]   ;;  %v399_v21 = vld [vmem:[%s517_s1 + $0x68] ss:$12 sps:$4 sm:$0xff]  }
   0x8   :  { %204 = vmatprep.subr.bf16.mxu0 %v377_v6  ;;  %351 = vmatpush3.bf16.msra.mxu1 %v396_v12  ;;  %v395_v22 = vld [vmem:[%s517_s1 + $0xa8] ss:$12 sps:$4 sm:$0xff]   ;;  %v20_v23 = vld [vmem:[#allocation2] sm:$0x3]  ;;  %v401_v26 = vld [vmem:[%s517_s1 + $0x98] ss:$12 sps:$4 sm:$0xff]  }
   0x9   :  { %352 = vmatprep.subr.bf16.mxu1 %v413_v1  ;;  %v400_v24 = vld [vmem:[%s517_s1 + $0x80] ss:$12 sps:$4 sm:$0xff]   ;;  %v22_v25 = vpack.c.bf16 %v20_v23, %v20_v23  ;;  %v402_v27 = vld [vmem:[%s517_s1 + $0xb0] ss:$12 sps:$4 sm:$0xff]   ;;  %v58_v29 = vshrl.u32 %v57_v28, 7 }
   0xa   :  { %v55_v31 = vld [vmem:[%s518_s2] sm:$0x7] }
   0xb   :  { %205 = vmatpush1.bf16.msra.mxu0 %v379_v7  ;;  %v59_v30 = vsub.s32 0, %v58_v29  ;;  %v63_v32 = vsub.s32 1, %v58_v29  ;;  %v21_v35 = vld [vmem:[%s519_s0] sm:$0x3f]  ;;  %v67_v53 = vsub.s32 2, %v58_v29 }
   0xc   :  { %206 = vmatprep.subr.bf16.mxu0 %v380_v8  ;;  %353 = vmatpush3.bf16.msra.mxu1 %v397_v15  ;;  %v289_v40 = vrot.slane %v21_v35, 2  ;;  %v299_v58 = vrot.slane %v21_v35, 4 }
   0xd   :  { %354 = vmatprep.subr.bf16.mxu1 %v413_v1  ;;  %v60_v33 = vrot.slane %v55_v31, %v59_v30  ;;  %v64_v34 = vrot.slane %v55_v31, %v63_v32  ;;  %v68_v54 = vrot.slane %v55_v31, %v67_v53 }
   0xf   :  { %207 = vmatpush1.bf16.msra.mxu0 %v382_v10 }
  0x10   :  { %208 = vmatprep.subr.bf16.mxu0 %v383_v11  ;;  %355 = vmatpush3.bf16.msra.mxu1 %v398_v18 }
  0x11   :  { %356 = vmatprep.subr.bf16.mxu1 %v413_v1 }
  0x13   :  { %209 = vmatpush1.bf16.msra.mxu0 %v385_v13 }
  0x14   :  { %210 = vmatprep.subr.bf16.mxu0 %v386_v14  ;;  %357 = vmatpush3.bf16.msra.mxu1 %v399_v21 }
  0x15   :  { %358 = vmatprep.subr.bf16.mxu1 %v413_v1 }
  0x17   :  { %211 = vmatpush1.bf16.msra.mxu0 %v388_v16 }
  0x18   :  { %212 = vmatprep.subr.bf16.mxu0 %v389_v17  ;;  %359 = vmatpush3.bf16.msra.mxu1 %v400_v24 }
  0x19   :  { %360 = vmatprep.subr.bf16.mxu1 %v413_v1 }
  0x1b   :  { %213 = vmatpush1.bf16.msra.mxu0 %v391_v19 }
  0x1c   :  { %214 = vmatprep.subr.bf16.mxu0 %v393_v20  ;;  %361 = vmatpush3.bf16.msra.mxu1 %v401_v26 }
  0x1d   :  { %362 = vmatprep.subr.bf16.mxu1 %v413_v1 }
  0x1f   :  { %215 = vmatpush1.bf16.msra.mxu0 %v395_v22 }
  0x20   :  { %363 = vmatpush3.bf16.msra.mxu1 %v402_v27 }
  0x22   :  { %233 = vmatmul.mubr.bf16.vlgmr.msra.gmra.mrb[0].mxu0 %v22_v25 }
  0x23   :  { %365 = vmatmul.mubr.bf16.vlgmr.msra.gmra.mrb[0].mxu1 %v22_v25 }
  0xf5   :  { %v234_v36 = vpop.f32.mrb[0].mxu0 }
  0xf6   :  { %v235_v37 = vadd.f32 %v234_v36, %v60_v33  ;;  %v236_v38 = vpop.f32.mrb[1].mxu0  ;;  %v275_v46 = vpop.f32.mrb[0].mxu1 }
  0xf7   :  { %v237_v39 = vadd.f32 %v236_v38, %v64_v34  ;;  %v238_v41 = vpop.f32.mrb[2].mxu0  ;;  %v366_v48 = vpop.f32.mrb[1].mxu1  ;;  %v276_v57 = vadd.f32 %v275_v46, %v68_v54 }
  0xf8   :  { %v281_v42 = vadd.f32 %v235_v37, %v21_v35  ;;  %v239_v43 = vpop.f32.mrb[3].mxu0  ;;  %v278_v49 = vpop.f32.mrb[2].mxu1 }
  0xf9   :  { %v291_v45 = vadd.f32 %v289_v40, %v237_v39  ;;  %v367_v50 = vpop.f32.mrb[3].mxu1 }
  0xfa   :  { %v337_v44 = vmul.f32 -1.442695, %v281_v42 }
  0xfb   :  { %v338_v47 = vmul.f32 -1.442695, %v291_v45 }
  0xfc   :  { %403 = vpow2.f32 %v337_v44 }
  0xfd   :  { %405 = vpow2.f32 %v338_v47 }
 0x106   :  { %v404_v51 = vpop.eup %403 }
 0x107   :  { %v285_v52 = vadd.f32 1.0, %v404_v51  ;;  %v406_v55 = vpop.eup %405 }
 0x108   :  { %v295_v56 = vadd.f32 1.0, %v406_v55 }
 0x109   :  { %407 = vrcp.f32 %v285_v52 }
 0x10a   :  { %409 = vrcp.f32 %v295_v56 }
 0x113   :  { %v408_v59 = vpop.eup %407 }
 0x114   :  { %v298_v60 = vmul.f32 %v408_v59, %v276_v57  ;;  %v410_v62 = vpop.eup %409 }
 0x115   :  { %v303_v63 = vsub.f32 1.0, %v410_v62  ;;  %v305_v1 = vmul.f32 %v410_v62, %v20_v23 }
 0x116   :  { %v301_v61 = vadd.f32 %v299_v58, %v298_v60 }
 0x118   :  { %411 = vtanh.f32 %v301_v61 }
 0x122   :  { %v412_v0 = vpop.eup %411 }
 0x123   :  { %v304_v2 = vmul.f32 %v412_v0, %v303_v63 }
 0x125   :  { %v306_v3 = vadd.f32 %v305_v1, %v304_v2 }
 0x127   :  { %307 = vst [vmem:[#allocation2] sm:$0x3] %v306_v3  ;;  %308 = vst [vmem:[%s520_s3] sm:$0x3] %v306_v3 }

// kernel: _lambda_.23
= control target key start
LH: loop header
LB: loop body
LE: loop exit
PB: predicated region body
PF: predicated region fallthrough
CT: control target
= control target key end

     0   :  { %s656_s12 = smov 0   ;;  %s760_s0 = inlined_call_operand.vmem [shape: f32[2,1,384], index: 0, kind: input, shape index: {}]   ;;  %s761_s1 = inlined_call_operand.vmem [shape: bf16[128,384], index: 1, kind: input, shape index: {}]   ;;  %s762_s2 = inlined_call_operand.vmem [shape: f32[1,384], index: 2, kind: input, shape index: {}]   ;;  %s763_s3 = inlined_call_operand.vmem [shape: f32[2,1,128], index: 3, kind: output, shape index: {}]  }
   0x1 LB: > { %s506_s13 = sadd.s32 4294967295, %s630_s12   ;;  %p510_p0 = scmp.ge.s32.totalorder %s630_s12, 1  ;;  %s630_s12 = sphi %s656_s12, %s13_s12  }
   0x2   : > { %p136_p1 = scmp.lt.s32.totalorder %s630_s12, 3 }
   0x4   : > { %p137_p2 = pnand %p510_p0, %p136_p1 }
   0x5   : > { %p157_p3 = scmp.lt.s32.totalorder (!%p137_p2), %s506_s13, 1  ;;  %p511_p4 = scmp.ne.s32.totalorder (!%p137_p2), %s506_s13, 0 }
   0x6   : > { %140 = sbr.rel (%p137_p2) target bundleno = 317 (0x13d), region = 32 }
   0xd   : > { %s664_s14 = scalar_select %p157_p3, %s506_s13, 1 }
   0xe   : > { %168 = sbr.rel (%p511_p4) target bundleno = 21 (0x15), region = 36  ;;  %v632_v0 = vmov (!%p511_p4), 0.0  }
   0xf   : > { %s569_s15 = smul.u32 3, %s664_s14  ;;  %s163_s18 = scalar_lea.vmem %s763_s3, %s664_s14  ;;  %169 = vst [vmem:[#allocation2] sm:$0x1] (!%p511_p4), %v632_v0 }
  0x11   : > { %s674_s21 = scalar_lea.vmem %s760_s0, %s569_s15 }
  0x15 PF: > { %v582_v1 = vld [vmem:[%s761_s1 + $0x4] ss:$12 sps:$4 sm:$0xff]   ;;  %v584_v2 = vld [vmem:[%s761_s1] ss:$12 sps:$4 sm:$0xff]   ;;  %v633_v3 = vmov 0.0   ;;  %v634_v4 = vmov 0   ;;  %v335_v29 = vlaneseq }
  0x16   : > { %549 = vmatprep.subr.bf16.mxu1 %v633_v3  ;;  %382 = vmatprep.mubr.bf16.mxu0 %v634_v4  ;;  %v585_v5 = vld [vmem:[%s761_s1 + $0x1c] ss:$12 sps:$4 sm:$0xff]   ;;  %vm635_vm0 = vmmov 0   ;;  %v587_v6 = vld [vmem:[%s761_s1 + $0x18] ss:$12 sps:$4 sm:$0xff]  }
  0x17   : > { %350 = vmatprep.subr.bf16.mxu0 %v582_v1  ;;  %565 = vmatprep.mubr.msk.bf16.mxu1 %vm635_vm0, %v633_v3  ;;  %v588_v7 = vld [vmem:[%s761_s1 + $0x34] ss:$12 sps:$4 sm:$0xff]   ;;  %v590_v8 = vld [vmem:[%s761_s1 + $0x30] ss:$12 sps:$4 sm:$0xff]   ;;  %v591_v9 = vld [vmem:[%s761_s1 + $0x4c] ss:$12 sps:$4 sm:$0xff]  }
  0x18   : > { %351 = vmatpush1.bf16.msra.mxu0 %v584_v2  ;;  %v603_v10 = vld [vmem:[%s761_s1 + $0x8] ss:$12 sps:$4 sm:$0xff]   ;;  %v594_v12 = vld [vmem:[%s761_s1 + $0x64] ss:$12 sps:$4 sm:$0xff]   ;;  %v607_v13 = vld [vmem:[%s761_s1 + $0x20] ss:$12 sps:$4 sm:$0xff]  }
  0x19   : > { %352 = vmatprep.subr.bf16.mxu0 %v585_v5  ;;  %v593_v11 = vld [vmem:[%s761_s1 + $0x48] ss:$12 sps:$4 sm:$0xff]   ;;  %550 = vmatpush3.bf16.msra.mxu1 %v603_v10  ;;  %v596_v14 = vld [vmem:[%s761_s1 + $0x60] ss:$12 sps:$4 sm:$0xff]   ;;  %v608_v16 = vld [vmem:[%s761_s1 + $0x38] ss:$12 sps:$4 sm:$0xff]  }
  0x1a   : > { %551 = vmatprep.subr.bf16.mxu1 %v633_v3  ;;  %v597_v15 = vld [vmem:[%s761_s1 + $0x7c] ss:$12 sps:$4 sm:$0xff]   ;;  %v599_v17 = vld [vmem:[%s761_s1 + $0x78] ss:$12 sps:$4 sm:$0xff]   ;;  %v600_v18 = vld [vmem:[%s761_s1 + $0x94] ss:$12 sps:$4 sm:$0xff]  }
  0x1b   : > { %v609_v19 = vld [vmem:[%s761_s1 + $0x50] ss:$12 sps:$4 sm:$0xff]   ;;  %v604_v21 = vld [vmem:[%s761_s1 + $0xac] ss:$12 sps:$4 sm:$0xff]   ;;  %v610_v22 = vld [vmem:[%s761_s1 + $0x68] ss:$12 sps:$4 sm:$0xff]  }
  0x1c   : > { %353 = vmatpush1.bf16.msra.mxu0 %v587_v6  ;;  %v602_v20 = vld [vmem:[%s761_s1 + $0x90] ss:$12 sps:$4 sm:$0xff]   ;;  %v606_v23 = vld [vmem:[%s761_s1 + $0xa8] ss:$12 sps:$4 sm:$0xff]   ;;  %v170_v24 = vld [vmem:[#allocation2] sm:$0x1] }
  0x1d   : > { %354 = vmatprep.subr.bf16.mxu0 %v588_v7  ;;  %552 = vmatpush3.bf16.msra.mxu1 %v607_v13  ;;  %v611_v25 = vld [vmem:[%s761_s1 + $0x80] ss:$12 sps:$4 sm:$0xff]   ;;  %v172_v26 = vpack.c.bf16 %v170_v24, %v170_v24  ;;  %v612_v27 = vld [vmem:[%s761_s1 + $0x98] ss:$12 sps:$4 sm:$0xff]   ;;  %v613_v28 = vld [vmem:[%s761_s1 + $0xb0] ss:$12 sps:$4 sm:$0xff]  }
  0x1e   : > { %553 = vmatprep.subr.bf16.mxu1 %v633_v3  ;;  %v336_v30 = vshrl.u32 %v335_v29, 7  ;;  %v205_v32 = vld [vmem:[%s762_s2] sm:$0x7] }
  0x1f   : > { %v171_v36 = vld [vmem:[%s674_s21] sm:$0x7] }
  0x20   : > { %355 = vmatpush1.bf16.msra.mxu0 %v590_v8  ;;  %v337_v31 = vsub.s32 0, %v336_v30  ;;  %v341_v33 = vsub.s32 1, %v336_v30  ;;  %v439_v41 = vrot.slane %v171_v36, 1  ;;  %v345_v54 = vsub.s32 2, %v336_v30 }
  0x21   : > { %356 = vmatprep.subr.bf16.mxu0 %v591_v9  ;;  %554 = vmatpush3.bf16.msra.mxu1 %v608_v16  ;;  %v449_v59 = vrot.slane %v171_v36, 2 }
  0x22   : > { %555 = vmatprep.subr.bf16.mxu1 %v633_v3  ;;  %v338_v34 = vrot.slane %v205_v32, %v337_v31  ;;  %v342_v35 = vrot.slane %v205_v32, %v341_v33  ;;  %v346_v55 = vrot.slane %v205_v32, %v345_v54 }
  0x24   : > { %357 = vmatpush1.bf16.msra.mxu0 %v593_v11 }
  0x25   : > { %358 = vmatprep.subr.bf16.mxu0 %v594_v12  ;;  %556 = vmatpush3.bf16.msra.mxu1 %v609_v19 }
  0x26   : > { %557 = vmatprep.subr.bf16.mxu1 %v633_v3 }
  0x28   : > { %359 = vmatpush1.bf16.msra.mxu0 %v596_v14 }
  0x29   : > { %360 = vmatprep.subr.bf16.mxu0 %v597_v15  ;;  %558 = vmatpush3.bf16.msra.mxu1 %v610_v22 }
  0x2a   : > { %559 = vmatprep.subr.bf16.mxu1 %v633_v3 }
  0x2c   : > { %361 = vmatpush1.bf16.msra.mxu0 %v599_v17 }
  0x2d   : > { %362 = vmatprep.subr.bf16.mxu0 %v600_v18  ;;  %560 = vmatpush3.bf16.msra.mxu1 %v611_v25 }
  0x2e   : > { %561 = vmatprep.subr.bf16.mxu1 %v633_v3 }
  0x30   : > { %363 = vmatpush1.bf16.msra.mxu0 %v602_v20 }
  0x31   : > { %364 = vmatprep.subr.bf16.mxu0 %v604_v21  ;;  %562 = vmatpush3.bf16.msra.mxu1 %v612_v27 }
  0x32   : > { %563 = vmatprep.subr.bf16.mxu1 %v633_v3 }
  0x34   : > { %365 = vmatpush1.bf16.msra.mxu0 %v606_v23 }
  0x35   : > { %564 = vmatpush3.bf16.msra.mxu1 %v613_v28 }
  0x37   : > { %383 = vmatmul.mubr.bf16.vlgmr.msra.gmra.mrb[0].mxu0 %v172_v26 }
  0x38   : > { %566 = vmatmul.mubr.bf16.vlgmr.msra.gmra.mrb[0].mxu1 %v172_v26 }
 0x10a   : > { %v384_v37 = vpop.f32.mrb[0].mxu0 }
 0x10b   : > { %v385_v38 = vadd.f32 %v384_v37, %v338_v34  ;;  %v386_v39 = vpop.f32.mrb[1].mxu0  ;;  %v425_v47 = vpop.f32.mrb[0].mxu1 }
 0x10c   : > { %v387_v40 = vadd.f32 %v386_v39, %v342_v35  ;;  %v388_v42 = vpop.f32.mrb[2].mxu0  ;;  %v567_v49 = vpop.f32.mrb[1].mxu1  ;;  %v426_v58 = vadd.f32 %v425_v47, %v346_v55 }
 0x10d   : > { %v431_v43 = vadd.f32 %v385_v38, %v171_v36  ;;  %v389_v44 = vpop.f32.mrb[3].mxu0  ;;  %v428_v50 = vpop.f32.mrb[2].mxu1 }
 0x10e   : > { %v441_v46 = vadd.f32 %v439_v41, %v387_v40  ;;  %v568_v51 = vpop.f32.mrb[3].mxu1 }
 0x10f   : > { %v536_v45 = vmul.f32 -1.442695, %v431_v43 }
 0x110   : > { %v537_v48 = vmul.f32 -1.442695, %v441_v46 }
 0x111   : > { %614 = vpow2.f32 %v536_v45 }
 0x112   : > { %616 = vpow2.f32 %v537_v48 }
 0x11b   : > { %v615_v52 = vpop.eup %614 }
 0x11c   : > { %v435_v53 = vadd.f32 1.0, %v615_v52  ;;  %v617_v56 = vpop.eup %616 }
 0x11d   : > { %v445_v57 = vadd.f32 1.0, %v617_v56 }
 0x11e   : > { %618 = vrcp.f32 %v435_v53 }
 0x11f   : > { %620 = vrcp.f32 %v445_v57 }
 0x128   : > { %v619_v60 = vpop.eup %618 }
 0x129   : > { %v448_v61 = vmul.f32 %v619_v60, %v426_v58  ;;  %v621_v63 = vpop.eup %620 }
 0x12a   : > { %v453_v0 = vsub.f32 1.0, %v621_v63  ;;  %v455_v2 = vmul.f32 %v621_v63, %v170_v24 }
 0x12b   : > { %v451_v62 = vadd.f32 %v449_v59, %v448_v61 }
 0x12d   : > { %622 = vtanh.f32 %v451_v62 }
 0x137   : > { %v623_v1 = vpop.eup %622 }
 0x138   : > { %v454_v3 = vmul.f32 %v623_v1, %v453_v0 }
 0x13a   : > { %v456_v4 = vadd.f32 %v455_v2, %v454_v3 }
 0x13c   : > { %457 = vst [vmem:[#allocation2] sm:$0x1] %v456_v4  ;;  %458 = vst [vmem:[%s163_s18] sm:$0x1] %v456_v4 }
 0x13d PF: > { %s13_s12 = sadd.s32 1, %s630_s12  }
 0x13e   : > { %p10_p5 = scmp.ge.s32.totalorder %s13_s12, 4  }
 0x140   :  { %12 = sbr.rel (!%p10_p5) target bundleno = 1 (0x1), region = 66 }

// kernel: _lambda_.22
= control target key start
LH: loop header
LB: loop body
LE: loop exit
PB: predicated region body
PF: predicated region fallthrough
CT: control target
= control target key end

     0   :  { %v82_v28 = vlaneseq  ;;  %v621_v29 = vmov 1966171168   ;;  %s803_s1 = inlined_call_operand.vmem [shape: bf16[256,384], index: 1, kind: input, shape index: {}]   ;;  %s804_s0 = inlined_call_operand.vmem [shape: bf16[2,256], index: 0, kind: input, shape index: {}]   ;;  %s805_s2 = inlined_call_operand.vmem [shape: f32[1,384], index: 2, kind: input, shape index: {}]   ;;  %s806_s3 = inlined_call_operand.vmem [shape: f32[2,384], index: 3, kind: output, shape index: {}]  }
   0x1   :  { %v557_v0 = vld [vmem:[%s803_s1 + $0x4] ss:$12 sps:$4 sm:$0xff]   ;;  %v559_v1 = vld [vmem:[%s803_s1] ss:$12 sps:$4 sm:$0xff]   ;;  %v560_v2 = vld [vmem:[%s803_s1 + $0x1c] ss:$12 sps:$4 sm:$0xff]   ;;  %v107_v30 = vunpack.c.l.s4 %v621_v29 }
   0x2   :  { %378 = vmatprep.subr.bf16.mxu0 %v557_v0  ;;  %v562_v3 = vld [vmem:[%s803_s1 + $0x18] ss:$12 sps:$4 sm:$0xff]   ;;  %v563_v4 = vld [vmem:[%s803_s1 + $0x34] ss:$12 sps:$4 sm:$0xff]   ;;  %v565_v5 = vld [vmem:[%s803_s1 + $0x30] ss:$12 sps:$4 sm:$0xff]  }
   0x3   :  { %379 = vmatpush1.bf16.msra.mxu0 %v559_v1  ;;  %v566_v6 = vld [vmem:[%s803_s1 + $0x4c] ss:$12 sps:$4 sm:$0xff]   ;;  %v568_v7 = vld [vmem:[%s803_s1 + $0x48] ss:$12 sps:$4 sm:$0xff]   ;;  %v569_v8 = vld [vmem:[%s803_s1 + $0x64] ss:$12 sps:$4 sm:$0xff]   ;;  %v108_v36 = vunpack.c.0.s8 %v107_v30 }
   0x4   :  { %380 = vmatprep.subr.bf16.mxu0 %v560_v2  ;;  %v581_v9 = vld [vmem:[%s803_s1 + $0xc8] ss:$12 sps:$4 sm:$0xff]   ;;  %v571_v11 = vld [vmem:[%s803_s1 + $0x60] ss:$12 sps:$4 sm:$0xff]   ;;  %v574_v15 = vld [vmem:[%s803_s1 + $0x78] ss:$12 sps:$4 sm:$0xff]  }
   0x5   :  { %v582_v10 = vld [vmem:[%s803_s1 + $0x8] ss:$12 sps:$4 sm:$0xff]   ;;  %533 = vmatprep.subr.bf16.mxu1 %v581_v9  ;;  %v586_v12 = vld [vmem:[%s803_s1 + $0xe0] ss:$12 sps:$4 sm:$0xff]   ;;  %v591_v16 = vld [vmem:[%s803_s1 + $0xf8] ss:$12 sps:$4 sm:$0xff]  }
   0x6   :  { %534 = vmatpush3.bf16.msra.mxu1 %v582_v10  ;;  %v587_v13 = vld [vmem:[%s803_s1 + $0x20] ss:$12 sps:$4 sm:$0xff]   ;;  %v572_v14 = vld [vmem:[%s803_s1 + $0x7c] ss:$12 sps:$4 sm:$0xff]   ;;  %v592_v17 = vld [vmem:[%s803_s1 + $0x38] ss:$12 sps:$4 sm:$0xff]  }
   0x7   :  { %381 = vmatpush1.bf16.msra.mxu0 %v562_v3  ;;  %535 = vmatprep.subr.bf16.mxu1 %v586_v12  ;;  %v575_v18 = vld [vmem:[%s803_s1 + $0x94] ss:$12 sps:$4 sm:$0xff]   ;;  %v596_v19 = vld [vmem:[%s803_s1 + $0x110] ss:$12 sps:$4 sm:$0xff]   ;;  %v578_v22 = vld [vmem:[%s803_s1 + $0xac] ss:$12 sps:$4 sm:$0xff]  }
   0x8   :  { %382 = vmatprep.subr.bf16.mxu0 %v563_v4  ;;  %v597_v20 = vld [vmem:[%s803_s1 + $0x50] ss:$12 sps:$4 sm:$0xff]   ;;  %v601_v23 = vld [vmem:[%s803_s1 + $0x128] ss:$12 sps:$4 sm:$0xff]   ;;  %v606_v27 = vld [vmem:[%s803_s1 + $0x140] ss:$12 sps:$4 sm:$0xff]  }
   0x9   :  { %v577_v21 = vld [vmem:[%s803_s1 + $0x90] ss:$12 sps:$4 sm:$0xff]   ;;  %v580_v24 = vld [vmem:[%s803_s1 + $0xa8] ss:$12 sps:$4 sm:$0xff]   ;;  %v585_v31 = vld [vmem:[%s803_s1 + $0xc0] ss:$12 sps:$4 sm:$0xff]  }
   0xa   :  { %536 = vmatpush3.bf16.msra.mxu1 %v587_v13  ;;  %v602_v25 = vld [vmem:[%s803_s1 + $0x68] ss:$12 sps:$4 sm:$0xff]   ;;  %v583_v26 = vld [vmem:[%s803_s1 + $0xc4] ss:$12 sps:$4 sm:$0xff]   ;;  %v607_v32 = vld [vmem:[%s803_s1 + $0x80] ss:$12 sps:$4 sm:$0xff]  }
   0xb   :  { %383 = vmatpush1.bf16.msra.mxu0 %v565_v5  ;;  %537 = vmatprep.subr.bf16.mxu1 %v591_v16  ;;  %v611_v33 = vld [vmem:[%s803_s1 + $0x158] ss:$12 sps:$4 sm:$0xff]   ;;  %v588_v34 = vld [vmem:[%s803_s1 + $0xdc] ss:$12 sps:$4 sm:$0xff]   ;;  %v739_v35 = vshrl.u32 %v82_v28, 7 }
   0xc   :  { %384 = vmatprep.subr.bf16.mxu0 %v566_v6  ;;  %v590_v37 = vld [vmem:[%s803_s1 + $0xd8] ss:$12 sps:$4 sm:$0xff]   ;;  %v616_v39 = vld [vmem:[%s803_s1 + $0x170] ss:$12 sps:$4 sm:$0xff]   ;;  %v593_v40 = vld [vmem:[%s803_s1 + $0xf4] ss:$12 sps:$4 sm:$0xff]  }
   0xd   :  { %v612_v38 = vld [vmem:[%s803_s1 + $0x98] ss:$12 sps:$4 sm:$0xff]   ;;  %v111_v41 = vsub.s32 %v108_v36, %v739_v35  ;;  %v484_v42 = vld.sshfl [vmem:[%s804_s0] sm:$0x11 pattern:$0x75316420] }
   0xe   :  { %538 = vmatpush3.bf16.msra.mxu1 %v592_v17  ;;  %v617_v43 = vld [vmem:[%s803_s1 + $0xb0] ss:$12 sps:$4 sm:$0xff]   ;;  %v105_v44 = vcombine.high %v484_v42, %v484_v42  ;;  %v598_v46 = vld [vmem:[%s803_s1 + $0x10c] ss:$12 sps:$4 sm:$0xff]   ;;  %v600_v49 = vld [vmem:[%s803_s1 + $0x108] ss:$12 sps:$4 sm:$0xff]  }
   0xf   :  { %385 = vmatpush1.bf16.msra.mxu0 %v568_v7  ;;  %539 = vmatprep.subr.bf16.mxu1 %v596_v19  ;;  %v595_v45 = vld [vmem:[%s803_s1 + $0xf0] ss:$12 sps:$4 sm:$0xff]   ;;  %v112_v48 = vrot.slane %v484_v42, %v111_v41  ;;  %v605_v51 = vld [vmem:[%s803_s1 + $0x120] ss:$12 sps:$4 sm:$0xff]   ;;  %v610_v53 = vld [vmem:[%s803_s1 + $0x138] ss:$12 sps:$4 sm:$0xff]  }
  0x10   :  { %386 = vmatprep.subr.bf16.mxu0 %v569_v8  ;;  %v119_v47 = vrot.slane %v105_v44, %v111_v41  ;;  %v603_v50 = vld [vmem:[%s803_s1 + $0x124] ss:$12 sps:$4 sm:$0xff]   ;;  %v608_v52 = vld [vmem:[%s803_s1 + $0x13c] ss:$12 sps:$4 sm:$0xff]   ;;  %v613_v54 = vld [vmem:[%s803_s1 + $0x154] ss:$12 sps:$4 sm:$0xff]  }
  0x11   :  { %v615_v55 = vld [vmem:[%s803_s1 + $0x150] ss:$12 sps:$4 sm:$0xff]   ;;  %v618_v56 = vld [vmem:[%s803_s1 + $0x16c] ss:$12 sps:$4 sm:$0xff]   ;;  %v620_v57 = vld [vmem:[%s803_s1 + $0x168] ss:$12 sps:$4 sm:$0xff]  }
  0x12   :  { %540 = vmatpush3.bf16.msra.mxu1 %v597_v20  ;;  %451 = vmatprep.mubr.bf16.mxu1 %v119_v47  ;;  %v92_v63 = vsub.s32 2, %v739_v35  ;;  %v622_v0 = vmov 1983009808   ;;  %v84_v2 = vsub.s32 0, %v739_v35  ;;  %v80_v3 = vld [vmem:[%s805_s2] sm:$0x7] }
  0x13   :  { %387 = vmatpush1.bf16.msra.mxu0 %v571_v11  ;;  %541 = vmatprep.subr.bf16.mxu1 %v601_v23  ;;  %v464_v1 = vunpack.c.l.s4 %v622_v0  ;;  %v88_v4 = vsub.s32 1, %v739_v35 }
  0x14   :  { %388 = vmatprep.subr.bf16.mxu0 %v572_v14  ;;  %410 = vmatprep.mubr.bf16.mxu0 %v119_v47  ;;  %v93_v5 = vrot.slane %v80_v3, %v92_v63  ;;  %v85_v7 = vrot.slane %v80_v3, %v84_v2 }
  0x15   :  { %v465_v6 = vunpack.c.0.s8 %v464_v1  ;;  %v89_v8 = vrot.slane %v80_v3, %v88_v4 }
  0x16   :  { %542 = vmatpush3.bf16.msra.mxu1 %v602_v25 }
  0x17   :  { %389 = vmatpush1.bf16.msra.mxu0 %v574_v15  ;;  %543 = vmatprep.subr.bf16.mxu1 %v606_v27  ;;  %v468_v10 = vsub.s32 %v465_v6, %v739_v35 }
  0x18   :  { %390 = vmatprep.subr.bf16.mxu0 %v575_v18 }
  0x1a   :  { %544 = vmatpush3.bf16.msra.mxu1 %v607_v32 }
  0x1b   :  { %391 = vmatpush1.bf16.msra.mxu0 %v577_v21  ;;  %545 = vmatprep.subr.bf16.mxu1 %v611_v33 }
  0x1c   :  { %392 = vmatprep.subr.bf16.mxu0 %v578_v22 }
  0x1e   :  { %546 = vmatpush3.bf16.msra.mxu1 %v612_v38 }
  0x1f   :  { %393 = vmatpush1.bf16.msra.mxu0 %v580_v24  ;;  %547 = vmatprep.subr.bf16.mxu1 %v616_v39 }
  0x20   :  { %394 = vmatprep.subr.bf16.mxu0 %v583_v26 }
  0x22   :  { %548 = vmatpush3.bf16.msra.mxu1 %v617_v43 }
  0x23   :  { %395 = vmatpush1.bf16.msra.mxu0 %v585_v31 }
  0x24   :  { %396 = vmatprep.subr.bf16.mxu0 %v588_v34 }
  0x25   :  { %452 = vmatmul.mubr.bf16.vlgmr.msra.gmra.mrb[0].mxu1 %v112_v48 }
  0x27   :  { %397 = vmatpush1.bf16.msra.mxu0 %v590_v37 }
  0x28   :  { %398 = vmatprep.subr.bf16.mxu0 %v593_v40 }
  0x2b   :  { %399 = vmatpush1.bf16.msra.mxu0 %v595_v45 }
  0x2c   :  { %400 = vmatprep.subr.bf16.mxu0 %v598_v46 }
  0x2f   :  { %401 = vmatpush1.bf16.msra.mxu0 %v600_v49 }
  0x30   :  { %402 = vmatprep.subr.bf16.mxu0 %v603_v50 }
  0x33   :  { %403 = vmatpush1.bf16.msra.mxu0 %v605_v51 }
  0x34   :  { %404 = vmatprep.subr.bf16.mxu0 %v608_v52 }
  0x37   :  { %405 = vmatpush1.bf16.msra.mxu0 %v610_v53 }
  0x38   :  { %406 = vmatprep.subr.bf16.mxu0 %v613_v54 }
  0x3b   :  { %407 = vmatpush1.bf16.msra.mxu0 %v615_v55 }
  0x3c   :  { %408 = vmatprep.subr.bf16.mxu0 %v618_v56 }
  0x3f   :  { %409 = vmatpush1.bf16.msra.mxu0 %v620_v57 }
  0x42   :  { %411 = vmatmul.mubr.bf16.vlgmr.msra.gmra.mrb[0].mxu0 %v112_v48 }
  0xf8   :  { %v549_v58 = vpop.f32.mrb[0].mxu1 }
  0xf9   :  { %v550_v59 = vpop.f32.mrb[1].mxu1 }
  0xfa   :  { %v551_v60 = vadd.f32 %v550_v59, %v549_v58  ;;  %v552_v61 = vpop.f32.mrb[2].mxu1 }
  0xfb   :  { %v553_v62 = vpop.f32.mrb[3].mxu1 }
  0xfc   :  { %v454_v9 = vadd.f32 %v551_v60, %v93_v5 }
  0xfe   :  { %v476_v17 = vrot.slane %v454_v9, %v468_v10 }
 0x115   :  { %v412_v11 = vpop.f32.mrb[0].mxu0 }
 0x116   :  { %v413_v12 = vadd.f32 %v412_v11, %v85_v7  ;;  %v414_v13 = vpop.f32.mrb[1].mxu0 }
 0x117   :  { %v415_v14 = vadd.f32 %v414_v13, %v89_v8  ;;  %v416_v15 = vpop.f32.mrb[2].mxu0 }
 0x118   :  { %v417_v16 = vpop.f32.mrb[3].mxu0 }
 0x119   :  { %v462_v18 = vcombine.low %v413_v12, %v415_v14 }
 0x11b   :  { %v469_v19 = vrot.slane %v462_v18, %v468_v10 }
 0x11d   :  { %v477_v20 = vcombine.low %v469_v19, %v476_v17 }
 0x11f   :  { %479 = vst [vmem:[%s806_s3] sm:$0x3f] %v477_v20 }

</bundles_post_ra>
